<compile_context>
chip_gen: v5e
topology: v5e:2x2
jax: 0.10.0
libtpu: 0.0.40
codegen_flags: <defaults>
</compile_context>

<pallas_src>
import functools

import jax
import jax.numpy as jnp
from jax import lax
from jax.experimental import pallas as pl
from jax.experimental.pallas import tpu as pltpu

LANE = 128
SUBLANE = 8

_VMEM = pl.BlockSpec(memory_space=pltpu.MemorySpace.VMEM)
_SMEM = pl.BlockSpec(memory_space=pltpu.MemorySpace.SMEM)


def _round_up(x, m):
    return (x + m - 1) // m * m


# --------------------------------------------------------------------------
# Encoder: single-layer GRU over the whole sequence in one kernel.
# PyTorch nn.GRU gate order: r, z, n.
# --------------------------------------------------------------------------
def encoder_gru_kernel(x_ref, wih_ref, whh_ref, bih_ref, bhh_ref, hfin_ref,
                       gi_ref):
    # x_ref  : (S*Bp, Ep)   bf16  time-major embedded input, flattened
    # wih_ref: (Ep, 3*Hp)   bf16  pre-transposed, per-gate padded
    # whh_ref: (Hp, 3*Hp)   bf16
    # biases : (1, 3*Hp)    f32
    # hfin   : (Bp, Hp)     f32   final hidden state
    # gi_ref : (S, Bp, 3Hp) f32   scratch for the hoisted input matmul
    S, B, G = gi_ref.shape
    H = hfin_ref.shape[1]

    # Hoisted input-to-hidden matmul over ALL timesteps at once (M = S*Bp).
    gi_all = jnp.dot(x_ref[...], wih_ref[...],
                     preferred_element_type=jnp.float32)
    gi_all = gi_all + jnp.broadcast_to(bih_ref[...], (S * B, G))
    gi_ref[...] = gi_all.reshape(S, B, G)

    whh = whh_ref[...]
    bhh = jnp.broadcast_to(bhh_ref[...], (B, G))   # hoisted out of recurrence

    def step(t, h):
        gi = gi_ref[t]
        gh = jnp.dot(h.astype(jnp.bfloat16), whh,
                     preferred_element_type=jnp.float32) + bhh
        r = jax.nn.sigmoid(gi[:, 0 * H:1 * H] + gh[:, 0 * H:1 * H])
        z = jax.nn.sigmoid(gi[:, 1 * H:2 * H] + gh[:, 1 * H:2 * H])
        n = jnp.tanh(gi[:, 2 * H:3 * H] + r * gh[:, 2 * H:3 * H])
        return (1.0 - z) * n + z * h

    h0 = jnp.zeros((B, H), jnp.float32)
    hfin_ref[...] = lax.fori_loop(0, S, step, h0,
                                  unroll=(True if S <= 16 else 4))


# --------------------------------------------------------------------------
# Decoder: whole autoregressive loop fused in one kernel.
# PyTorch nn.LSTM gate order: i, f, g, o.  Embedding is pre-folded into the
# input gate weights (W_ve), so each step is 2 dependent matmuls (gates, FC).
# --------------------------------------------------------------------------
def decoder_seq_kernel(tf_ref, tgt_ref, h0_ref, wve_ref, whh_ref, bg_ref,
                       wfc_ref, bfc_ref, out_ref, *, v_real):
    # tf_ref  : (T,)        int32 (SMEM) teacher-forcing flags
    # tgt_ref : (T, Bp, 1)  int32 target tokens, time-major
    # h0_ref  : (Bp, Hp)    f32   encoder final hidden
    # wve_ref : (Vp, 4Hp)   bf16  dec_emb @ W_ih^T (embedding folded in)
    # whh_ref : (Hp, 4Hp)   bf16  W_hh^T, per-gate padded
    # bg_ref  : (1, 4Hp)    f32   b_ih + b_hh
    # wfc_ref : (Hp, Vp)    bf16  FC weight, pre-transposed
    # bfc_ref : (1, Vp)     f32
    # out_ref : (T, Bp, Vp) f32   logits per step (row 0 stays zero)
    T, B, V = out_ref.shape
    H = h0_ref.shape[1]

    wve = wve_ref[...]
    whh = whh_ref[...]
    wfc = wfc_ref[...]
    bg = jnp.broadcast_to(bg_ref[...], (B, 4 * H))
    bfc = jnp.broadcast_to(bfc_ref[...], (B, V))

    lane_ids = lax.broadcasted_iota(jnp.int32, (B, V), 1)
    # logits stay f32, so a large finite negative is a safe pad mask
    pad_mask = jnp.where(lane_ids < v_real, 0.0, -1e30)

    out_ref[0] = jnp.zeros((B, V), jnp.float32)            # outputs[:, 0, :] == 0

    def step(t, carry):
        h, c, x_oh = carry                                  # f32, f32, bf16 (B,Vp)
        # x-gate and h-gate matmuls are independent; only the h one is serial.
        gates = (jnp.dot(x_oh, wve, preferred_element_type=jnp.float32)
                 + jnp.dot(h.astype(jnp.bfloat16), whh,
                           preferred_element_type=jnp.float32)
                 + bg)                                      # (B, 4Hp)
        i = jax.nn.sigmoid(gates[:, 0 * H:1 * H])
        f = jax.nn.sigmoid(gates[:, 1 * H:2 * H])
        g = jnp.tanh(gates[:, 2 * H:3 * H])
        o = jax.nn.sigmoid(gates[:, 3 * H:4 * H])
        c_new = f * c + i * g
        h_new = o * jnp.tanh(c_new)
        logits = jnp.dot(h_new.astype(jnp.bfloat16), wfc,
                         preferred_element_type=jnp.float32) + bfc   # (B, Vp)
        out_ref[t] = logits

        # argmax over the real vocab (first maximal index)
        masked = logits + pad_mask
        m = jnp.max(masked, axis=1, keepdims=True)
        idx_of_max = jnp.where(masked == m, lane_ids, V)
        top1 = jnp.min(idx_of_max, axis=1, keepdims=True)            # (B, 1) int32

        # teacher forcing: one shared Bernoulli decision per timestep;
        # select in token space, then build a single one-hot in-kernel.
        next_tok = jnp.where(tf_ref[t] > 0, tgt_ref[t], top1)        # (B, 1)
        next_oh = (lane_ids == next_tok).astype(jnp.bfloat16)        # (B, Vp)
        return h_new, c_new, next_oh

    c0 = jnp.zeros((B, H), jnp.float32)
    x0 = (lane_ids == tgt_ref[0]).astype(jnp.bfloat16)   # decoder_input = target[:, 0]
    lax.fori_loop(1, T, step, (h0_ref[...], c0, x0),
                  unroll=(True if T <= 16 else 4))


# --------------------------------------------------------------------------
# Parameter preparation: transpose / per-gate pad / fold embedding / bf16 ONCE.
# --------------------------------------------------------------------------
def prepare_params(params, vocab, embed, hidden):
    H, E, V = hidden, embed, vocab
    Hp, Ep, Vp = _round_up(H, LANE), _round_up(E, LANE), _round_up(V, LANE)
    bf16 = jnp.bfloat16

    def pad_to(x, shape):
        return jnp.pad(x, [(0, s - d) for d, s in zip(x.shape, shape)])

    def pad_gates(w_t, n_gates):
        # w_t: (rows, n_gates*H). Pad each gate's H block to Hp so in-kernel
        # gate slices [k*Hp:(k+1)*Hp] stay 128-aligned.
        rows = w_t.shape[0]
        w3 = w_t.reshape(rows, n_gates, H)
        w3 = jnp.pad(w3, ((0, 0), (0, 0), (0, Hp - H)))
        return w3.reshape(rows, n_gates * Hp)

    # encoder GRU (gate order r, z, n)
    enc_wih = pad_to(pad_gates(params["enc_wih"].T, 3), (Ep, 3 * Hp)).astype(bf16)
    enc_whh = pad_to(pad_gates(params["enc_whh"].T, 3), (Hp, 3 * Hp)).astype(bf16)
    enc_bih = pad_gates(params["enc_bih"], 3).astype(jnp.float32)
    enc_bhh = pad_gates(params["enc_bhh"], 3).astype(jnp.float32)

    # decoder LSTM (gate order i, f, g, o):
    # fold the embedding into the input gate weights (f32 fold, then bf16).
    wve = params["dec_emb"] @ params["dec_wih"].T                    # (V, 4H)
    dec_wve = pad_to(pad_gates(wve, 4), (Vp, 4 * Hp)).astype(bf16)   # (Vp, 4Hp)
    dec_whh = pad_to(pad_gates(params["dec_whh"].T, 4), (Hp, 4 * Hp)).astype(bf16)
    dec_bg = pad_gates(params["dec_bih"] + params["dec_bhh"], 4).astype(jnp.float32)

    fc_w = pad_to(params["fc_w"].T, (Hp, Vp)).astype(bf16)           # (Hp, Vp)
    fc_b = pad_to(params["fc_b"], (1, Vp)).astype(jnp.float32)

    enc_emb = pad_to(params["enc_emb"], (Vp, Ep)).astype(bf16)

    return {
        "enc_emb": enc_emb, "enc_wih": enc_wih, "enc_whh": enc_whh,
        "enc_bih": enc_bih, "enc_bhh": enc_bhh,
        "dec_wve": dec_wve, "dec_whh": dec_whh, "dec_bg": dec_bg,
        "fc_w": fc_w, "fc_b": fc_b,
    }


# --------------------------------------------------------------------------
# Seq2Seq.forward (jitted)
# --------------------------------------------------------------------------
@functools.partial(jax.jit, static_argnames=("vocab",))
def seq2seq_forward(prep, inp_tokens, tgt_tokens, key,
                    teacher_forcing_ratio=0.5, *, vocab):
    B, S = inp_tokens.shape
    T = tgt_tokens.shape[1]
    Bp = _round_up(B, SUBLANE)
    Vp = prep["fc_b"].shape[1]
    Hp = prep["fc_w"].shape[0]
    Ep = prep["enc_emb"].shape[1]

    pad_b = Bp - B
    inp_p = jnp.pad(inp_tokens, ((0, pad_b), (0, 0)))
    tgt_p = jnp.pad(tgt_tokens, ((0, pad_b), (0, 0)))

    # ---- encoder: gather embeddings already time-major (no HBM transpose of
    #      the activation); encoder_output is never used by the PyTorch forward ----
    x_emb_tm = jnp.take(prep["enc_emb"], jnp.transpose(inp_p), axis=0)  # (S, Bp, Ep)
    x_flat = x_emb_tm.reshape(S * Bp, Ep)                               # bf16

    hidden = pl.pallas_call(
        encoder_gru_kernel,
        out_shape=jax.ShapeDtypeStruct((Bp, Hp), jnp.float32),
        in_specs=[_VMEM] * 5,
        out_specs=_VMEM,
        scratch_shapes=[pltpu.VMEM((S, Bp, 3 * Hp), jnp.float32)],
    )(x_flat, prep["enc_wih"], prep["enc_whh"],
      prep["enc_bih"], prep["enc_bhh"])

    # ---- decoder: whole autoregressive loop fused into one kernel ----
    # deterministic stand-in for per-step random.random() < ratio
    tf_mask = (jax.random.uniform(key, (T,)) < teacher_forcing_ratio).astype(jnp.int32)
    tgt_tm = jnp.transpose(tgt_p)[:, :, None].astype(jnp.int32)       # (T, Bp, 1)

    out_tm = pl.pallas_call(
        functools.partial(decoder_seq_kernel, v_real=vocab),
        out_shape=jax.ShapeDtypeStruct((T, Bp, Vp), jnp.float32),
        in_specs=[_SMEM] + [_VMEM] * 7,
        out_specs=_VMEM,
    )(tf_mask, tgt_tm, hidden, prep["dec_wve"], prep["dec_whh"],
      prep["dec_bg"], prep["fc_w"], prep["fc_b"])

    # (T, Bp, Vp) -> (B, T, V)
    outputs = jnp.transpose(out_tm[:, :B, :vocab], (1, 0, 2))
    # TODO(synk): the reference PyTorch forward has no `return` (returns None);
    # we return the `outputs` buffer it fills.
    return outputs


# --------------------------------------------------------------------------
# Deterministic parameter init (PyTorch-layout params)
# --------------------------------------------------------------------------
def init_params(key, vocab, embed, hidden):
    ks = jax.random.split(key, 12)
    u = lambda k, shape, s=0.1: jax.random.uniform(k, shape, jnp.float32, -s, s)
    return {
        "enc_emb": u(ks[0], (vocab, embed)),
        "enc_wih": u(ks[1], (3 * hidden, embed)),
        "enc_whh": u(ks[2], (3 * hidden, hidden)),
        "enc_bih": u(ks[3], (1, 3 * hidden)),
        "enc_bhh": u(ks[4], (1, 3 * hidden)),
        "dec_emb": u(ks[5], (vocab, embed)),
        "dec_wih": u(ks[6], (4 * hidden, embed)),
        "dec_whh": u(ks[7], (4 * hidden, hidden)),
        "dec_bih": u(ks[8], (1, 4 * hidden)),
        "dec_bhh": u(ks[9], (1, 4 * hidden)),
        "fc_w":    u(ks[10], (vocab, hidden)),
        "fc_b":    u(ks[11], (1, vocab)),
    }


if __name__ == "__main__":
    B, S, T = 2, 8, 8
    VOCAB, EMBED, HIDDEN = 32, 16, 32

    root = jax.random.PRNGKey(0)
    k_params, k_inp, k_tgt, k_tf = jax.random.split(root, 4)

    params = init_params(k_params, VOCAB, EMBED, HIDDEN)
    prep = prepare_params(params, VOCAB, EMBED, HIDDEN)   # once, outside the jit

    inp = jax.random.randint(k_inp, (B, S), 0, VOCAB, dtype=jnp.int32)
    tgt = jax.random.randint(k_tgt, (B, T), 0, VOCAB, dtype=jnp.int32)

    out = seq2seq_forward(prep, inp, tgt, k_tf, 0.5, vocab=VOCAB)
    out = jax.block_until_ready(out)

    assert out.shape == (B, T, VOCAB)
    assert bool(jnp.all(out[:, 0, :] == 0.0))
    print("KERNEL_OK")
</pallas_src>

<mosaic_0001>
module attributes {stable_mosaic.version = 11 : i64} {
  func.func @encoder_gru_kernel(%arg0: memref<64x128xbf16, #tpu.memory_space<vmem>>, %arg1: memref<128x384xbf16, #tpu.memory_space<vmem>>, %arg2: memref<128x384xbf16, #tpu.memory_space<vmem>>, %arg3: memref<1x384xf32, #tpu.memory_space<vmem>>, %arg4: memref<1x384xf32, #tpu.memory_space<vmem>>, %arg5: memref<8x128xf32, #tpu.memory_space<vmem>>, %arg6: memref<8x8x384xf32, #tpu.memory_space<vmem>>) attributes {dimension_semantics = [], scalar_prefetch = 0 : i64, scratch_operands = 1 : i64, tpu.core_type = #tpu.core_type<tc>} {
    %c0 = arith.constant 0 : index
    %c0_0 = arith.constant 0 : index
    %0 = vector.load %arg0[%c0, %c0_0] : memref<64x128xbf16, #tpu.memory_space<vmem>>, vector<64x128xbf16>
    %c0_1 = arith.constant 0 : index
    %c0_2 = arith.constant 0 : index
    %1 = vector.load %arg1[%c0_1, %c0_2] : memref<128x384xbf16, #tpu.memory_space<vmem>>, vector<128x384xbf16>
    %cst = arith.constant dense<0.000000e+00> : vector<64x384xf32>
    %2 = tpu.matmul %0, %1, %cst {dimension_numbers = #tpu.dot_dimension_numbers<[1], [0], [0], [1], [0, 0, 1, 1], [], []>} : vector<64x128xbf16>, vector<128x384xbf16>, vector<64x384xf32> -> vector<64x384xf32>
    %c0_3 = arith.constant 0 : index
    %c0_4 = arith.constant 0 : index
    %3 = vector.load %arg3[%c0_3, %c0_4] : memref<1x384xf32, #tpu.memory_space<vmem>>, vector<1x384xf32>
    %4 = vector.shape_cast %3 : vector<1x384xf32> to vector<1x384xf32>
    %5 = vector.broadcast %4 : vector<1x384xf32> to vector<64x384xf32>
    %6 = arith.addf %2, %5 : vector<64x384xf32>
    %7 = vector.shape_cast %6 : vector<64x384xf32> to vector<8x8x384xf32>
    %c0_5 = arith.constant 0 : index
    %c0_6 = arith.constant 0 : index
    %c0_7 = arith.constant 0 : index
    %8 = vector.load %arg6[%c0_5, %c0_6, %c0_7] : memref<8x8x384xf32, #tpu.memory_space<vmem>>, vector<8x8x384xf32>
    tpu.vector_store %arg6[%c0_5, %c0_6, %c0_7], %7 {strides = array<i32>} : memref<8x8x384xf32, #tpu.memory_space<vmem>>, vector<8x8x384xf32>,
    %c0_8 = arith.constant 0 : index
    %c0_9 = arith.constant 0 : index
    %9 = vector.load %arg2[%c0_8, %c0_9] : memref<128x384xbf16, #tpu.memory_space<vmem>>, vector<128x384xbf16>
    %c0_10 = arith.constant 0 : index
    %c0_11 = arith.constant 0 : index
    %10 = vector.load %arg4[%c0_10, %c0_11] : memref<1x384xf32, #tpu.memory_space<vmem>>, vector<1x384xf32>
    %11 = vector.shape_cast %10 : vector<1x384xf32> to vector<1x384xf32>
    %12 = vector.broadcast %11 : vector<1x384xf32> to vector<8x384xf32>
    %cst_12 = arith.constant 0.000000e+00 : f32
    %13 = vector.broadcast %cst_12 : f32 to vector<8x128xf32>
    %c0_i32 = arith.constant 0 : i32
    %14 = arith.index_cast %c0_i32 : i32 to index
    %c0_13 = arith.constant 0 : index
    %c0_14 = arith.constant 0 : index
    %15 = vector.load %arg6[%14, %c0_13, %c0_14] : memref<8x8x384xf32, #tpu.memory_space<vmem>>, vector<1x8x384xf32>
    %16 = vector.shape_cast %15 : vector<1x8x384xf32> to vector<8x384xf32>
    %17 = arith.truncf %13 : vector<8x128xf32> to vector<8x128xbf16>
    %cst_15 = arith.constant dense<0.000000e+00> : vector<8x384xf32>
    %18 = tpu.matmul %17, %9, %cst_15 {dimension_numbers = #tpu.dot_dimension_numbers<[1], [0], [0], [1], [0, 0, 1, 1], [], []>} : vector<8x128xbf16>, vector<128x384xbf16>, vector<8x384xf32> -> vector<8x384xf32>
    %19 = arith.addf %18, %12 : vector<8x384xf32>
    %20 = vector.extract_strided_slice %16 {offsets = [0, 0], sizes = [8, 128], strides = [1, 1]} : vector<8x384xf32> to vector<8x128xf32>
    %21 = vector.extract_strided_slice %19 {offsets = [0, 0], sizes = [8, 128], strides = [1, 1]} : vector<8x384xf32> to vector<8x128xf32>
    %22 = arith.addf %20, %21 : vector<8x128xf32>
    %23 = arith.negf %22 : vector<8x128xf32>
    %24 = math.exp %23 : vector<8x128xf32>
    %cst_16 = arith.constant 1.000000e+00 : f32
    %25 = vector.broadcast %cst_16 : f32 to vector<8x128xf32>
    %26 = arith.addf %25, %24 : vector<8x128xf32>
    %27 = arith.divf %25, %26 : vector<8x128xf32>
    %28 = vector.extract_strided_slice %16 {offsets = [0, 128], sizes = [8, 128], strides = [1, 1]} : vector<8x384xf32> to vector<8x128xf32>
    %29 = vector.extract_strided_slice %19 {offsets = [0, 128], sizes = [8, 128], strides = [1, 1]} : vector<8x384xf32> to vector<8x128xf32>
    %30 = arith.addf %28, %29 : vector<8x128xf32>
    %31 = arith.negf %30 : vector<8x128xf32>
    %32 = math.exp %31 : vector<8x128xf32>
    %cst_17 = arith.constant 1.000000e+00 : f32
    %33 = vector.broadcast %cst_17 : f32 to vector<8x128xf32>
    %34 = arith.addf %33, %32 : vector<8x128xf32>
    %35 = arith.divf %33, %34 : vector<8x128xf32>
    %36 = vector.extract_strided_slice %16 {offsets = [0, 256], sizes = [8, 128], strides = [1, 1]} : vector<8x384xf32> to vector<8x128xf32>
    %37 = vector.extract_strided_slice %19 {offsets = [0, 256], sizes = [8, 128], strides = [1, 1]} : vector<8x384xf32> to vector<8x128xf32>
    %38 = arith.mulf %27, %37 : vector<8x128xf32>
    %39 = arith.addf %36, %38 : vector<8x128xf32>
    %40 = math.tanh %39 : vector<8x128xf32>
    %cst_18 = arith.constant 1.000000e+00 : f32
    %41 = vector.broadcast %cst_18 : f32 to vector<8x128xf32>
    %42 = arith.subf %41, %35 : vector<8x128xf32>
    %43 = arith.mulf %42, %40 : vector<8x128xf32>
    %44 = arith.mulf %35, %13 : vector<8x128xf32>
    %45 = arith.addf %43, %44 : vector<8x128xf32>
    %c1_i32 = arith.constant 1 : i32
    %46 = arith.index_cast %c1_i32 : i32 to index
    %c0_19 = arith.constant 0 : index
    %c0_20 = arith.constant 0 : index
    %47 = vector.load %arg6[%46, %c0_19, %c0_20] : memref<8x8x384xf32, #tpu.memory_space<vmem>>, vector<1x8x384xf32>
    %48 = vector.shape_cast %47 : vector<1x8x384xf32> to vector<8x384xf32>
    %49 = arith.truncf %45 : vector<8x128xf32> to vector<8x128xbf16>
    %cst_21 = arith.constant dense<0.000000e+00> : vector<8x384xf32>
    %50 = tpu.matmul %49, %9, %cst_21 {dimension_numbers = #tpu.dot_dimension_numbers<[1], [0], [0], [1], [0, 0, 1, 1], [], []>} : vector<8x128xbf16>, vector<128x384xbf16>, vector<8x384xf32> -> vector<8x384xf32>
    %51 = arith.addf %50, %12 : vector<8x384xf32>
    %52 = vector.extract_strided_slice %48 {offsets = [0, 0], sizes = [8, 128], strides = [1, 1]} : vector<8x384xf32> to vector<8x128xf32>
    %53 = vector.extract_strided_slice %51 {offsets = [0, 0], sizes = [8, 128], strides = [1, 1]} : vector<8x384xf32> to vector<8x128xf32>
    %54 = arith.addf %52, %53 : vector<8x128xf32>
    %55 = arith.negf %54 : vector<8x128xf32>
    %56 = math.exp %55 : vector<8x128xf32>
    %cst_22 = arith.constant 1.000000e+00 : f32
    %57 = vector.broadcast %cst_22 : f32 to vector<8x128xf32>
    %58 = arith.addf %57, %56 : vector<8x128xf32>
    %59 = arith.divf %57, %58 : vector<8x128xf32>
    %60 = vector.extract_strided_slice %48 {offsets = [0, 128], sizes = [8, 128], strides = [1, 1]} : vector<8x384xf32> to vector<8x128xf32>
    %61 = vector.extract_strided_slice %51 {offsets = [0, 128], sizes = [8, 128], strides = [1, 1]} : vector<8x384xf32> to vector<8x128xf32>
    %62 = arith.addf %60, %61 : vector<8x128xf32>
    %63 = arith.negf %62 : vector<8x128xf32>
    %64 = math.exp %63 : vector<8x128xf32>
    %cst_23 = arith.constant 1.000000e+00 : f32
    %65 = vector.broadcast %cst_23 : f32 to vector<8x128xf32>
    %66 = arith.addf %65, %64 : vector<8x128xf32>
    %67 = arith.divf %65, %66 : vector<8x128xf32>
    %68 = vector.extract_strided_slice %48 {offsets = [0, 256], sizes = [8, 128], strides = [1, 1]} : vector<8x384xf32> to vector<8x128xf32>
    %69 = vector.extract_strided_slice %51 {offsets = [0, 256], sizes = [8, 128], strides = [1, 1]} : vector<8x384xf32> to vector<8x128xf32>
    %70 = arith.mulf %59, %69 : vector<8x128xf32>
    %71 = arith.addf %68, %70 : vector<8x128xf32>
    %72 = math.tanh %71 : vector<8x128xf32>
    %cst_24 = arith.constant 1.000000e+00 : f32
    %73 = vector.broadcast %cst_24 : f32 to vector<8x128xf32>
    %74 = arith.subf %73, %67 : vector<8x128xf32>
    %75 = arith.mulf %74, %72 : vector<8x128xf32>
    %76 = arith.mulf %67, %45 : vector<8x128xf32>
    %77 = arith.addf %75, %76 : vector<8x128xf32>
    %c2_i32 = arith.constant 2 : i32
    %78 = arith.index_cast %c2_i32 : i32 to index
    %c0_25 = arith.constant 0 : index
    %c0_26 = arith.constant 0 : index
    %79 = vector.load %arg6[%78, %c0_25, %c0_26] : memref<8x8x384xf32, #tpu.memory_space<vmem>>, vector<1x8x384xf32>
    %80 = vector.shape_cast %79 : vector<1x8x384xf32> to vector<8x384xf32>
    %81 = arith.truncf %77 : vector<8x128xf32> to vector<8x128xbf16>
    %cst_27 = arith.constant dense<0.000000e+00> : vector<8x384xf32>
    %82 = tpu.matmul %81, %9, %cst_27 {dimension_numbers = #tpu.dot_dimension_numbers<[1], [0], [0], [1], [0, 0, 1, 1], [], []>} : vector<8x128xbf16>, vector<128x384xbf16>, vector<8x384xf32> -> vector<8x384xf32>
    %83 = arith.addf %82, %12 : vector<8x384xf32>
    %84 = vector.extract_strided_slice %80 {offsets = [0, 0], sizes = [8, 128], strides = [1, 1]} : vector<8x384xf32> to vector<8x128xf32>
    %85 = vector.extract_strided_slice %83 {offsets = [0, 0], sizes = [8, 128], strides = [1, 1]} : vector<8x384xf32> to vector<8x128xf32>
    %86 = arith.addf %84, %85 : vector<8x128xf32>
    %87 = arith.negf %86 : vector<8x128xf32>
    %88 = math.exp %87 : vector<8x128xf32>
    %cst_28 = arith.constant 1.000000e+00 : f32
    %89 = vector.broadcast %cst_28 : f32 to vector<8x128xf32>
    %90 = arith.addf %89, %88 : vector<8x128xf32>
    %91 = arith.divf %89, %90 : vector<8x128xf32>
    %92 = vector.extract_strided_slice %80 {offsets = [0, 128], sizes = [8, 128], strides = [1, 1]} : vector<8x384xf32> to vector<8x128xf32>
    %93 = vector.extract_strided_slice %83 {offsets = [0, 128], sizes = [8, 128], strides = [1, 1]} : vector<8x384xf32> to vector<8x128xf32>
    %94 = arith.addf %92, %93 : vector<8x128xf32>
    %95 = arith.negf %94 : vector<8x128xf32>
    %96 = math.exp %95 : vector<8x128xf32>
    %cst_29 = arith.constant 1.000000e+00 : f32
    %97 = vector.broadcast %cst_29 : f32 to vector<8x128xf32>
    %98 = arith.addf %97, %96 : vector<8x128xf32>
    %99 = arith.divf %97, %98 : vector<8x128xf32>
    %100 = vector.extract_strided_slice %80 {offsets = [0, 256], sizes = [8, 128], strides = [1, 1]} : vector<8x384xf32> to vector<8x128xf32>
    %101 = vector.extract_strided_slice %83 {offsets = [0, 256], sizes = [8, 128], strides = [1, 1]} : vector<8x384xf32> to vector<8x128xf32>
    %102 = arith.mulf %91, %101 : vector<8x128xf32>
    %103 = arith.addf %100, %102 : vector<8x128xf32>
    %104 = math.tanh %103 : vector<8x128xf32>
    %cst_30 = arith.constant 1.000000e+00 : f32
    %105 = vector.broadcast %cst_30 : f32 to vector<8x128xf32>
    %106 = arith.subf %105, %99 : vector<8x128xf32>
    %107 = arith.mulf %106, %104 : vector<8x128xf32>
    %108 = arith.mulf %99, %77 : vector<8x128xf32>
    %109 = arith.addf %107, %108 : vector<8x128xf32>
    %c3_i32 = arith.constant 3 : i32
    %110 = arith.index_cast %c3_i32 : i32 to index
    %c0_31 = arith.constant 0 : index
    %c0_32 = arith.constant 0 : index
    %111 = vector.load %arg6[%110, %c0_31, %c0_32] : memref<8x8x384xf32, #tpu.memory_space<vmem>>, vector<1x8x384xf32>
    %112 = vector.shape_cast %111 : vector<1x8x384xf32> to vector<8x384xf32>
    %113 = arith.truncf %109 : vector<8x128xf32> to vector<8x128xbf16>
    %cst_33 = arith.constant dense<0.000000e+00> : vector<8x384xf32>
    %114 = tpu.matmul %113, %9, %cst_33 {dimension_numbers = #tpu.dot_dimension_numbers<[1], [0], [0], [1], [0, 0, 1, 1], [], []>} : vector<8x128xbf16>, vector<128x384xbf16>, vector<8x384xf32> -> vector<8x384xf32>
    %115 = arith.addf %114, %12 : vector<8x384xf32>
    %116 = vector.extract_strided_slice %112 {offsets = [0, 0], sizes = [8, 128], strides = [1, 1]} : vector<8x384xf32> to vector<8x128xf32>
    %117 = vector.extract_strided_slice %115 {offsets = [0, 0], sizes = [8, 128], strides = [1, 1]} : vector<8x384xf32> to vector<8x128xf32>
    %118 = arith.addf %116, %117 : vector<8x128xf32>
    %119 = arith.negf %118 : vector<8x128xf32>
    %120 = math.exp %119 : vector<8x128xf32>
    %cst_34 = arith.constant 1.000000e+00 : f32
    %121 = vector.broadcast %cst_34 : f32 to vector<8x128xf32>
    %122 = arith.addf %121, %120 : vector<8x128xf32>
    %123 = arith.divf %121, %122 : vector<8x128xf32>
    %124 = vector.extract_strided_slice %112 {offsets = [0, 128], sizes = [8, 128], strides = [1, 1]} : vector<8x384xf32> to vector<8x128xf32>
    %125 = vector.extract_strided_slice %115 {offsets = [0, 128], sizes = [8, 128], strides = [1, 1]} : vector<8x384xf32> to vector<8x128xf32>
    %126 = arith.addf %124, %125 : vector<8x128xf32>
    %127 = arith.negf %126 : vector<8x128xf32>
    %128 = math.exp %127 : vector<8x128xf32>
    %cst_35 = arith.constant 1.000000e+00 : f32
    %129 = vector.broadcast %cst_35 : f32 to vector<8x128xf32>
    %130 = arith.addf %129, %128 : vector<8x128xf32>
    %131 = arith.divf %129, %130 : vector<8x128xf32>
    %132 = vector.extract_strided_slice %112 {offsets = [0, 256], sizes = [8, 128], strides = [1, 1]} : vector<8x384xf32> to vector<8x128xf32>
    %133 = vector.extract_strided_slice %115 {offsets = [0, 256], sizes = [8, 128], strides = [1, 1]} : vector<8x384xf32> to vector<8x128xf32>
    %134 = arith.mulf %123, %133 : vector<8x128xf32>
    %135 = arith.addf %132, %134 : vector<8x128xf32>
    %136 = math.tanh %135 : vector<8x128xf32>
    %cst_36 = arith.constant 1.000000e+00 : f32
    %137 = vector.broadcast %cst_36 : f32 to vector<8x128xf32>
    %138 = arith.subf %137, %131 : vector<8x128xf32>
    %139 = arith.mulf %138, %136 : vector<8x128xf32>
    %140 = arith.mulf %131, %109 : vector<8x128xf32>
    %141 = arith.addf %139, %140 : vector<8x128xf32>
    %c4_i32 = arith.constant 4 : i32
    %142 = arith.index_cast %c4_i32 : i32 to index
    %c0_37 = arith.constant 0 : index
    %c0_38 = arith.constant 0 : index
    %143 = vector.load %arg6[%142, %c0_37, %c0_38] : memref<8x8x384xf32, #tpu.memory_space<vmem>>, vector<1x8x384xf32>
    %144 = vector.shape_cast %143 : vector<1x8x384xf32> to vector<8x384xf32>
    %145 = arith.truncf %141 : vector<8x128xf32> to vector<8x128xbf16>
    %cst_39 = arith.constant dense<0.000000e+00> : vector<8x384xf32>
    %146 = tpu.matmul %145, %9, %cst_39 {dimension_numbers = #tpu.dot_dimension_numbers<[1], [0], [0], [1], [0, 0, 1, 1], [], []>} : vector<8x128xbf16>, vector<128x384xbf16>, vector<8x384xf32> -> vector<8x384xf32>
    %147 = arith.addf %146, %12 : vector<8x384xf32>
    %148 = vector.extract_strided_slice %144 {offsets = [0, 0], sizes = [8, 128], strides = [1, 1]} : vector<8x384xf32> to vector<8x128xf32>
    %149 = vector.extract_strided_slice %147 {offsets = [0, 0], sizes = [8, 128], strides = [1, 1]} : vector<8x384xf32> to vector<8x128xf32>
    %150 = arith.addf %148, %149 : vector<8x128xf32>
    %151 = arith.negf %150 : vector<8x128xf32>
    %152 = math.exp %151 : vector<8x128xf32>
    %cst_40 = arith.constant 1.000000e+00 : f32
    %153 = vector.broadcast %cst_40 : f32 to vector<8x128xf32>
    %154 = arith.addf %153, %152 : vector<8x128xf32>
    %155 = arith.divf %153, %154 : vector<8x128xf32>
    %156 = vector.extract_strided_slice %144 {offsets = [0, 128], sizes = [8, 128], strides = [1, 1]} : vector<8x384xf32> to vector<8x128xf32>
    %157 = vector.extract_strided_slice %147 {offsets = [0, 128], sizes = [8, 128], strides = [1, 1]} : vector<8x384xf32> to vector<8x128xf32>
    %158 = arith.addf %156, %157 : vector<8x128xf32>
    %159 = arith.negf %158 : vector<8x128xf32>
    %160 = math.exp %159 : vector<8x128xf32>
    %cst_41 = arith.constant 1.000000e+00 : f32
    %161 = vector.broadcast %cst_41 : f32 to vector<8x128xf32>
    %162 = arith.addf %161, %160 : vector<8x128xf32>
    %163 = arith.divf %161, %162 : vector<8x128xf32>
    %164 = vector.extract_strided_slice %144 {offsets = [0, 256], sizes = [8, 128], strides = [1, 1]} : vector<8x384xf32> to vector<8x128xf32>
    %165 = vector.extract_strided_slice %147 {offsets = [0, 256], sizes = [8, 128], strides = [1, 1]} : vector<8x384xf32> to vector<8x128xf32>
    %166 = arith.mulf %155, %165 : vector<8x128xf32>
    %167 = arith.addf %164, %166 : vector<8x128xf32>
    %168 = math.tanh %167 : vector<8x128xf32>
    %cst_42 = arith.constant 1.000000e+00 : f32
    %169 = vector.broadcast %cst_42 : f32 to vector<8x128xf32>
    %170 = arith.subf %169, %163 : vector<8x128xf32>
    %171 = arith.mulf %170, %168 : vector<8x128xf32>
    %172 = arith.mulf %163, %141 : vector<8x128xf32>
    %173 = arith.addf %171, %172 : vector<8x128xf32>
    %c5_i32 = arith.constant 5 : i32
    %174 = arith.index_cast %c5_i32 : i32 to index
    %c0_43 = arith.constant 0 : index
    %c0_44 = arith.constant 0 : index
    %175 = vector.load %arg6[%174, %c0_43, %c0_44] : memref<8x8x384xf32, #tpu.memory_space<vmem>>, vector<1x8x384xf32>
    %176 = vector.shape_cast %175 : vector<1x8x384xf32> to vector<8x384xf32>
    %177 = arith.truncf %173 : vector<8x128xf32> to vector<8x128xbf16>
    %cst_45 = arith.constant dense<0.000000e+00> : vector<8x384xf32>
    %178 = tpu.matmul %177, %9, %cst_45 {dimension_numbers = #tpu.dot_dimension_numbers<[1], [0], [0], [1], [0, 0, 1, 1], [], []>} : vector<8x128xbf16>, vector<128x384xbf16>, vector<8x384xf32> -> vector<8x384xf32>
    %179 = arith.addf %178, %12 : vector<8x384xf32>
    %180 = vector.extract_strided_slice %176 {offsets = [0, 0], sizes = [8, 128], strides = [1, 1]} : vector<8x384xf32> to vector<8x128xf32>
    %181 = vector.extract_strided_slice %179 {offsets = [0, 0], sizes = [8, 128], strides = [1, 1]} : vector<8x384xf32> to vector<8x128xf32>
    %182 = arith.addf %180, %181 : vector<8x128xf32>
    %183 = arith.negf %182 : vector<8x128xf32>
    %184 = math.exp %183 : vector<8x128xf32>
    %cst_46 = arith.constant 1.000000e+00 : f32
    %185 = vector.broadcast %cst_46 : f32 to vector<8x128xf32>
    %186 = arith.addf %185, %184 : vector<8x128xf32>
    %187 = arith.divf %185, %186 : vector<8x128xf32>
    %188 = vector.extract_strided_slice %176 {offsets = [0, 128], sizes = [8, 128], strides = [1, 1]} : vector<8x384xf32> to vector<8x128xf32>
    %189 = vector.extract_strided_slice %179 {offsets = [0, 128], sizes = [8, 128], strides = [1, 1]} : vector<8x384xf32> to vector<8x128xf32>
    %190 = arith.addf %188, %189 : vector<8x128xf32>
    %191 = arith.negf %190 : vector<8x128xf32>
    %192 = math.exp %191 : vector<8x128xf32>
    %cst_47 = arith.constant 1.000000e+00 : f32
    %193 = vector.broadcast %cst_47 : f32 to vector<8x128xf32>
    %194 = arith.addf %193, %192 : vector<8x128xf32>
    %195 = arith.divf %193, %194 : vector<8x128xf32>
    %196 = vector.extract_strided_slice %176 {offsets = [0, 256], sizes = [8, 128], strides = [1, 1]} : vector<8x384xf32> to vector<8x128xf32>
    %197 = vector.extract_strided_slice %179 {offsets = [0, 256], sizes = [8, 128], strides = [1, 1]} : vector<8x384xf32> to vector<8x128xf32>
    %198 = arith.mulf %187, %197 : vector<8x128xf32>
    %199 = arith.addf %196, %198 : vector<8x128xf32>
    %200 = math.tanh %199 : vector<8x128xf32>
    %cst_48 = arith.constant 1.000000e+00 : f32
    %201 = vector.broadcast %cst_48 : f32 to vector<8x128xf32>
    %202 = arith.subf %201, %195 : vector<8x128xf32>
    %203 = arith.mulf %202, %200 : vector<8x128xf32>
    %204 = arith.mulf %195, %173 : vector<8x128xf32>
    %205 = arith.addf %203, %204 : vector<8x128xf32>
    %c6_i32 = arith.constant 6 : i32
    %206 = arith.index_cast %c6_i32 : i32 to index
    %c0_49 = arith.constant 0 : index
    %c0_50 = arith.constant 0 : index
    %207 = vector.load %arg6[%206, %c0_49, %c0_50] : memref<8x8x384xf32, #tpu.memory_space<vmem>>, vector<1x8x384xf32>
    %208 = vector.shape_cast %207 : vector<1x8x384xf32> to vector<8x384xf32>
    %209 = arith.truncf %205 : vector<8x128xf32> to vector<8x128xbf16>
    %cst_51 = arith.constant dense<0.000000e+00> : vector<8x384xf32>
    %210 = tpu.matmul %209, %9, %cst_51 {dimension_numbers = #tpu.dot_dimension_numbers<[1], [0], [0], [1], [0, 0, 1, 1], [], []>} : vector<8x128xbf16>, vector<128x384xbf16>, vector<8x384xf32> -> vector<8x384xf32>
    %211 = arith.addf %210, %12 : vector<8x384xf32>
    %212 = vector.extract_strided_slice %208 {offsets = [0, 0], sizes = [8, 128], strides = [1, 1]} : vector<8x384xf32> to vector<8x128xf32>
    %213 = vector.extract_strided_slice %211 {offsets = [0, 0], sizes = [8, 128], strides = [1, 1]} : vector<8x384xf32> to vector<8x128xf32>
    %214 = arith.addf %212, %213 : vector<8x128xf32>
    %215 = arith.negf %214 : vector<8x128xf32>
    %216 = math.exp %215 : vector<8x128xf32>
    %cst_52 = arith.constant 1.000000e+00 : f32
    %217 = vector.broadcast %cst_52 : f32 to vector<8x128xf32>
    %218 = arith.addf %217, %216 : vector<8x128xf32>
    %219 = arith.divf %217, %218 : vector<8x128xf32>
    %220 = vector.extract_strided_slice %208 {offsets = [0, 128], sizes = [8, 128], strides = [1, 1]} : vector<8x384xf32> to vector<8x128xf32>
    %221 = vector.extract_strided_slice %211 {offsets = [0, 128], sizes = [8, 128], strides = [1, 1]} : vector<8x384xf32> to vector<8x128xf32>
    %222 = arith.addf %220, %221 : vector<8x128xf32>
    %223 = arith.negf %222 : vector<8x128xf32>
    %224 = math.exp %223 : vector<8x128xf32>
    %cst_53 = arith.constant 1.000000e+00 : f32
    %225 = vector.broadcast %cst_53 : f32 to vector<8x128xf32>
    %226 = arith.addf %225, %224 : vector<8x128xf32>
    %227 = arith.divf %225, %226 : vector<8x128xf32>
    %228 = vector.extract_strided_slice %208 {offsets = [0, 256], sizes = [8, 128], strides = [1, 1]} : vector<8x384xf32> to vector<8x128xf32>
    %229 = vector.extract_strided_slice %211 {offsets = [0, 256], sizes = [8, 128], strides = [1, 1]} : vector<8x384xf32> to vector<8x128xf32>
    %230 = arith.mulf %219, %229 : vector<8x128xf32>
    %231 = arith.addf %228, %230 : vector<8x128xf32>
    %232 = math.tanh %231 : vector<8x128xf32>
    %cst_54 = arith.constant 1.000000e+00 : f32
    %233 = vector.broadcast %cst_54 : f32 to vector<8x128xf32>
    %234 = arith.subf %233, %227 : vector<8x128xf32>
    %235 = arith.mulf %234, %232 : vector<8x128xf32>
    %236 = arith.mulf %227, %205 : vector<8x128xf32>
    %237 = arith.addf %235, %236 : vector<8x128xf32>
    %c7_i32 = arith.constant 7 : i32
    %238 = arith.index_cast %c7_i32 : i32 to index
    %c0_55 = arith.constant 0 : index
    %c0_56 = arith.constant 0 : index
    %239 = vector.load %arg6[%238, %c0_55, %c0_56] : memref<8x8x384xf32, #tpu.memory_space<vmem>>, vector<1x8x384xf32>
    %240 = vector.shape_cast %239 : vector<1x8x384xf32> to vector<8x384xf32>
    %241 = arith.truncf %237 : vector<8x128xf32> to vector<8x128xbf16>
    %cst_57 = arith.constant dense<0.000000e+00> : vector<8x384xf32>
    %242 = tpu.matmul %241, %9, %cst_57 {dimension_numbers = #tpu.dot_dimension_numbers<[1], [0], [0], [1], [0, 0, 1, 1], [], []>} : vector<8x128xbf16>, vector<128x384xbf16>, vector<8x384xf32> -> vector<8x384xf32>
    %243 = arith.addf %242, %12 : vector<8x384xf32>
    %244 = vector.extract_strided_slice %240 {offsets = [0, 0], sizes = [8, 128], strides = [1, 1]} : vector<8x384xf32> to vector<8x128xf32>
    %245 = vector.extract_strided_slice %243 {offsets = [0, 0], sizes = [8, 128], strides = [1, 1]} : vector<8x384xf32> to vector<8x128xf32>
    %246 = arith.addf %244, %245 : vector<8x128xf32>
    %247 = arith.negf %246 : vector<8x128xf32>
    %248 = math.exp %247 : vector<8x128xf32>
    %cst_58 = arith.constant 1.000000e+00 : f32
    %249 = vector.broadcast %cst_58 : f32 to vector<8x128xf32>
    %250 = arith.addf %249, %248 : vector<8x128xf32>
    %251 = arith.divf %249, %250 : vector<8x128xf32>
    %252 = vector.extract_strided_slice %240 {offsets = [0, 128], sizes = [8, 128], strides = [1, 1]} : vector<8x384xf32> to vector<8x128xf32>
    %253 = vector.extract_strided_slice %243 {offsets = [0, 128], sizes = [8, 128], strides = [1, 1]} : vector<8x384xf32> to vector<8x128xf32>
    %254 = arith.addf %252, %253 : vector<8x128xf32>
    %255 = arith.negf %254 : vector<8x128xf32>
    %256 = math.exp %255 : vector<8x128xf32>
    %cst_59 = arith.constant 1.000000e+00 : f32
    %257 = vector.broadcast %cst_59 : f32 to vector<8x128xf32>
    %258 = arith.addf %257, %256 : vector<8x128xf32>
    %259 = arith.divf %257, %258 : vector<8x128xf32>
    %260 = vector.extract_strided_slice %240 {offsets = [0, 256], sizes = [8, 128], strides = [1, 1]} : vector<8x384xf32> to vector<8x128xf32>
    %261 = vector.extract_strided_slice %243 {offsets = [0, 256], sizes = [8, 128], strides = [1, 1]} : vector<8x384xf32> to vector<8x128xf32>
    %262 = arith.mulf %251, %261 : vector<8x128xf32>
    %263 = arith.addf %260, %262 : vector<8x128xf32>
    %264 = math.tanh %263 : vector<8x128xf32>
    %cst_60 = arith.constant 1.000000e+00 : f32
    %265 = vector.broadcast %cst_60 : f32 to vector<8x128xf32>
    %266 = arith.subf %265, %259 : vector<8x128xf32>
    %267 = arith.mulf %266, %264 : vector<8x128xf32>
    %268 = arith.mulf %259, %237 : vector<8x128xf32>
    %269 = arith.addf %267, %268 : vector<8x128xf32>
    %c8_i32 = arith.constant 8 : i32
    %c0_61 = arith.constant 0 : index
    %c0_62 = arith.constant 0 : index
    %270 = vector.load %arg5[%c0_61, %c0_62] : memref<8x128xf32, #tpu.memory_space<vmem>>, vector<8x128xf32>
    tpu.vector_store %arg5[%c0_61, %c0_62], %269 {strides = array<i32>} : memref<8x128xf32, #tpu.memory_space<vmem>>, vector<8x128xf32>,
    return
  }
}

module attributes {stable_mosaic.version = 11 : i64} {
  func.func @decoder_seq_kernel(%arg0: memref<8xi32, #tpu.memory_space<smem>>, %arg1: memref<8x8x1xi32, #tpu.memory_space<vmem>>, %arg2: memref<8x128xf32, #tpu.memory_space<vmem>>, %arg3: memref<128x512xbf16, #tpu.memory_space<vmem>>, %arg4: memref<128x512xbf16, #tpu.memory_space<vmem>>, %arg5: memref<1x512xf32, #tpu.memory_space<vmem>>, %arg6: memref<128x128xbf16, #tpu.memory_space<vmem>>, %arg7: memref<1x128xf32, #tpu.memory_space<vmem>>, %arg8: memref<8x8x128xf32, #tpu.memory_space<vmem>>) attributes {dimension_semantics = [], scalar_prefetch = 0 : i64, scratch_operands = 0 : i64, tpu.core_type = #tpu.core_type<tc>} {
    %c0 = arith.constant 0 : index
    %c0_0 = arith.constant 0 : index
    %0 = vector.load %arg3[%c0, %c0_0] : memref<128x512xbf16, #tpu.memory_space<vmem>>, vector<128x512xbf16>
    %c0_1 = arith.constant 0 : index
    %c0_2 = arith.constant 0 : index
    %1 = vector.load %arg4[%c0_1, %c0_2] : memref<128x512xbf16, #tpu.memory_space<vmem>>, vector<128x512xbf16>
    %c0_3 = arith.constant 0 : index
    %c0_4 = arith.constant 0 : index
    %2 = vector.load %arg6[%c0_3, %c0_4] : memref<128x128xbf16, #tpu.memory_space<vmem>>, vector<128x128xbf16>
    %c0_5 = arith.constant 0 : index
    %c0_6 = arith.constant 0 : index
    %3 = vector.load %arg5[%c0_5, %c0_6] : memref<1x512xf32, #tpu.memory_space<vmem>>, vector<1x512xf32>
    %4 = vector.shape_cast %3 : vector<1x512xf32> to vector<1x512xf32>
    %5 = vector.broadcast %4 : vector<1x512xf32> to vector<8x512xf32>
    %c0_7 = arith.constant 0 : index
    %c0_8 = arith.constant 0 : index
    %6 = vector.load %arg7[%c0_7, %c0_8] : memref<1x128xf32, #tpu.memory_space<vmem>>, vector<1x128xf32>
    %7 = vector.shape_cast %6 : vector<1x128xf32> to vector<1x128xf32>
    %8 = vector.broadcast %7 : vector<1x128xf32> to vector<8x128xf32>
    %9 = tpu.iota {dimensions = array<i32: 1>} : vector<8x128xi32>
    %c32_i32 = arith.constant 32 : i32
    %10 = vector.broadcast %c32_i32 : i32 to vector<8x128xi32>
    %11 = arith.cmpi slt, %9, %10 : vector<8x128xi32>
    %cst = arith.constant 0.000000e+00 : f32
    %cst_9 = arith.constant -1.000000e+30 : f32
    %12 = vector.broadcast %cst : f32 to vector<8x128xf32>
    %13 = vector.broadcast %cst_9 : f32 to vector<8x128xf32>
    %14 = arith.select %11, %12, %13 : vector<8x128xi1>, vector<8x128xf32>
    %cst_10 = arith.constant 0.000000e+00 : f32
    %15 = vector.broadcast %cst_10 : f32 to vector<8x128xf32>
    %c0_11 = arith.constant 0 : index
    %c0_12 = arith.constant 0 : index
    %c0_13 = arith.constant 0 : index
    %16 = vector.load %arg8[%c0_11, %c0_12, %c0_13] : memref<8x8x128xf32, #tpu.memory_space<vmem>>, vector<1x8x128xf32>
    %17 = vector.shape_cast %16 : vector<1x8x128xf32> to vector<8x128xf32>
    %18 = vector.shape_cast %15 : vector<8x128xf32> to vector<1x8x128xf32>
    tpu.vector_store %arg8[%c0_11, %c0_12, %c0_13], %18 {strides = array<i32>} : memref<8x8x128xf32, #tpu.memory_space<vmem>>, vector<1x8x128xf32>,
    %cst_14 = arith.constant 0.000000e+00 : f32
    %19 = vector.broadcast %cst_14 : f32 to vector<8x128xf32>
    %c0_15 = arith.constant 0 : index
    %c0_16 = arith.constant 0 : index
    %c0_17 = arith.constant 0 : index
    %20 = vector.load %arg1[%c0_15, %c0_16, %c0_17] : memref<8x8x1xi32, #tpu.memory_space<vmem>>, vector<1x8x1xi32>
    %21 = vector.shape_cast %20 : vector<1x8x1xi32> to vector<8x1xi32>
    %22 = vector.broadcast %21 : vector<8x1xi32> to vector<8x128xi32>
    %23 = arith.cmpi eq, %9, %22 : vector<8x128xi32>
    %24 = arith.extui %23 : vector<8x128xi1> to vector<8x128xi32>
    %25 = arith.sitofp %24 : vector<8x128xi32> to vector<8x128xf32>
    %26 = arith.truncf %25 : vector<8x128xf32> to vector<8x128xbf16>
    %c0_18 = arith.constant 0 : index
    %c0_19 = arith.constant 0 : index
    %27 = vector.load %arg2[%c0_18, %c0_19] : memref<8x128xf32, #tpu.memory_space<vmem>>, vector<8x128xf32>
    %c1_i32 = arith.constant 1 : i32
    %cst_20 = arith.constant dense<0.000000e+00> : vector<8x512xf32>
    %28 = tpu.matmul %26, %0, %cst_20 {dimension_numbers = #tpu.dot_dimension_numbers<[1], [0], [0], [1], [0, 0, 1, 1], [], []>} : vector<8x128xbf16>, vector<128x512xbf16>, vector<8x512xf32> -> vector<8x512xf32>
    %29 = arith.truncf %27 : vector<8x128xf32> to vector<8x128xbf16>
    %cst_21 = arith.constant dense<0.000000e+00> : vector<8x512xf32>
    %30 = tpu.matmul %29, %1, %cst_21 {dimension_numbers = #tpu.dot_dimension_numbers<[1], [0], [0], [1], [0, 0, 1, 1], [], []>} : vector<8x128xbf16>, vector<128x512xbf16>, vector<8x512xf32> -> vector<8x512xf32>
    %31 = arith.addf %28, %30 : vector<8x512xf32>
    %32 = arith.addf %31, %5 : vector<8x512xf32>
    %33 = vector.extract_strided_slice %32 {offsets = [0, 0], sizes = [8, 128], strides = [1, 1]} : vector<8x512xf32> to vector<8x128xf32>
    %34 = arith.negf %33 : vector<8x128xf32>
    %35 = math.exp %34 : vector<8x128xf32>
    %cst_22 = arith.constant 1.000000e+00 : f32
    %36 = vector.broadcast %cst_22 : f32 to vector<8x128xf32>
    %37 = arith.addf %36, %35 : vector<8x128xf32>
    %38 = arith.divf %36, %37 : vector<8x128xf32>
    %39 = vector.extract_strided_slice %32 {offsets = [0, 128], sizes = [8, 128], strides = [1, 1]} : vector<8x512xf32> to vector<8x128xf32>
    %40 = arith.negf %39 : vector<8x128xf32>
    %41 = math.exp %40 : vector<8x128xf32>
    %cst_23 = arith.constant 1.000000e+00 : f32
    %42 = vector.broadcast %cst_23 : f32 to vector<8x128xf32>
    %43 = arith.addf %42, %41 : vector<8x128xf32>
    %44 = arith.divf %42, %43 : vector<8x128xf32>
    %45 = vector.extract_strided_slice %32 {offsets = [0, 256], sizes = [8, 128], strides = [1, 1]} : vector<8x512xf32> to vector<8x128xf32>
    %46 = math.tanh %45 : vector<8x128xf32>
    %47 = vector.extract_strided_slice %32 {offsets = [0, 384], sizes = [8, 128], strides = [1, 1]} : vector<8x512xf32> to vector<8x128xf32>
    %48 = arith.negf %47 : vector<8x128xf32>
    %49 = math.exp %48 : vector<8x128xf32>
    %cst_24 = arith.constant 1.000000e+00 : f32
    %50 = vector.broadcast %cst_24 : f32 to vector<8x128xf32>
    %51 = arith.addf %50, %49 : vector<8x128xf32>
    %52 = arith.divf %50, %51 : vector<8x128xf32>
    %53 = arith.mulf %44, %19 : vector<8x128xf32>
    %54 = arith.mulf %38, %46 : vector<8x128xf32>
    %55 = arith.addf %53, %54 : vector<8x128xf32>
    %56 = math.tanh %55 : vector<8x128xf32>
    %57 = arith.mulf %52, %56 : vector<8x128xf32>
    %58 = arith.truncf %57 : vector<8x128xf32> to vector<8x128xbf16>
    %cst_25 = arith.constant dense<0.000000e+00> : vector<8x128xf32>
    %59 = tpu.matmul %58, %2, %cst_25 {dimension_numbers = #tpu.dot_dimension_numbers<[1], [0], [0], [1], [0, 0, 1, 1], [], []>} : vector<8x128xbf16>, vector<128x128xbf16>, vector<8x128xf32> -> vector<8x128xf32>
    %60 = arith.addf %59, %8 : vector<8x128xf32>
    %61 = arith.index_cast %c1_i32 : i32 to index
    %c0_26 = arith.constant 0 : index
    %c0_27 = arith.constant 0 : index
    %62 = vector.load %arg8[%61, %c0_26, %c0_27] : memref<8x8x128xf32, #tpu.memory_space<vmem>>, vector<1x8x128xf32>
    %63 = vector.shape_cast %62 : vector<1x8x128xf32> to vector<8x128xf32>
    %64 = vector.shape_cast %60 : vector<8x128xf32> to vector<1x8x128xf32>
    tpu.vector_store %arg8[%61, %c0_26, %c0_27], %64 {strides = array<i32>} : memref<8x8x128xf32, #tpu.memory_space<vmem>>, vector<1x8x128xf32>,
    %65 = arith.addf %60, %14 : vector<8x128xf32>
    %cst_28 = arith.constant dense<0xFF800000> : vector<8xf32>
    %66 = vector.multi_reduction <maximumf>, %65, %cst_28 [1] : vector<8x128xf32> to vector<8xf32>
    %67 = vector.shape_cast %66 : vector<8xf32> to vector<8x1xf32>
    %68 = vector.broadcast %67 : vector<8x1xf32> to vector<8x128xf32>
    %69 = arith.cmpf oeq, %65, %68 : vector<8x128xf32>
    %c128_i32 = arith.constant 128 : i32
    %70 = vector.broadcast %c128_i32 : i32 to vector<8x128xi32>
    %71 = arith.select %69, %9, %70 : vector<8x128xi1>, vector<8x128xi32>
    %cst_29 = arith.constant dense<2147483647> : vector<8xi32>
    %72 = vector.multi_reduction <minsi>, %71, %cst_29 [1] : vector<8x128xi32> to vector<8xi32>
    %73 = vector.shape_cast %72 : vector<8xi32> to vector<8x1xi32>
    %74 = arith.index_cast %c1_i32 : i32 to index
    %75 = memref.load %arg0[%74] : memref<8xi32, #tpu.memory_space<smem>>
    %c0_i32 = arith.constant 0 : i32
    %76 = arith.cmpi sgt, %75, %c0_i32 : i32
    %77 = arith.index_cast %c1_i32 : i32 to index
    %c0_30 = arith.constant 0 : index
    %c0_31 = arith.constant 0 : index
    %78 = vector.load %arg1[%77, %c0_30, %c0_31] : memref<8x8x1xi32, #tpu.memory_space<vmem>>, vector<1x8x1xi32>
    %79 = vector.shape_cast %78 : vector<1x8x1xi32> to vector<8x1xi32>
    %80 = arith.select %76, %79, %73 : vector<8x1xi32>
    %81 = vector.broadcast %80 : vector<8x1xi32> to vector<8x128xi32>
    %82 = arith.cmpi eq, %9, %81 : vector<8x128xi32>
    %83 = arith.extui %82 : vector<8x128xi1> to vector<8x128xi32>
    %84 = arith.sitofp %83 : vector<8x128xi32> to vector<8x128xf32>
    %85 = arith.truncf %84 : vector<8x128xf32> to vector<8x128xbf16>
    %c2_i32 = arith.constant 2 : i32
    %cst_32 = arith.constant dense<0.000000e+00> : vector<8x512xf32>
    %86 = tpu.matmul %85, %0, %cst_32 {dimension_numbers = #tpu.dot_dimension_numbers<[1], [0], [0], [1], [0, 0, 1, 1], [], []>} : vector<8x128xbf16>, vector<128x512xbf16>, vector<8x512xf32> -> vector<8x512xf32>
    %87 = arith.truncf %57 : vector<8x128xf32> to vector<8x128xbf16>
    %cst_33 = arith.constant dense<0.000000e+00> : vector<8x512xf32>
    %88 = tpu.matmul %87, %1, %cst_33 {dimension_numbers = #tpu.dot_dimension_numbers<[1], [0], [0], [1], [0, 0, 1, 1], [], []>} : vector<8x128xbf16>, vector<128x512xbf16>, vector<8x512xf32> -> vector<8x512xf32>
    %89 = arith.addf %86, %88 : vector<8x512xf32>
    %90 = arith.addf %89, %5 : vector<8x512xf32>
    %91 = vector.extract_strided_slice %90 {offsets = [0, 0], sizes = [8, 128], strides = [1, 1]} : vector<8x512xf32> to vector<8x128xf32>
    %92 = arith.negf %91 : vector<8x128xf32>
    %93 = math.exp %92 : vector<8x128xf32>
    %cst_34 = arith.constant 1.000000e+00 : f32
    %94 = vector.broadcast %cst_34 : f32 to vector<8x128xf32>
    %95 = arith.addf %94, %93 : vector<8x128xf32>
    %96 = arith.divf %94, %95 : vector<8x128xf32>
    %97 = vector.extract_strided_slice %90 {offsets = [0, 128], sizes = [8, 128], strides = [1, 1]} : vector<8x512xf32> to vector<8x128xf32>
    %98 = arith.negf %97 : vector<8x128xf32>
    %99 = math.exp %98 : vector<8x128xf32>
    %cst_35 = arith.constant 1.000000e+00 : f32
    %100 = vector.broadcast %cst_35 : f32 to vector<8x128xf32>
    %101 = arith.addf %100, %99 : vector<8x128xf32>
    %102 = arith.divf %100, %101 : vector<8x128xf32>
    %103 = vector.extract_strided_slice %90 {offsets = [0, 256], sizes = [8, 128], strides = [1, 1]} : vector<8x512xf32> to vector<8x128xf32>
    %104 = math.tanh %103 : vector<8x128xf32>
    %105 = vector.extract_strided_slice %90 {offsets = [0, 384], sizes = [8, 128], strides = [1, 1]} : vector<8x512xf32> to vector<8x128xf32>
    %106 = arith.negf %105 : vector<8x128xf32>
    %107 = math.exp %106 : vector<8x128xf32>
    %cst_36 = arith.constant 1.000000e+00 : f32
    %108 = vector.broadcast %cst_36 : f32 to vector<8x128xf32>
    %109 = arith.addf %108, %107 : vector<8x128xf32>
    %110 = arith.divf %108, %109 : vector<8x128xf32>
    %111 = arith.mulf %102, %55 : vector<8x128xf32>
    %112 = arith.mulf %96, %104 : vector<8x128xf32>
    %113 = arith.addf %111, %112 : vector<8x128xf32>
    %114 = math.tanh %113 : vector<8x128xf32>
    %115 = arith.mulf %110, %114 : vector<8x128xf32>
    %116 = arith.truncf %115 : vector<8x128xf32> to vector<8x128xbf16>
    %cst_37 = arith.constant dense<0.000000e+00> : vector<8x128xf32>
    %117 = tpu.matmul %116, %2, %cst_37 {dimension_numbers = #tpu.dot_dimension_numbers<[1], [0], [0], [1], [0, 0, 1, 1], [], []>} : vector<8x128xbf16>, vector<128x128xbf16>, vector<8x128xf32> -> vector<8x128xf32>
    %118 = arith.addf %117, %8 : vector<8x128xf32>
    %119 = arith.index_cast %c2_i32 : i32 to index
    %c0_38 = arith.constant 0 : index
    %c0_39 = arith.constant 0 : index
    %120 = vector.load %arg8[%119, %c0_38, %c0_39] : memref<8x8x128xf32, #tpu.memory_space<vmem>>, vector<1x8x128xf32>
    %121 = vector.shape_cast %120 : vector<1x8x128xf32> to vector<8x128xf32>
    %122 = vector.shape_cast %118 : vector<8x128xf32> to vector<1x8x128xf32>
    tpu.vector_store %arg8[%119, %c0_38, %c0_39], %122 {strides = array<i32>} : memref<8x8x128xf32, #tpu.memory_space<vmem>>, vector<1x8x128xf32>,
    %123 = arith.addf %118, %14 : vector<8x128xf32>
    %cst_40 = arith.constant dense<0xFF800000> : vector<8xf32>
    %124 = vector.multi_reduction <maximumf>, %123, %cst_40 [1] : vector<8x128xf32> to vector<8xf32>
    %125 = vector.shape_cast %124 : vector<8xf32> to vector<8x1xf32>
    %126 = vector.broadcast %125 : vector<8x1xf32> to vector<8x128xf32>
    %127 = arith.cmpf oeq, %123, %126 : vector<8x128xf32>
    %c128_i32_41 = arith.constant 128 : i32
    %128 = vector.broadcast %c128_i32_41 : i32 to vector<8x128xi32>
    %129 = arith.select %127, %9, %128 : vector<8x128xi1>, vector<8x128xi32>
    %cst_42 = arith.constant dense<2147483647> : vector<8xi32>
    %130 = vector.multi_reduction <minsi>, %129, %cst_42 [1] : vector<8x128xi32> to vector<8xi32>
    %131 = vector.shape_cast %130 : vector<8xi32> to vector<8x1xi32>
    %132 = arith.index_cast %c2_i32 : i32 to index
    %133 = memref.load %arg0[%132] : memref<8xi32, #tpu.memory_space<smem>>
    %c0_i32_43 = arith.constant 0 : i32
    %134 = arith.cmpi sgt, %133, %c0_i32_43 : i32
    %135 = arith.index_cast %c2_i32 : i32 to index
    %c0_44 = arith.constant 0 : index
    %c0_45 = arith.constant 0 : index
    %136 = vector.load %arg1[%135, %c0_44, %c0_45] : memref<8x8x1xi32, #tpu.memory_space<vmem>>, vector<1x8x1xi32>
    %137 = vector.shape_cast %136 : vector<1x8x1xi32> to vector<8x1xi32>
    %138 = arith.select %134, %137, %131 : vector<8x1xi32>
    %139 = vector.broadcast %138 : vector<8x1xi32> to vector<8x128xi32>
    %140 = arith.cmpi eq, %9, %139 : vector<8x128xi32>
    %141 = arith.extui %140 : vector<8x128xi1> to vector<8x128xi32>
    %142 = arith.sitofp %141 : vector<8x128xi32> to vector<8x128xf32>
    %143 = arith.truncf %142 : vector<8x128xf32> to vector<8x128xbf16>
    %c3_i32 = arith.constant 3 : i32
    %cst_46 = arith.constant dense<0.000000e+00> : vector<8x512xf32>
    %144 = tpu.matmul %143, %0, %cst_46 {dimension_numbers = #tpu.dot_dimension_numbers<[1], [0], [0], [1], [0, 0, 1, 1], [], []>} : vector<8x128xbf16>, vector<128x512xbf16>, vector<8x512xf32> -> vector<8x512xf32>
    %145 = arith.truncf %115 : vector<8x128xf32> to vector<8x128xbf16>
    %cst_47 = arith.constant dense<0.000000e+00> : vector<8x512xf32>
    %146 = tpu.matmul %145, %1, %cst_47 {dimension_numbers = #tpu.dot_dimension_numbers<[1], [0], [0], [1], [0, 0, 1, 1], [], []>} : vector<8x128xbf16>, vector<128x512xbf16>, vector<8x512xf32> -> vector<8x512xf32>
    %147 = arith.addf %144, %146 : vector<8x512xf32>
    %148 = arith.addf %147, %5 : vector<8x512xf32>
    %149 = vector.extract_strided_slice %148 {offsets = [0, 0], sizes = [8, 128], strides = [1, 1]} : vector<8x512xf32> to vector<8x128xf32>
    %150 = arith.negf %149 : vector<8x128xf32>
    %151 = math.exp %150 : vector<8x128xf32>
    %cst_48 = arith.constant 1.000000e+00 : f32
    %152 = vector.broadcast %cst_48 : f32 to vector<8x128xf32>
    %153 = arith.addf %152, %151 : vector<8x128xf32>
    %154 = arith.divf %152, %153 : vector<8x128xf32>
    %155 = vector.extract_strided_slice %148 {offsets = [0, 128], sizes = [8, 128], strides = [1, 1]} : vector<8x512xf32> to vector<8x128xf32>
    %156 = arith.negf %155 : vector<8x128xf32>
    %157 = math.exp %156 : vector<8x128xf32>
    %cst_49 = arith.constant 1.000000e+00 : f32
    %158 = vector.broadcast %cst_49 : f32 to vector<8x128xf32>
    %159 = arith.addf %158, %157 : vector<8x128xf32>
    %160 = arith.divf %158, %159 : vector<8x128xf32>
    %161 = vector.extract_strided_slice %148 {offsets = [0, 256], sizes = [8, 128], strides = [1, 1]} : vector<8x512xf32> to vector<8x128xf32>
    %162 = math.tanh %161 : vector<8x128xf32>
    %163 = vector.extract_strided_slice %148 {offsets = [0, 384], sizes = [8, 128], strides = [1, 1]} : vector<8x512xf32> to vector<8x128xf32>
    %164 = arith.negf %163 : vector<8x128xf32>
    %165 = math.exp %164 : vector<8x128xf32>
    %cst_50 = arith.constant 1.000000e+00 : f32
    %166 = vector.broadcast %cst_50 : f32 to vector<8x128xf32>
    %167 = arith.addf %166, %165 : vector<8x128xf32>
    %168 = arith.divf %166, %167 : vector<8x128xf32>
    %169 = arith.mulf %160, %113 : vector<8x128xf32>
    %170 = arith.mulf %154, %162 : vector<8x128xf32>
    %171 = arith.addf %169, %170 : vector<8x128xf32>
    %172 = math.tanh %171 : vector<8x128xf32>
    %173 = arith.mulf %168, %172 : vector<8x128xf32>
    %174 = arith.truncf %173 : vector<8x128xf32> to vector<8x128xbf16>
    %cst_51 = arith.constant dense<0.000000e+00> : vector<8x128xf32>
    %175 = tpu.matmul %174, %2, %cst_51 {dimension_numbers = #tpu.dot_dimension_numbers<[1], [0], [0], [1], [0, 0, 1, 1], [], []>} : vector<8x128xbf16>, vector<128x128xbf16>, vector<8x128xf32> -> vector<8x128xf32>
    %176 = arith.addf %175, %8 : vector<8x128xf32>
    %177 = arith.index_cast %c3_i32 : i32 to index
    %c0_52 = arith.constant 0 : index
    %c0_53 = arith.constant 0 : index
    %178 = vector.load %arg8[%177, %c0_52, %c0_53] : memref<8x8x128xf32, #tpu.memory_space<vmem>>, vector<1x8x128xf32>
    %179 = vector.shape_cast %178 : vector<1x8x128xf32> to vector<8x128xf32>
    %180 = vector.shape_cast %176 : vector<8x128xf32> to vector<1x8x128xf32>
    tpu.vector_store %arg8[%177, %c0_52, %c0_53], %180 {strides = array<i32>} : memref<8x8x128xf32, #tpu.memory_space<vmem>>, vector<1x8x128xf32>,
    %181 = arith.addf %176, %14 : vector<8x128xf32>
    %cst_54 = arith.constant dense<0xFF800000> : vector<8xf32>
    %182 = vector.multi_reduction <maximumf>, %181, %cst_54 [1] : vector<8x128xf32> to vector<8xf32>
    %183 = vector.shape_cast %182 : vector<8xf32> to vector<8x1xf32>
    %184 = vector.broadcast %183 : vector<8x1xf32> to vector<8x128xf32>
    %185 = arith.cmpf oeq, %181, %184 : vector<8x128xf32>
    %c128_i32_55 = arith.constant 128 : i32
    %186 = vector.broadcast %c128_i32_55 : i32 to vector<8x128xi32>
    %187 = arith.select %185, %9, %186 : vector<8x128xi1>, vector<8x128xi32>
    %cst_56 = arith.constant dense<2147483647> : vector<8xi32>
    %188 = vector.multi_reduction <minsi>, %187, %cst_56 [1] : vector<8x128xi32> to vector<8xi32>
    %189 = vector.shape_cast %188 : vector<8xi32> to vector<8x1xi32>
    %190 = arith.index_cast %c3_i32 : i32 to index
    %191 = memref.load %arg0[%190] : memref<8xi32, #tpu.memory_space<smem>>
    %c0_i32_57 = arith.constant 0 : i32
    %192 = arith.cmpi sgt, %191, %c0_i32_57 : i32
    %193 = arith.index_cast %c3_i32 : i32 to index
    %c0_58 = arith.constant 0 : index
    %c0_59 = arith.constant 0 : index
    %194 = vector.load %arg1[%193, %c0_58, %c0_59] : memref<8x8x1xi32, #tpu.memory_space<vmem>>, vector<1x8x1xi32>
    %195 = vector.shape_cast %194 : vector<1x8x1xi32> to vector<8x1xi32>
    %196 = arith.select %192, %195, %189 : vector<8x1xi32>
    %197 = vector.broadcast %196 : vector<8x1xi32> to vector<8x128xi32>
    %198 = arith.cmpi eq, %9, %197 : vector<8x128xi32>
    %199 = arith.extui %198 : vector<8x128xi1> to vector<8x128xi32>
    %200 = arith.sitofp %199 : vector<8x128xi32> to vector<8x128xf32>
    %201 = arith.truncf %200 : vector<8x128xf32> to vector<8x128xbf16>
    %c4_i32 = arith.constant 4 : i32
    %cst_60 = arith.constant dense<0.000000e+00> : vector<8x512xf32>
    %202 = tpu.matmul %201, %0, %cst_60 {dimension_numbers = #tpu.dot_dimension_numbers<[1], [0], [0], [1], [0, 0, 1, 1], [], []>} : vector<8x128xbf16>, vector<128x512xbf16>, vector<8x512xf32> -> vector<8x512xf32>
    %203 = arith.truncf %173 : vector<8x128xf32> to vector<8x128xbf16>
    %cst_61 = arith.constant dense<0.000000e+00> : vector<8x512xf32>
    %204 = tpu.matmul %203, %1, %cst_61 {dimension_numbers = #tpu.dot_dimension_numbers<[1], [0], [0], [1], [0, 0, 1, 1], [], []>} : vector<8x128xbf16>, vector<128x512xbf16>, vector<8x512xf32> -> vector<8x512xf32>
    %205 = arith.addf %202, %204 : vector<8x512xf32>
    %206 = arith.addf %205, %5 : vector<8x512xf32>
    %207 = vector.extract_strided_slice %206 {offsets = [0, 0], sizes = [8, 128], strides = [1, 1]} : vector<8x512xf32> to vector<8x128xf32>
    %208 = arith.negf %207 : vector<8x128xf32>
    %209 = math.exp %208 : vector<8x128xf32>
    %cst_62 = arith.constant 1.000000e+00 : f32
    %210 = vector.broadcast %cst_62 : f32 to vector<8x128xf32>
    %211 = arith.addf %210, %209 : vector<8x128xf32>
    %212 = arith.divf %210, %211 : vector<8x128xf32>
    %213 = vector.extract_strided_slice %206 {offsets = [0, 128], sizes = [8, 128], strides = [1, 1]} : vector<8x512xf32> to vector<8x128xf32>
    %214 = arith.negf %213 : vector<8x128xf32>
    %215 = math.exp %214 : vector<8x128xf32>
    %cst_63 = arith.constant 1.000000e+00 : f32
    %216 = vector.broadcast %cst_63 : f32 to vector<8x128xf32>
    %217 = arith.addf %216, %215 : vector<8x128xf32>
    %218 = arith.divf %216, %217 : vector<8x128xf32>
    %219 = vector.extract_strided_slice %206 {offsets = [0, 256], sizes = [8, 128], strides = [1, 1]} : vector<8x512xf32> to vector<8x128xf32>
    %220 = math.tanh %219 : vector<8x128xf32>
    %221 = vector.extract_strided_slice %206 {offsets = [0, 384], sizes = [8, 128], strides = [1, 1]} : vector<8x512xf32> to vector<8x128xf32>
    %222 = arith.negf %221 : vector<8x128xf32>
    %223 = math.exp %222 : vector<8x128xf32>
    %cst_64 = arith.constant 1.000000e+00 : f32
    %224 = vector.broadcast %cst_64 : f32 to vector<8x128xf32>
    %225 = arith.addf %224, %223 : vector<8x128xf32>
    %226 = arith.divf %224, %225 : vector<8x128xf32>
    %227 = arith.mulf %218, %171 : vector<8x128xf32>
    %228 = arith.mulf %212, %220 : vector<8x128xf32>
    %229 = arith.addf %227, %228 : vector<8x128xf32>
    %230 = math.tanh %229 : vector<8x128xf32>
    %231 = arith.mulf %226, %230 : vector<8x128xf32>
    %232 = arith.truncf %231 : vector<8x128xf32> to vector<8x128xbf16>
    %cst_65 = arith.constant dense<0.000000e+00> : vector<8x128xf32>
    %233 = tpu.matmul %232, %2, %cst_65 {dimension_numbers = #tpu.dot_dimension_numbers<[1], [0], [0], [1], [0, 0, 1, 1], [], []>} : vector<8x128xbf16>, vector<128x128xbf16>, vector<8x128xf32> -> vector<8x128xf32>
    %234 = arith.addf %233, %8 : vector<8x128xf32>
    %235 = arith.index_cast %c4_i32 : i32 to index
    %c0_66 = arith.constant 0 : index
    %c0_67 = arith.constant 0 : index
    %236 = vector.load %arg8[%235, %c0_66, %c0_67] : memref<8x8x128xf32, #tpu.memory_space<vmem>>, vector<1x8x128xf32>
    %237 = vector.shape_cast %236 : vector<1x8x128xf32> to vector<8x128xf32>
    %238 = vector.shape_cast %234 : vector<8x128xf32> to vector<1x8x128xf32>
    tpu.vector_store %arg8[%235, %c0_66, %c0_67], %238 {strides = array<i32>} : memref<8x8x128xf32, #tpu.memory_space<vmem>>, vector<1x8x128xf32>,
    %239 = arith.addf %234, %14 : vector<8x128xf32>
    %cst_68 = arith.constant dense<0xFF800000> : vector<8xf32>
    %240 = vector.multi_reduction <maximumf>, %239, %cst_68 [1] : vector<8x128xf32> to vector<8xf32>
    %241 = vector.shape_cast %240 : vector<8xf32> to vector<8x1xf32>
    %242 = vector.broadcast %241 : vector<8x1xf32> to vector<8x128xf32>
    %243 = arith.cmpf oeq, %239, %242 : vector<8x128xf32>
    %c128_i32_69 = arith.constant 128 : i32
    %244 = vector.broadcast %c128_i32_69 : i32 to vector<8x128xi32>
    %245 = arith.select %243, %9, %244 : vector<8x128xi1>, vector<8x128xi32>
    %cst_70 = arith.constant dense<2147483647> : vector<8xi32>
    %246 = vector.multi_reduction <minsi>, %245, %cst_70 [1] : vector<8x128xi32> to vector<8xi32>
    %247 = vector.shape_cast %246 : vector<8xi32> to vector<8x1xi32>
    %248 = arith.index_cast %c4_i32 : i32 to index
    %249 = memref.load %arg0[%248] : memref<8xi32, #tpu.memory_space<smem>>
    %c0_i32_71 = arith.constant 0 : i32
    %250 = arith.cmpi sgt, %249, %c0_i32_71 : i32
    %251 = arith.index_cast %c4_i32 : i32 to index
    %c0_72 = arith.constant 0 : index
    %c0_73 = arith.constant 0 : index
    %252 = vector.load %arg1[%251, %c0_72, %c0_73] : memref<8x8x1xi32, #tpu.memory_space<vmem>>, vector<1x8x1xi32>
    %253 = vector.shape_cast %252 : vector<1x8x1xi32> to vector<8x1xi32>
    %254 = arith.select %250, %253, %247 : vector<8x1xi32>
    %255 = vector.broadcast %254 : vector<8x1xi32> to vector<8x128xi32>
    %256 = arith.cmpi eq, %9, %255 : vector<8x128xi32>
    %257 = arith.extui %256 : vector<8x128xi1> to vector<8x128xi32>
    %258 = arith.sitofp %257 : vector<8x128xi32> to vector<8x128xf32>
    %259 = arith.truncf %258 : vector<8x128xf32> to vector<8x128xbf16>
    %c5_i32 = arith.constant 5 : i32
    %cst_74 = arith.constant dense<0.000000e+00> : vector<8x512xf32>
    %260 = tpu.matmul %259, %0, %cst_74 {dimension_numbers = #tpu.dot_dimension_numbers<[1], [0], [0], [1], [0, 0, 1, 1], [], []>} : vector<8x128xbf16>, vector<128x512xbf16>, vector<8x512xf32> -> vector<8x512xf32>
    %261 = arith.truncf %231 : vector<8x128xf32> to vector<8x128xbf16>
    %cst_75 = arith.constant dense<0.000000e+00> : vector<8x512xf32>
    %262 = tpu.matmul %261, %1, %cst_75 {dimension_numbers = #tpu.dot_dimension_numbers<[1], [0], [0], [1], [0, 0, 1, 1], [], []>} : vector<8x128xbf16>, vector<128x512xbf16>, vector<8x512xf32> -> vector<8x512xf32>
    %263 = arith.addf %260, %262 : vector<8x512xf32>
    %264 = arith.addf %263, %5 : vector<8x512xf32>
    %265 = vector.extract_strided_slice %264 {offsets = [0, 0], sizes = [8, 128], strides = [1, 1]} : vector<8x512xf32> to vector<8x128xf32>
    %266 = arith.negf %265 : vector<8x128xf32>
    %267 = math.exp %266 : vector<8x128xf32>
    %cst_76 = arith.constant 1.000000e+00 : f32
    %268 = vector.broadcast %cst_76 : f32 to vector<8x128xf32>
    %269 = arith.addf %268, %267 : vector<8x128xf32>
    %270 = arith.divf %268, %269 : vector<8x128xf32>
    %271 = vector.extract_strided_slice %264 {offsets = [0, 128], sizes = [8, 128], strides = [1, 1]} : vector<8x512xf32> to vector<8x128xf32>
    %272 = arith.negf %271 : vector<8x128xf32>
    %273 = math.exp %272 : vector<8x128xf32>
    %cst_77 = arith.constant 1.000000e+00 : f32
    %274 = vector.broadcast %cst_77 : f32 to vector<8x128xf32>
    %275 = arith.addf %274, %273 : vector<8x128xf32>
    %276 = arith.divf %274, %275 : vector<8x128xf32>
    %277 = vector.extract_strided_slice %264 {offsets = [0, 256], sizes = [8, 128], strides = [1, 1]} : vector<8x512xf32> to vector<8x128xf32>
    %278 = math.tanh %277 : vector<8x128xf32>
    %279 = vector.extract_strided_slice %264 {offsets = [0, 384], sizes = [8, 128], strides = [1, 1]} : vector<8x512xf32> to vector<8x128xf32>
    %280 = arith.negf %279 : vector<8x128xf32>
    %281 = math.exp %280 : vector<8x128xf32>
    %cst_78 = arith.constant 1.000000e+00 : f32
    %282 = vector.broadcast %cst_78 : f32 to vector<8x128xf32>
    %283 = arith.addf %282, %281 : vector<8x128xf32>
    %284 = arith.divf %282, %283 : vector<8x128xf32>
    %285 = arith.mulf %276, %229 : vector<8x128xf32>
    %286 = arith.mulf %270, %278 : vector<8x128xf32>
    %287 = arith.addf %285, %286 : vector<8x128xf32>
    %288 = math.tanh %287 : vector<8x128xf32>
    %289 = arith.mulf %284, %288 : vector<8x128xf32>
    %290 = arith.truncf %289 : vector<8x128xf32> to vector<8x128xbf16>
    %cst_79 = arith.constant dense<0.000000e+00> : vector<8x128xf32>
    %291 = tpu.matmul %290, %2, %cst_79 {dimension_numbers = #tpu.dot_dimension_numbers<[1], [0], [0], [1], [0, 0, 1, 1], [], []>} : vector<8x128xbf16>, vector<128x128xbf16>, vector<8x128xf32> -> vector<8x128xf32>
    %292 = arith.addf %291, %8 : vector<8x128xf32>
    %293 = arith.index_cast %c5_i32 : i32 to index
    %c0_80 = arith.constant 0 : index
    %c0_81 = arith.constant 0 : index
    %294 = vector.load %arg8[%293, %c0_80, %c0_81] : memref<8x8x128xf32, #tpu.memory_space<vmem>>, vector<1x8x128xf32>
    %295 = vector.shape_cast %294 : vector<1x8x128xf32> to vector<8x128xf32>
    %296 = vector.shape_cast %292 : vector<8x128xf32> to vector<1x8x128xf32>
    tpu.vector_store %arg8[%293, %c0_80, %c0_81], %296 {strides = array<i32>} : memref<8x8x128xf32, #tpu.memory_space<vmem>>, vector<1x8x128xf32>,
    %297 = arith.addf %292, %14 : vector<8x128xf32>
    %cst_82 = arith.constant dense<0xFF800000> : vector<8xf32>
    %298 = vector.multi_reduction <maximumf>, %297, %cst_82 [1] : vector<8x128xf32> to vector<8xf32>
    %299 = vector.shape_cast %298 : vector<8xf32> to vector<8x1xf32>
    %300 = vector.broadcast %299 : vector<8x1xf32> to vector<8x128xf32>
    %301 = arith.cmpf oeq, %297, %300 : vector<8x128xf32>
    %c128_i32_83 = arith.constant 128 : i32
    %302 = vector.broadcast %c128_i32_83 : i32 to vector<8x128xi32>
    %303 = arith.select %301, %9, %302 : vector<8x128xi1>, vector<8x128xi32>
    %cst_84 = arith.constant dense<2147483647> : vector<8xi32>
    %304 = vector.multi_reduction <minsi>, %303, %cst_84 [1] : vector<8x128xi32> to vector<8xi32>
    %305 = vector.shape_cast %304 : vector<8xi32> to vector<8x1xi32>
    %306 = arith.index_cast %c5_i32 : i32 to index
    %307 = memref.load %arg0[%306] : memref<8xi32, #tpu.memory_space<smem>>
    %c0_i32_85 = arith.constant 0 : i32
    %308 = arith.cmpi sgt, %307, %c0_i32_85 : i32
    %309 = arith.index_cast %c5_i32 : i32 to index
    %c0_86 = arith.constant 0 : index
    %c0_87 = arith.constant 0 : index
    %310 = vector.load %arg1[%309, %c0_86, %c0_87] : memref<8x8x1xi32, #tpu.memory_space<vmem>>, vector<1x8x1xi32>
    %311 = vector.shape_cast %310 : vector<1x8x1xi32> to vector<8x1xi32>
    %312 = arith.select %308, %311, %305 : vector<8x1xi32>
    %313 = vector.broadcast %312 : vector<8x1xi32> to vector<8x128xi32>
    %314 = arith.cmpi eq, %9, %313 : vector<8x128xi32>
    %315 = arith.extui %314 : vector<8x128xi1> to vector<8x128xi32>
    %316 = arith.sitofp %315 : vector<8x128xi32> to vector<8x128xf32>
    %317 = arith.truncf %316 : vector<8x128xf32> to vector<8x128xbf16>
    %c6_i32 = arith.constant 6 : i32
    %cst_88 = arith.constant dense<0.000000e+00> : vector<8x512xf32>
    %318 = tpu.matmul %317, %0, %cst_88 {dimension_numbers = #tpu.dot_dimension_numbers<[1], [0], [0], [1], [0, 0, 1, 1], [], []>} : vector<8x128xbf16>, vector<128x512xbf16>, vector<8x512xf32> -> vector<8x512xf32>
    %319 = arith.truncf %289 : vector<8x128xf32> to vector<8x128xbf16>
    %cst_89 = arith.constant dense<0.000000e+00> : vector<8x512xf32>
    %320 = tpu.matmul %319, %1, %cst_89 {dimension_numbers = #tpu.dot_dimension_numbers<[1], [0], [0], [1], [0, 0, 1, 1], [], []>} : vector<8x128xbf16>, vector<128x512xbf16>, vector<8x512xf32> -> vector<8x512xf32>
    %321 = arith.addf %318, %320 : vector<8x512xf32>
    %322 = arith.addf %321, %5 : vector<8x512xf32>
    %323 = vector.extract_strided_slice %322 {offsets = [0, 0], sizes = [8, 128], strides = [1, 1]} : vector<8x512xf32> to vector<8x128xf32>
    %324 = arith.negf %323 : vector<8x128xf32>
    %325 = math.exp %324 : vector<8x128xf32>
    %cst_90 = arith.constant 1.000000e+00 : f32
    %326 = vector.broadcast %cst_90 : f32 to vector<8x128xf32>
    %327 = arith.addf %326, %325 : vector<8x128xf32>
    %328 = arith.divf %326, %327 : vector<8x128xf32>
    %329 = vector.extract_strided_slice %322 {offsets = [0, 128], sizes = [8, 128], strides = [1, 1]} : vector<8x512xf32> to vector<8x128xf32>
    %330 = arith.negf %329 : vector<8x128xf32>
    %331 = math.exp %330 : vector<8x128xf32>
    %cst_91 = arith.constant 1.000000e+00 : f32
    %332 = vector.broadcast %cst_91 : f32 to vector<8x128xf32>
    %333 = arith.addf %332, %331 : vector<8x128xf32>
    %334 = arith.divf %332, %333 : vector<8x128xf32>
    %335 = vector.extract_strided_slice %322 {offsets = [0, 256], sizes = [8, 128], strides = [1, 1]} : vector<8x512xf32> to vector<8x128xf32>
    %336 = math.tanh %335 : vector<8x128xf32>
    %337 = vector.extract_strided_slice %322 {offsets = [0, 384], sizes = [8, 128], strides = [1, 1]} : vector<8x512xf32> to vector<8x128xf32>
    %338 = arith.negf %337 : vector<8x128xf32>
    %339 = math.exp %338 : vector<8x128xf32>
    %cst_92 = arith.constant 1.000000e+00 : f32
    %340 = vector.broadcast %cst_92 : f32 to vector<8x128xf32>
    %341 = arith.addf %340, %339 : vector<8x128xf32>
    %342 = arith.divf %340, %341 : vector<8x128xf32>
    %343 = arith.mulf %334, %287 : vector<8x128xf32>
    %344 = arith.mulf %328, %336 : vector<8x128xf32>
    %345 = arith.addf %343, %344 : vector<8x128xf32>
    %346 = math.tanh %345 : vector<8x128xf32>
    %347 = arith.mulf %342, %346 : vector<8x128xf32>
    %348 = arith.truncf %347 : vector<8x128xf32> to vector<8x128xbf16>
    %cst_93 = arith.constant dense<0.000000e+00> : vector<8x128xf32>
    %349 = tpu.matmul %348, %2, %cst_93 {dimension_numbers = #tpu.dot_dimension_numbers<[1], [0], [0], [1], [0, 0, 1, 1], [], []>} : vector<8x128xbf16>, vector<128x128xbf16>, vector<8x128xf32> -> vector<8x128xf32>
    %350 = arith.addf %349, %8 : vector<8x128xf32>
    %351 = arith.index_cast %c6_i32 : i32 to index
    %c0_94 = arith.constant 0 : index
    %c0_95 = arith.constant 0 : index
    %352 = vector.load %arg8[%351, %c0_94, %c0_95] : memref<8x8x128xf32, #tpu.memory_space<vmem>>, vector<1x8x128xf32>
    %353 = vector.shape_cast %352 : vector<1x8x128xf32> to vector<8x128xf32>
    %354 = vector.shape_cast %350 : vector<8x128xf32> to vector<1x8x128xf32>
    tpu.vector_store %arg8[%351, %c0_94, %c0_95], %354 {strides = array<i32>} : memref<8x8x128xf32, #tpu.memory_space<vmem>>, vector<1x8x128xf32>,
    %355 = arith.addf %350, %14 : vector<8x128xf32>
    %cst_96 = arith.constant dense<0xFF800000> : vector<8xf32>
    %356 = vector.multi_reduction <maximumf>, %355, %cst_96 [1] : vector<8x128xf32> to vector<8xf32>
    %357 = vector.shape_cast %356 : vector<8xf32> to vector<8x1xf32>
    %358 = vector.broadcast %357 : vector<8x1xf32> to vector<8x128xf32>
    %359 = arith.cmpf oeq, %355, %358 : vector<8x128xf32>
    %c128_i32_97 = arith.constant 128 : i32
    %360 = vector.broadcast %c128_i32_97 : i32 to vector<8x128xi32>
    %361 = arith.select %359, %9, %360 : vector<8x128xi1>, vector<8x128xi32>
    %cst_98 = arith.constant dense<2147483647> : vector<8xi32>
    %362 = vector.multi_reduction <minsi>, %361, %cst_98 [1] : vector<8x128xi32> to vector<8xi32>
    %363 = vector.shape_cast %362 : vector<8xi32> to vector<8x1xi32>
    %364 = arith.index_cast %c6_i32 : i32 to index
    %365 = memref.load %arg0[%364] : memref<8xi32, #tpu.memory_space<smem>>
    %c0_i32_99 = arith.constant 0 : i32
    %366 = arith.cmpi sgt, %365, %c0_i32_99 : i32
    %367 = arith.index_cast %c6_i32 : i32 to index
    %c0_100 = arith.constant 0 : index
    %c0_101 = arith.constant 0 : index
    %368 = vector.load %arg1[%367, %c0_100, %c0_101] : memref<8x8x1xi32, #tpu.memory_space<vmem>>, vector<1x8x1xi32>
    %369 = vector.shape_cast %368 : vector<1x8x1xi32> to vector<8x1xi32>
    %370 = arith.select %366, %369, %363 : vector<8x1xi32>
    %371 = vector.broadcast %370 : vector<8x1xi32> to vector<8x128xi32>
    %372 = arith.cmpi eq, %9, %371 : vector<8x128xi32>
    %373 = arith.extui %372 : vector<8x128xi1> to vector<8x128xi32>
    %374 = arith.sitofp %373 : vector<8x128xi32> to vector<8x128xf32>
    %375 = arith.truncf %374 : vector<8x128xf32> to vector<8x128xbf16>
    %c7_i32 = arith.constant 7 : i32
    %cst_102 = arith.constant dense<0.000000e+00> : vector<8x512xf32>
    %376 = tpu.matmul %375, %0, %cst_102 {dimension_numbers = #tpu.dot_dimension_numbers<[1], [0], [0], [1], [0, 0, 1, 1], [], []>} : vector<8x128xbf16>, vector<128x512xbf16>, vector<8x512xf32> -> vector<8x512xf32>
    %377 = arith.truncf %347 : vector<8x128xf32> to vector<8x128xbf16>
    %cst_103 = arith.constant dense<0.000000e+00> : vector<8x512xf32>
    %378 = tpu.matmul %377, %1, %cst_103 {dimension_numbers = #tpu.dot_dimension_numbers<[1], [0], [0], [1], [0, 0, 1, 1], [], []>} : vector<8x128xbf16>, vector<128x512xbf16>, vector<8x512xf32> -> vector<8x512xf32>
    %379 = arith.addf %376, %378 : vector<8x512xf32>
    %380 = arith.addf %379, %5 : vector<8x512xf32>
    %381 = vector.extract_strided_slice %380 {offsets = [0, 0], sizes = [8, 128], strides = [1, 1]} : vector<8x512xf32> to vector<8x128xf32>
    %382 = arith.negf %381 : vector<8x128xf32>
    %383 = math.exp %382 : vector<8x128xf32>
    %cst_104 = arith.constant 1.000000e+00 : f32
    %384 = vector.broadcast %cst_104 : f32 to vector<8x128xf32>
    %385 = arith.addf %384, %383 : vector<8x128xf32>
    %386 = arith.divf %384, %385 : vector<8x128xf32>
    %387 = vector.extract_strided_slice %380 {offsets = [0, 128], sizes = [8, 128], strides = [1, 1]} : vector<8x512xf32> to vector<8x128xf32>
    %388 = arith.negf %387 : vector<8x128xf32>
    %389 = math.exp %388 : vector<8x128xf32>
    %cst_105 = arith.constant 1.000000e+00 : f32
    %390 = vector.broadcast %cst_105 : f32 to vector<8x128xf32>
    %391 = arith.addf %390, %389 : vector<8x128xf32>
    %392 = arith.divf %390, %391 : vector<8x128xf32>
    %393 = vector.extract_strided_slice %380 {offsets = [0, 256], sizes = [8, 128], strides = [1, 1]} : vector<8x512xf32> to vector<8x128xf32>
    %394 = math.tanh %393 : vector<8x128xf32>
    %395 = vector.extract_strided_slice %380 {offsets = [0, 384], sizes = [8, 128], strides = [1, 1]} : vector<8x512xf32> to vector<8x128xf32>
    %396 = arith.negf %395 : vector<8x128xf32>
    %397 = math.exp %396 : vector<8x128xf32>
    %cst_106 = arith.constant 1.000000e+00 : f32
    %398 = vector.broadcast %cst_106 : f32 to vector<8x128xf32>
    %399 = arith.addf %398, %397 : vector<8x128xf32>
    %400 = arith.divf %398, %399 : vector<8x128xf32>
    %401 = arith.mulf %392, %345 : vector<8x128xf32>
    %402 = arith.mulf %386, %394 : vector<8x128xf32>
    %403 = arith.addf %401, %402 : vector<8x128xf32>
    %404 = math.tanh %403 : vector<8x128xf32>
    %405 = arith.mulf %400, %404 : vector<8x128xf32>
    %406 = arith.truncf %405 : vector<8x128xf32> to vector<8x128xbf16>
    %cst_107 = arith.constant dense<0.000000e+00> : vector<8x128xf32>
    %407 = tpu.matmul %406, %2, %cst_107 {dimension_numbers = #tpu.dot_dimension_numbers<[1], [0], [0], [1], [0, 0, 1, 1], [], []>} : vector<8x128xbf16>, vector<128x128xbf16>, vector<8x128xf32> -> vector<8x128xf32>
    %408 = arith.addf %407, %8 : vector<8x128xf32>
    %409 = arith.index_cast %c7_i32 : i32 to index
    %c0_108 = arith.constant 0 : index
    %c0_109 = arith.constant 0 : index
    %410 = vector.load %arg8[%409, %c0_108, %c0_109] : memref<8x8x128xf32, #tpu.memory_space<vmem>>, vector<1x8x128xf32>
    %411 = vector.shape_cast %410 : vector<1x8x128xf32> to vector<8x128xf32>
    %412 = vector.shape_cast %408 : vector<8x128xf32> to vector<1x8x128xf32>
    tpu.vector_store %arg8[%409, %c0_108, %c0_109], %412 {strides = array<i32>} : memref<8x8x128xf32, #tpu.memory_space<vmem>>, vector<1x8x128xf32>,
    %413 = arith.addf %408, %14 : vector<8x128xf32>
    %cst_110 = arith.constant dense<0xFF800000> : vector<8xf32>
    %414 = vector.multi_reduction <maximumf>, %413, %cst_110 [1] : vector<8x128xf32> to vector<8xf32>
    %415 = vector.shape_cast %414 : vector<8xf32> to vector<8x1xf32>
    %416 = vector.broadcast %415 : vector<8x1xf32> to vector<8x128xf32>
    %417 = arith.cmpf oeq, %413, %416 : vector<8x128xf32>
    %c128_i32_111 = arith.constant 128 : i32
    %418 = vector.broadcast %c128_i32_111 : i32 to vector<8x128xi32>
    %419 = arith.select %417, %9, %418 : vector<8x128xi1>, vector<8x128xi32>
    %cst_112 = arith.constant dense<2147483647> : vector<8xi32>
    %420 = vector.multi_reduction <minsi>, %419, %cst_112 [1] : vector<8x128xi32> to vector<8xi32>
    %421 = vector.shape_cast %420 : vector<8xi32> to vector<8x1xi32>
    %422 = arith.index_cast %c7_i32 : i32 to index
    %423 = memref.load %arg0[%422] : memref<8xi32, #tpu.memory_space<smem>>
    %c0_i32_113 = arith.constant 0 : i32
    %424 = arith.cmpi sgt, %423, %c0_i32_113 : i32
    %425 = arith.index_cast %c7_i32 : i32 to index
    %c0_114 = arith.constant 0 : index
    %c0_115 = arith.constant 0 : index
    %426 = vector.load %arg1[%425, %c0_114, %c0_115] : memref<8x8x1xi32, #tpu.memory_space<vmem>>, vector<1x8x1xi32>
    %427 = vector.shape_cast %426 : vector<1x8x1xi32> to vector<8x1xi32>
    %428 = arith.select %424, %427, %421 : vector<8x1xi32>
    %429 = vector.broadcast %428 : vector<8x1xi32> to vector<8x128xi32>
    %430 = arith.cmpi eq, %9, %429 : vector<8x128xi32>
    %431 = arith.extui %430 : vector<8x128xi1> to vector<8x128xi32>
    %432 = arith.sitofp %431 : vector<8x128xi32> to vector<8x128xf32>
    %433 = arith.truncf %432 : vector<8x128xf32> to vector<8x128xbf16>
    %c7_i32_116 = arith.constant 7 : i32
    return
  }
}

</mosaic_0001>

<bundles_post_ra>
// kernel: seq2seq_forward.2
= control target key start
LH: loop header
LB: loop body
LE: loop exit
PB: predicated region body
PF: predicated region fallthrough
CT: control target
= control target key end

     0   :  { %10 = vsyncpa [#allocation4], 0  ;;  %s2123_s0 = inlined_call_operand.vmem [shape: bf16[64,128], index: 0, kind: input, shape index: {}]   ;;  %s2124_s1 = inlined_call_operand.hbm [shape: bf16[128,384], index: 1, kind: input, shape index: {}]   ;;  %s2125_s2 = inlined_call_operand.hbm [shape: bf16[128,384], index: 2, kind: input, shape index: {}]   ;;  %s2126_s3 = inlined_call_operand.vmem [shape: f32[1,384], index: 3, kind: input, shape index: {}]   ;;  %s2127_s4 = inlined_call_operand.vmem [shape: f32[1,384], index: 4, kind: input, shape index: {}]   ;;  %s2128_s5 = inlined_call_operand.vmem [shape: f32[8,128], index: 5, kind: output, shape index: {}]  }
   0x1   :  { %s18_s20 = sshll.u32 %s2124_s1, 4  ;;  %s19_s20 = int_to_ptr.hbm [resolvable:$true] %s18_s20 }
   0x2   :  { %11 = vsyncpa [#allocation6], 0  ;;  %s1678_s21 = smov [#allocation3]   ;;  %s31_s25 = sshll.u32 %s2125_s2, 4  ;;  %s32_s25 = int_to_ptr.hbm [resolvable:$true] %s31_s25 }
   0x3   :  { %s20_s22 = sshll.u32 %s1678_s21, 4  ;;  %s1679_s26 = smov 192   ;;  %s21_s22 = int_to_ptr.vmem [resolvable:$true] %s20_s22 }
   0x4   :  { %s1680_s27 = smov 12   ;;  %s1681_s28 = smov [#allocation5]  }
   0x5   :  { %26 = dma.hbm_to_vmem [thread:$0]  %s19_s20, 3072, %s21_s22, [#allocation4], %s1679_s26, %s1679_s26, %s1680_s27  }
   0x6   :  { %s33_s29 = sshll.u32 %s1681_s28, 4  ;;  %s34_s29 = int_to_ptr.vmem [resolvable:$true] %s33_s29 }
   0x7   :  { %39 = dma.hbm_to_vmem [thread:$0]  %s32_s25, 3072, %s34_s29, [#allocation6], %s1679_s26, %s1679_s26, %s1680_s27  }
   0x8   :  { %1674 = dma.done.wait [#allocation4], 3072  }
   0x9   :  { %1675 = vsyncadd [#allocation4], 4294964224 }
   0xa   :  { %1676 = dma.done.wait [#allocation6], 3072  }
   0xb   :  { %1677 = vsyncadd [#allocation6], 4294964224  ;;  %v1367_v0 = vld [vmem:[#allocation3 + $0xa8] sm:$0xf]  ;;  %v1515_v1 = vld [vmem:[#allocation3 + $0xb0] sm:$0xf0] }
   0xc   :  { %v1463_v2 = vld [vmem:[#allocation5 + $0xa8] sm:$0xf]  ;;  %v1368_v3 = vor.u32 %v1515_v1, %v1367_v0  ;;  %v1539_v4 = vld [vmem:[#allocation5 + $0xb0] sm:$0xf0]  ;;  %v1355_v5 = vld [vmem:[#allocation3 + $0x90] sm:$0xf] }
   0xd   :  { %v1512_v6 = vld [vmem:[#allocation3 + $0x98] sm:$0xf0]  ;;  %v1719_v7 = vor.u32 %v1539_v4, %v1463_v2  ;;  %v1451_v8 = vld [vmem:[#allocation5 + $0x90] sm:$0xf]  ;;  %v1343_v12 = vld [vmem:[#allocation3 + $0x78] sm:$0xf] }
   0xe   :  { %v1536_v9 = vld [vmem:[#allocation5 + $0x98] sm:$0xf0]  ;;  %253 = vmatpush.bf16.msra.mxu0 %v1368_v3  ;;  %v1356_v10 = vor.u32 %v1512_v6, %v1355_v5  ;;  %v1509_v13 = vld [vmem:[#allocation3 + $0x80] sm:$0xf0]  ;;  %v1439_v14 = vld [vmem:[#allocation5 + $0x78] sm:$0xf] }
   0xf   :  { %535 = vmatpush.bf16.msra.mxu3 %v1719_v7  ;;  %v1722_v11 = vor.u32 %v1536_v9, %v1451_v8  ;;  %v1533_v15 = vld [vmem:[#allocation5 + $0x80] sm:$0xf0]  ;;  %v1344_v16 = vor.u32 %v1509_v13, %v1343_v12  ;;  %v1331_v18 = vld [vmem:[#allocation3 + $0x60] sm:$0xf]  ;;  %v1506_v19 = vld [vmem:[#allocation3 + $0x68] sm:$0xf0] }
  0x10   :  { %v1725_v17 = vor.u32 %v1533_v15, %v1439_v14  ;;  %v1427_v20 = vld [vmem:[#allocation5 + $0x60] sm:$0xf]  ;;  %v1530_v21 = vld [vmem:[#allocation5 + $0x68] sm:$0xf0]  ;;  %v1332_v22 = vor.u32 %v1506_v19, %v1331_v18  ;;  %v1319_v24 = vld [vmem:[#allocation3 + $0x48] sm:$0xf] }
  0x11   :  { %v1728_v23 = vor.u32 %v1530_v21, %v1427_v20  ;;  %v1503_v25 = vld [vmem:[#allocation3 + $0x50] sm:$0xf0]  ;;  %v1415_v26 = vld [vmem:[#allocation5 + $0x48] sm:$0xf]  ;;  %v1514_v28 = vld [vmem:[#allocation3 + $0xac] sm:$0xf] }
  0x12   :  { %254 = vmatpush.bf16.msra.mxu0 %v1356_v10  ;;  %v1527_v27 = vld [vmem:[#allocation5 + $0x50] sm:$0xf0]  ;;  %v1369_v29 = vld [vmem:[#allocation3 + $0xb4] sm:$0xf0]  ;;  %v1357_v32 = vld [vmem:[#allocation3 + $0x9c] sm:$0xf0]  ;;  %v1320_v33 = vor.u32 %v1503_v25, %v1319_v24 }
  0x13   :  { %536 = vmatpush.bf16.msra.mxu3 %v1722_v11  ;;  %v1372_v30 = vor.u32 %v1514_v28, %v1369_v29  ;;  %v1511_v31 = vld [vmem:[#allocation3 + $0x94] sm:$0xf]  ;;  %v1731_v34 = vor.u32 %v1527_v27, %v1415_v26  ;;  %v1307_v35 = vld [vmem:[#allocation3 + $0x30] sm:$0xf]  ;;  %v1500_v36 = vld [vmem:[#allocation3 + $0x38] sm:$0xf0] }
  0x14   :  { %v1403_v37 = vld [vmem:[#allocation5 + $0x30] sm:$0xf]  ;;  %v1360_v38 = vor.u32 %v1511_v31, %v1357_v32  ;;  %v1524_v39 = vld [vmem:[#allocation5 + $0x38] sm:$0xf0]  ;;  %v1345_v41 = vld [vmem:[#allocation3 + $0x84] sm:$0xf0]  ;;  %v1308_v42 = vor.u32 %v1500_v36, %v1307_v35 }
  0x15   :  { %282 = vmatpush.bf16.msra.mxu1 %v1372_v30  ;;  %v1508_v40 = vld [vmem:[#allocation3 + $0x7c] sm:$0xf]  ;;  %v1295_v43 = vld [vmem:[#allocation3 + $0x18] sm:$0xf]  ;;  %v1497_v44 = vld [vmem:[#allocation3 + $0x20] sm:$0xf0]  ;;  %v1734_v45 = vor.u32 %v1524_v39, %v1403_v37 }
  0x16   :  { %255 = vmatpush.bf16.msra.mxu0 %v1344_v16  ;;  %v1391_v46 = vld [vmem:[#allocation5 + $0x18] sm:$0xf]  ;;  %v1521_v47 = vld [vmem:[#allocation5 + $0x20] sm:$0xf0]  ;;  %v1348_v48 = vor.u32 %v1508_v40, %v1345_v41  ;;  %v1333_v50 = vld [vmem:[#allocation3 + $0x6c] sm:$0xf0]  ;;  %v1296_v54 = vor.u32 %v1497_v44, %v1295_v43 }
  0x17   :  { %537 = vmatpush.bf16.msra.mxu3 %v1725_v17  ;;  %v1505_v49 = vld [vmem:[#allocation3 + $0x64] sm:$0xf]  ;;  %v1375_v51 = vld [vmem:[#allocation3 + $0xb0] sm:$0xf]  ;;  %v1516_v52 = vld [vmem:[#allocation3 + $0xb8] sm:$0xf0]  ;;  %v1737_v58 = vor.u32 %v1521_v47, %v1391_v46 }
  0x18   :  { %v1376_v53 = vor.u32 %v1516_v52, %v1375_v51  ;;  %v1283_v55 = vld [vmem:[#allocation3] sm:$0xf]  ;;  %v1494_v56 = vld [vmem:[#allocation3 + $0x8] sm:$0xf0]  ;;  %v1465_v61 = vld [vmem:[#allocation5 + $0xb4] sm:$0xf0]  ;;  %v1336_v62 = vor.u32 %v1505_v49, %v1333_v50 }
  0x19   :  { %283 = vmatpush.bf16.msra.mxu1 %v1360_v38  ;;  %v1379_v57 = vld [vmem:[#allocation5] sm:$0xf]  ;;  %v1518_v59 = vld [vmem:[#allocation5 + $0x8] sm:$0xf0]  ;;  %v1471_v63 = vld [vmem:[#allocation5 + $0xb0] sm:$0xf]  ;;  %v1284_v5 = vor.u32 %v1494_v56, %v1283_v55 }
  0x1a   :  { %256 = vmatpush.bf16.msra.mxu0 %v1332_v22  ;;  %v1538_v60 = vld [vmem:[#allocation5 + $0xac] sm:$0xf]  ;;  %v1540_v0 = vld [vmem:[#allocation5 + $0xb8] sm:$0xf0]  ;;  %311 = vmatpush.bf16.msra.mxu2 %v1376_v53  ;;  %v1363_v1 = vld [vmem:[#allocation3 + $0x98] sm:$0xf]  ;;  %v1740_v8 = vor.u32 %v1518_v59, %v1379_v57 }
  0x1b   :  { %538 = vmatpush.bf16.msra.mxu3 %v1728_v23  ;;  %v1502_v2 = vld [vmem:[#allocation3 + $0x4c] sm:$0xf]  ;;  %v1321_v3 = vld [vmem:[#allocation3 + $0x54] sm:$0xf0]  ;;  %v1513_v4 = vld [vmem:[#allocation3 + $0xa0] sm:$0xf0]  ;;  %v1747_v10 = vor.u32 %v1540_v0, %v1471_v63  ;;  %v1749_v14 = vor.u32 %v1538_v60, %v1465_v61 }
  0x1c   :  { %v1364_v6 = vor.u32 %v1513_v4, %v1363_v1  ;;  %v1745_v9 = vld [vmem:[%s2123_s0] sm:$0xff]  ;;  %v1535_v12 = vld [vmem:[#allocation5 + $0x94] sm:$0xf]  ;;  %v1459_v13 = vld [vmem:[#allocation5 + $0x98] sm:$0xf]  ;;  %v1324_v16 = vor.u32 %v1502_v2, %v1321_v3  ;;  %v1682_v38 = vmov 0  }
  0x1d   :  { %284 = vmatpush.bf16.msra.mxu1 %v1348_v48  ;;  %v1537_v15 = vld [vmem:[#allocation5 + $0xa0] sm:$0xf0]  ;;  %v1351_v18 = vld [vmem:[#allocation3 + $0x80] sm:$0xf]  ;;  %v1510_v19 = vld [vmem:[#allocation3 + $0x88] sm:$0xf0] }
  0x1e   :  { %257 = vmatpush.bf16.msra.mxu0 %v1320_v33  ;;  %312 = vmatpush.bf16.msra.mxu2 %v1364_v6  ;;  %v1453_v20 = vld [vmem:[#allocation5 + $0x9c] sm:$0xf0]  ;;  %v1499_v21 = vld [vmem:[#allocation3 + $0x34] sm:$0xf]  ;;  %v1352_v24 = vor.u32 %v1510_v19, %v1351_v18  ;;  %v1532_v25 = vld [vmem:[#allocation5 + $0x7c] sm:$0xf]  ;;  %v1753_v26 = vor.u32 %v1537_v15, %v1459_v13 }
  0x1f   :  { %539 = vmatpush.bf16.msra.mxu3 %v1731_v34  ;;  %v1309_v22 = vld [vmem:[#allocation3 + $0x3c] sm:$0xf0]  ;;  %v1756_v28 = vor.u32 %v1535_v12, %v1453_v20  ;;  %v1534_v29 = vld [vmem:[#allocation5 + $0x88] sm:$0xf0]  ;;  %v1339_v31 = vld [vmem:[#allocation3 + $0x68] sm:$0xf] }
  0x20   :  { %v1447_v27 = vld [vmem:[#allocation5 + $0x80] sm:$0xf]  ;;  %v1312_v30 = vor.u32 %v1499_v21, %v1309_v22  ;;  %v1507_v32 = vld [vmem:[#allocation3 + $0x70] sm:$0xf0]  ;;  %v1441_v33 = vld [vmem:[#allocation5 + $0x84] sm:$0xf0] }
  0x21   :  { %285 = vmatpush.bf16.msra.mxu1 %v1336_v62  ;;  %v1496_v35 = vld [vmem:[#allocation3 + $0x1c] sm:$0xf]  ;;  %v1297_v36 = vld [vmem:[#allocation3 + $0x24] sm:$0xf0]  ;;  %v1340_v37 = vor.u32 %v1507_v32, %v1339_v31  ;;  %v1327_v39 = vld [vmem:[#allocation3 + $0x50] sm:$0xf]  ;;  %v1761_v41 = vor.u32 %v1534_v29, %v1447_v27 }
  0x22   :  { %258 = vmatpush.bf16.msra.mxu0 %v1308_v42  ;;  %313 = vmatpush.bf16.msra.mxu2 %v1352_v24  ;;  %v1504_v40 = vld [vmem:[#allocation3 + $0x58] sm:$0xf0]  ;;  %v1764_v42 = vor.u32 %v1532_v25, %v1441_v33  ;;  %v1529_v43 = vld [vmem:[#allocation5 + $0x64] sm:$0xf]  ;;  %v1435_v44 = vld [vmem:[#allocation5 + $0x68] sm:$0xf]  ;;  %v1300_v47 = vor.u32 %v1496_v35, %v1297_v36 }
  0x23   :  { %540 = vmatpush.bf16.msra.mxu3 %v1734_v45  ;;  %v1531_v46 = vld [vmem:[#allocation5 + $0x70] sm:$0xf0]  ;;  %v1429_v48 = vld [vmem:[#allocation5 + $0x6c] sm:$0xf0]  ;;  %v1493_v49 = vld [vmem:[#allocation3 + $0x4] sm:$0xf]  ;;  %v1328_v51 = vor.u32 %v1504_v40, %v1327_v39 }
  0x24   :  { %v1285_v50 = vld [vmem:[#allocation3 + $0xc] sm:$0xf0]  ;;  %v1315_v52 = vld [vmem:[#allocation3 + $0x38] sm:$0xf]  ;;  %v1501_v53 = vld [vmem:[#allocation3 + $0x40] sm:$0xf0]  ;;  %v1770_v55 = vor.u32 %v1529_v43, %v1429_v48 }
  0x25   :  { %286 = vmatpush.bf16.msra.mxu1 %v1324_v16  ;;  %v1288_v56 = vor.u32 %v1493_v49, %v1285_v50  ;;  %v1423_v57 = vld [vmem:[#allocation5 + $0x50] sm:$0xf]  ;;  %v1528_v59 = vld [vmem:[#allocation5 + $0x58] sm:$0xf0]  ;;  %v1526_v60 = vld [vmem:[#allocation5 + $0x4c] sm:$0xf]  ;;  %v1316_v62 = vor.u32 %v1501_v53, %v1315_v52 }
  0x26   :  { %259 = vmatpush.bf16.msra.mxu0 %v1296_v54  ;;  %314 = vmatpush.bf16.msra.mxu2 %v1340_v37  ;;  %v1767_v54 = vor.u32 %v1531_v46, %v1435_v44  ;;  %v1417_v61 = vld [vmem:[#allocation5 + $0x54] sm:$0xf0]  ;;  %v1303_v63 = vld [vmem:[#allocation3 + $0x20] sm:$0xf]  ;;  %v1498_v0 = vld [vmem:[#allocation3 + $0x28] sm:$0xf0]  ;;  %v1773_v1 = vor.u32 %v1528_v59, %v1423_v57 }
  0x27   :  { %541 = vmatpush.bf16.msra.mxu3 %v1737_v58  ;;  %v1776_v2 = vor.u32 %v1526_v60, %v1417_v61  ;;  %v1411_v3 = vld [vmem:[#allocation5 + $0x38] sm:$0xf]  ;;  %v1525_v4 = vld [vmem:[#allocation5 + $0x40] sm:$0xf0]  ;;  %v1523_v6 = vld [vmem:[#allocation5 + $0x34] sm:$0xf]  ;;  %v1304_v13 = vor.u32 %v1498_v0, %v1303_v63 }
  0x28   :  { %v1405_v12 = vld [vmem:[#allocation5 + $0x3c] sm:$0xf0]  ;;  %v1784_v15 = vor.u32 %v1525_v4, %v1411_v3  ;;  %v1520_v18 = vld [vmem:[#allocation5 + $0x1c] sm:$0xf]  ;;  %v1291_v19 = vld [vmem:[#allocation3 + $0x8] sm:$0xf] }
  0x29   :  { %287 = vmatpush.bf16.msra.mxu1 %v1312_v30  ;;  %v1787_v16 = vor.u32 %v1523_v6, %v1405_v12  ;;  %v1495_v20 = vld [vmem:[#allocation3 + $0x10] sm:$0xf0]  ;;  %v1393_v21 = vld [vmem:[#allocation5 + $0x24] sm:$0xf0]  ;;  %v1399_v22 = vld [vmem:[#allocation5 + $0x20] sm:$0xf] }
  0x2a   :  { %260 = vmatpush.bf16.msra.mxu0 %v1284_v5  ;;  %315 = vmatpush.bf16.msra.mxu2 %v1328_v51  ;;  %v1490_v5 = vld [vmem:[%s2123_s0 + $0x8] sm:$0xff]  ;;  %v1292_v25 = vor.u32 %v1495_v20, %v1291_v19  ;;  %v1794_v29 = vor.u32 %v1520_v18, %v1393_v21  ;;  %v1519_v31 = vld [vmem:[#allocation5 + $0x10] sm:$0xf0]  ;;  %v1517_v32 = vld [vmem:[#allocation5 + $0x4] sm:$0xf] }
  0x2b   :  { %542 = vmatpush.bf16.msra.mxu3 %v1740_v8  ;;  %v1522_v24 = vld [vmem:[#allocation5 + $0x28] sm:$0xf0]  ;;  %v1387_v30 = vld [vmem:[#allocation5 + $0x8] sm:$0xf]  ;;  %v1381_v33 = vld [vmem:[#allocation5 + $0xc] sm:$0xf0] }
  0x2c   :  { %v1791_v27 = vor.u32 %v1522_v24, %v1399_v22  ;;  %v1799_v35 = vor.u32 %v1519_v31, %v1387_v30  ;;  %v1802_v36 = vor.u32 %v1517_v32, %v1381_v33  ;;  %v1491_v37 = vld [vmem:[%s2123_s0 + $0x10] sm:$0xff]  ;;  %v93_v39 = vld [vmem:[%s2126_s3] sm:$0x7] }
  0x2d   :  { %261 = vmatmul.bf16.vlgmr.msra.gmra.mxu0 %v1745_v9  ;;  %288 = vmatpush.bf16.msra.mxu1 %v1300_v47  ;;  %v396_v40 = vld [vmem:[%s2127_s4] sm:$0x7]  ;;  %v95_v43 = vperm.slane %v93_v39, 0  ;;  %v1890_v63 = vperm.slane %v93_v39, 1  ;;  %v1896_v12 = vperm.slane %v93_v39, 2 }
  0x2e   :  { %561 = vmatpush.bf16.msrb.mxu0 %v1747_v10  ;;  %543 = vmatmul.bf16.vlgmr.msra.gmra.mxu3 %v1682_v38  ;;  %v1881_v47 = vperm.slane %v396_v40, 0 }
  0x2f   :  { %548 = vmatpush.bf16.msrb.mxu3 %v1749_v14  ;;  %316 = vmatpush.bf16.msra.mxu2 %v1316_v62  ;;  %2130 = vst [vmem:[#allocation9_spill] sm:$0xff] %v1896_v12 }
  0x31   :  { %289 = vmatpush.bf16.msra.mxu1 %v1288_v56 }
  0x32   :  { %562 = vmatpush.bf16.msrb.mxu0 %v1753_v26 }
  0x33   :  { %549 = vmatpush.bf16.msrb.mxu3 %v1756_v28  ;;  %317 = vmatpush.bf16.msra.mxu2 %v1304_v13 }
  0x34   :  { %290 = vmatmul.bf16.vlgmr.msra.gmra.mxu1 %v1745_v9 }
  0x35   :  { %626 = vmatpush.bf16.msrb.mxu1 %v1719_v7 }
  0x36   :  { %563 = vmatpush.bf16.msrb.mxu0 %v1761_v41 }
  0x37   :  { %550 = vmatpush.bf16.msrb.mxu3 %v1764_v42  ;;  %318 = vmatpush.bf16.msra.mxu2 %v1292_v25 }
  0x39   :  { %627 = vmatpush.bf16.msrb.mxu1 %v1722_v11 }
  0x3a   :  { %564 = vmatpush.bf16.msrb.mxu0 %v1767_v54  ;;  %319 = vmatmul.bf16.vlgmr.msra.gmra.mxu2 %v1745_v9  ;;  %v1492_v9 = vld [vmem:[%s2123_s0 + $0x18] sm:$0xff] }
  0x3b   :  { %551 = vmatpush.bf16.msrb.mxu3 %v1770_v55  ;;  %639 = vmatpush.bf16.msrb.mxu2 %v1749_v14 }
  0x3d   :  { %266 = vmatmul.bf16.gmra.mxu0 %v1490_v5  ;;  %628 = vmatpush.bf16.msrb.mxu1 %v1725_v17 }
  0x3e   :  { %565 = vmatpush.bf16.msrb.mxu0 %v1773_v1 }
  0x3f   :  { %552 = vmatpush.bf16.msrb.mxu3 %v1776_v2  ;;  %640 = vmatpush.bf16.msrb.mxu2 %v1756_v28 }
  0x41   :  { %629 = vmatpush.bf16.msrb.mxu1 %v1728_v23 }
  0x42   :  { %566 = vmatpush.bf16.msrb.mxu0 %v1784_v15 }
  0x43   :  { %553 = vmatpush.bf16.msrb.mxu3 %v1787_v16  ;;  %641 = vmatpush.bf16.msrb.mxu2 %v1764_v42 }
  0x44   :  { %295 = vmatmul.bf16.gmra.mxu1 %v1490_v5 }
  0x45   :  { %630 = vmatpush.bf16.msrb.mxu1 %v1731_v34 }
  0x46   :  { %567 = vmatpush.bf16.msrb.mxu0 %v1791_v27 }
  0x47   :  { %554 = vmatpush.bf16.msrb.mxu3 %v1794_v29  ;;  %642 = vmatpush.bf16.msrb.mxu2 %v1770_v55 }
  0x49   :  { %631 = vmatpush.bf16.msrb.mxu1 %v1734_v45 }
  0x4a   :  { %568 = vmatpush.bf16.msrb.mxu0 %v1799_v35  ;;  %324 = vmatmul.bf16.gmra.mxu2 %v1490_v5  ;;  %v1894_v5 = vperm.slane %v396_v40, 1 }
  0x4b   :  { %555 = vmatpush.bf16.msrb.mxu3 %v1802_v36  ;;  %643 = vmatpush.bf16.msrb.mxu2 %v1776_v2 }
  0x4d   :  { %271 = vmatmul.bf16.gmra.mxu0 %v1491_v37  ;;  %632 = vmatpush.bf16.msrb.mxu1 %v1737_v58 }
  0x4e   :  { %717 = vmatpush.bf16.msra.mxu0 %v1719_v7  ;;  %556 = vmatmul.bf16.vlgmr.msrb.gmra.mxu3 %v1682_v38 }
  0x4f   :  { %652 = vmatpush.bf16.msra.mxu3 %v1747_v10  ;;  %644 = vmatpush.bf16.msrb.mxu2 %v1787_v16 }
  0x51   :  { %633 = vmatpush.bf16.msrb.mxu1 %v1740_v8 }
  0x52   :  { %718 = vmatpush.bf16.msra.mxu0 %v1722_v11 }
  0x53   :  { %653 = vmatpush.bf16.msra.mxu3 %v1753_v26  ;;  %645 = vmatpush.bf16.msrb.mxu2 %v1794_v29 }
  0x54   :  { %300 = vmatmul.bf16.gmra.mxu1 %v1491_v37 }
  0x55   :  { %730 = vmatpush.bf16.msra.mxu1 %v1749_v14 }
  0x56   :  { %719 = vmatpush.bf16.msra.mxu0 %v1725_v17 }
  0x57   :  { %654 = vmatpush.bf16.msra.mxu3 %v1761_v41  ;;  %646 = vmatpush.bf16.msrb.mxu2 %v1802_v36 }
  0x59   :  { %731 = vmatpush.bf16.msra.mxu1 %v1756_v28 }
  0x5a   :  { %720 = vmatpush.bf16.msra.mxu0 %v1728_v23  ;;  %329 = vmatmul.bf16.gmra.mxu2 %v1491_v37 }
  0x5b   :  { %655 = vmatpush.bf16.msra.mxu3 %v1767_v54  ;;  %743 = vmatpush.bf16.msra.mxu2 %v1747_v10 }
  0x5d   :  { %276 = vmatmul.bf16.gmra.mxu0 %v1492_v9  ;;  %732 = vmatpush.bf16.msra.mxu1 %v1764_v42 }
  0x5e   :  { %721 = vmatpush.bf16.msra.mxu0 %v1731_v34 }
  0x5f   :  { %656 = vmatpush.bf16.msra.mxu3 %v1773_v1  ;;  %744 = vmatpush.bf16.msra.mxu2 %v1753_v26 }
  0x61   :  { %733 = vmatpush.bf16.msra.mxu1 %v1770_v55 }
  0x62   :  { %722 = vmatpush.bf16.msra.mxu0 %v1734_v45 }
  0x63   :  { %657 = vmatpush.bf16.msra.mxu3 %v1784_v15  ;;  %745 = vmatpush.bf16.msra.mxu2 %v1761_v41 }
  0x64   :  { %305 = vmatmul.bf16.gmra.mxu1 %v1492_v9 }
  0x65   :  { %734 = vmatpush.bf16.msra.mxu1 %v1776_v2 }
  0x66   :  { %723 = vmatpush.bf16.msra.mxu0 %v1737_v58 }
  0x67   :  { %658 = vmatpush.bf16.msra.mxu3 %v1791_v27  ;;  %746 = vmatpush.bf16.msra.mxu2 %v1767_v54 }
  0x69   :  { %735 = vmatpush.bf16.msra.mxu1 %v1787_v16 }
  0x6a   :  { %724 = vmatpush.bf16.msra.mxu0 %v1740_v8  ;;  %334 = vmatmul.bf16.gmra.mxu2 %v1492_v9 }
  0x6b   :  { %659 = vmatpush.bf16.msra.mxu3 %v1799_v35  ;;  %747 = vmatpush.bf16.msra.mxu2 %v1773_v1 }
  0x6d   :  { %569 = vmatmul.bf16.vlgmr.msrb.gmra.mxu0 %v1682_v38  ;;  %736 = vmatpush.bf16.msra.mxu1 %v1794_v29 }
  0x6e   :  { %821 = vmatpush.bf16.msrb.mxu0 %v1749_v14 }
  0x6f   :  { %808 = vmatpush.bf16.msrb.mxu3 %v1719_v7  ;;  %748 = vmatpush.bf16.msra.mxu2 %v1784_v15 }
  0x71   :  { %737 = vmatpush.bf16.msra.mxu1 %v1802_v36 }
  0x72   :  { %822 = vmatpush.bf16.msrb.mxu0 %v1756_v28 }
  0x73   :  { %809 = vmatpush.bf16.msrb.mxu3 %v1722_v11  ;;  %749 = vmatpush.bf16.msra.mxu2 %v1791_v27 }
  0x76   :  { %823 = vmatpush.bf16.msrb.mxu0 %v1764_v42 }
  0x77   :  { %810 = vmatpush.bf16.msrb.mxu3 %v1725_v17  ;;  %750 = vmatpush.bf16.msra.mxu2 %v1799_v35 }
  0x7a   :  { %824 = vmatpush.bf16.msrb.mxu0 %v1770_v55 }
  0x7b   :  { %811 = vmatpush.bf16.msrb.mxu3 %v1728_v23 }
  0x7e   :  { %825 = vmatpush.bf16.msrb.mxu0 %v1776_v2 }
  0x7f   :  { %812 = vmatpush.bf16.msrb.mxu3 %v1731_v34 }
  0x82   :  { %826 = vmatpush.bf16.msrb.mxu0 %v1787_v16 }
  0x83   :  { %813 = vmatpush.bf16.msrb.mxu3 %v1734_v45 }
  0x86   :  { %827 = vmatpush.bf16.msrb.mxu0 %v1794_v29 }
  0x87   :  { %814 = vmatpush.bf16.msrb.mxu3 %v1737_v58 }
  0x8a   :  { %828 = vmatpush.bf16.msrb.mxu0 %v1802_v36 }
  0x8b   :  { %815 = vmatpush.bf16.msrb.mxu3 %v1740_v8 }
  0xaa   :  { %v262_v38 = vpop.f32.mrf.mxu0 }
  0xab   :  { %v263_v50 = vadd.f32 %v262_v38, %v95_v43 }
  0xb1   :  { %v544_v44 = vpop.f32.mrf.mxu3  ;;  %v291_v3 = vpop.f32.mrf.mxu1 }
  0xb2   :  { %v264_v46 = vpop.f32.mrf.mxu0  ;;  %v545_v49 = vadd.f32 %v544_v44, %v1881_v47  ;;  %v292_v13 = vadd.f32 %v291_v3, %v1890_v63  ;;  %v1912_v3 = vperm.slane %v396_v40, 2 }
  0xb3   :  { %v1883_v48 = vadd.f32 %v264_v46, %v95_v43 }
  0xb4   :  { %v574_v53 = vadd.f32 %v545_v49, %v263_v50 }
  0xb6   :  { %v1473_v57 = vmul.f32 -1.442695, %v574_v53 }
  0xb8   :  { %1546 = vpow2.f32 %v1473_v57 }
  0xb9   :  { %v546_v51 = vpop.f32.mrf.mxu3 }
  0xba   :  { %v267_v52 = vpop.f32.mrf.mxu0 }
  0xbb   :  { %v1886_v56 = vadd.f32 %v267_v52, %v95_v43 }
  0xbd   :  { %v320_v61 = vpop.f32.mrf.mxu2 }
  0xbe   :  { %v1547_v62 = vpop.eup %1546 }
  0xbf   :  { %v578_v6 = vadd.f32 1.0, %v1547_v62 }
  0xc1   :  { %1548 = vrcp.f32 %v578_v6  ;;  %v590_v62 = vand.u32 2147483648, %v578_v6  ;;  %vm584_vm1 = vweird.f32 %v578_v6 }
  0xc2   :  { %v269_v59 = vpop.f32.mrf.mxu0 }
  0xc3   :  { %v1888_v60 = vadd.f32 %v269_v59, %v95_v43 }
  0xc5   :  { %v322_v20 = vpop.f32.mrf.mxu2 }
  0xc6   :  { %v1901_v21 = vadd.f32 %v322_v20, %v1896_v12 }
  0xc7   :  { %v1549_v31 = vpop.eup %1548 }
  0xc8   :  { %v580_v33 = vmul.f32 %v1549_v31, %v578_v6  ;;  %vm585_vm0 = vweird.f32 %v1549_v31 }
  0xc9   :  { %vm586_vm2 = vmor %vm584_vm1, %vm585_vm0 }
  0xca   :  { %v272_v0 = vpop.f32.mrf.mxu0  ;;  %v581_v44 = vsub.f32 1.0, %v580_v33 }
  0xcb   :  { %v1892_v4 = vadd.f32 %v272_v0, %v95_v43 }
  0xcc   :  { %v582_v50 = vmul.f32 %v1549_v31, %v581_v44 }
  0xcd   :  { %v325_v46 = vpop.f32.mrf.mxu2 }
  0xce   :  { %v1908_v49 = vadd.f32 %v325_v46, %v1896_v12  ;;  %v583_v59 = vadd.f32 %v1549_v31, %v582_v50 }
  0xd0   :  { %v587_v20 = vsel %vm586_vm2, %v1549_v31, %v583_v59 }
  0xd1   :  { %v557_v18 = vpop.f32.mrf.mxu3 }
  0xd2   :  { %v558_v19 = vadd.f32 %v557_v18, %v1894_v5  ;;  %v274_v24 = vpop.f32.mrf.mxu0 }
  0xd3   :  { %v1903_v30 = vadd.f32 %v274_v24, %v95_v43 }
  0xd4   :  { %v594_v22 = vadd.f32 %v558_v19, %v292_v13  ;;  %v588_v13 = vand.u32 2147483647, %v578_v6 }
  0xd5   :  { %v327_v18 = vpop.f32.mrf.mxu2 }
  0xd6   :  { %v1474_v25 = vmul.f32 -1.442695, %v594_v22  ;;  %v1915_v19 = vadd.f32 %v327_v18, %v1896_v12  ;;  %vm589_vm3 = vcmp.eq.f32.partialorder %v588_v13, 8.507059e+37 }
  0xd8   :  { %1550 = vpow2.f32 %v1474_v25  ;;  %v321_v25 = vadd.f32 %v320_v61, %v1896_v12 }
  0xd9   :  { %v559_v32 = vpop.f32.mrf.mxu3 }
  0xda   :  { %v277_v37 = vpop.f32.mrf.mxu0 }
  0xdb   :  { %v1905_v38 = vadd.f32 %v277_v37, %v95_v43 }
  0xdd   :  { %2131 = vst [vmem:[#allocation10_spill] sm:$0xff] %v1905_v38  ;;  %v330_v46 = vpop.f32.mrf.mxu2 }
  0xde   :  { %v1551_v9 = vpop.eup %1550  ;;  %v1920_v31 = vadd.f32 %v330_v46, %v1896_v12 }
  0xdf   :  { %v598_v39 = vadd.f32 1.0, %v1551_v9 }
  0xe1   :  { %1552 = vrcp.f32 %v598_v39  ;;  %vm604_vm4 = vweird.f32 %v598_v39  ;;  %v610_v6 = vand.u32 2147483648, %v598_v39  ;;  %v608_v9 = vand.u32 2147483647, %v598_v39 }
  0xe2   :  { %v279_v51 = vpop.f32.mrf.mxu0 }
  0xe3   :  { %v1910_v52 = vadd.f32 %v279_v51, %v95_v43  ;;  %v591_v43 = vor.u32 1.1754944e-38, %v590_v62  ;;  %v611_v51 = vor.u32 1.1754944e-38, %v610_v6  ;;  %vm609_vm7 = vcmp.eq.f32.partialorder %v608_v9, 8.507059e+37 }
  0xe5   :  { %2132 = vst [vmem:[#allocation11_spill] sm:$0xff] %v1910_v52  ;;  %v592_v33 = vsel %vm589_vm3, %v591_v43, %v587_v20  ;;  %v293_v43 = vpop.f32.mrf.mxu1 }
  0xe7   :  { %v1553_v53 = vpop.eup %1552 }
  0xe8   :  { %v600_v57 = vmul.f32 %v1553_v53, %v598_v39  ;;  %vm605_vm5 = vweird.f32 %v1553_v53 }
  0xe9   :  { %vm606_vm6 = vmor %vm604_vm4, %vm605_vm5 }
  0xea   :  { %v601_v0 = vsub.f32 1.0, %v600_v57  ;;  %v570_v24 = vpop.f32.mrf.mxu0 }
  0xeb   :  { %v571_v32 = vadd.f32 %v570_v24, %v1912_v3 }
  0xec   :  { %v602_v22 = vmul.f32 %v1553_v53, %v601_v0  ;;  %v332_v0 = vpop.f32.mrf.mxu2 }
  0xed   :  { %v614_v40 = vmul.f32 %v592_v33, %v571_v32  ;;  %v1923_v20 = vadd.f32 %v332_v0, %v1896_v12 }
  0xee   :  { %v603_v37 = vadd.f32 %v1553_v53, %v602_v22 }
  0xef   :  { %v615_v44 = vadd.f32 %v614_v40, %v321_v25  ;;  %v1956_v25 = vpop.f32.mrf.mxu1 }
  0xf0   :  { %v607_v50 = vsel %vm606_vm6, %v1553_v53, %v603_v37 }
  0xf1   :  { %1554 = vtanh.f32 %v615_v44  ;;  %v612_v57 = vsel %vm609_vm7, %v611_v51, %v607_v50 }
  0xf2   :  { %v572_v61 = vpop.f32.mrf.mxu0  ;;  %v617_v59 = vsub.f32 1.0, %v612_v57  ;;  %v619_v18 = vmul.f32 0.0, %v612_v57  ;;  %v294_v57 = vadd.f32 %v293_v43, %v1890_v63 }
  0xf4   :  { %v335_v22 = vpop.f32.mrf.mxu2 }
  0xf5   :  { %v1931_v24 = vadd.f32 %v335_v22, %v1896_v12 }
  0xf7   :  { %v1555_v62 = vpop.eup %1554  ;;  %2133 = vst [vmem:[#allocation12_spill] sm:$0xff] %v1931_v24  ;;  %v1958_v32 = vpop.f32.mrf.mxu1 }
  0xf8   :  { %v618_v13 = vmul.f32 %v1555_v62, %v617_v59 }
  0xfa   :  { %v1925_v39 = vadd.f32 %v619_v18, %v618_v13 }
  0xfc   :  { %v625_v53 = vpack.c.bf16 %v1925_v39, %v1925_v39  ;;  %v1968_v9 = vpop.f32.mrf.mxu2 }
  0xfd   :  { %2135 = vst [vmem:[#allocation14_spill] sm:$0xff] %v1968_v9 }
  0xfe   :  { %634 = vmatmul.bf16.vlgmr.msrb.gmra.mxu1 %v625_v53  ;;  %647 = vmatmul.bf16.vlgmr.msrb.gmra.mxu2 %v625_v53 }
  0xff   :  { %660 = vmatmul.bf16.vlgmr.msra.gmra.mxu3 %v625_v53  ;;  %834 = vmatpush.bf16.msrb.mxu1 %v1747_v10  ;;  %v1960_v33 = vpop.f32.mrf.mxu1 }
 0x100   :  { %899 = vmatpush.bf16.msrb.mxu2 %v1719_v7  ;;  %912 = vmatpush.bf16.msra.mxu3 %v1749_v14 }
 0x103   :  { %835 = vmatpush.bf16.msrb.mxu1 %v1753_v26 }
 0x104   :  { %900 = vmatpush.bf16.msrb.mxu2 %v1722_v11  ;;  %913 = vmatpush.bf16.msra.mxu3 %v1756_v28 }
 0x107   :  { %836 = vmatpush.bf16.msrb.mxu1 %v1761_v41  ;;  %v1962_v37 = vpop.f32.mrf.mxu1 }
 0x108   :  { %901 = vmatpush.bf16.msrb.mxu2 %v1725_v17  ;;  %914 = vmatpush.bf16.msra.mxu3 %v1764_v42 }
 0x10b   :  { %837 = vmatpush.bf16.msrb.mxu1 %v1767_v54 }
 0x10c   :  { %902 = vmatpush.bf16.msrb.mxu2 %v1728_v23  ;;  %915 = vmatpush.bf16.msra.mxu3 %v1770_v55 }
 0x10f   :  { %838 = vmatpush.bf16.msrb.mxu1 %v1773_v1  ;;  %v1964_v40 = vpop.f32.mrf.mxu1 }
 0x110   :  { %903 = vmatpush.bf16.msrb.mxu2 %v1731_v34  ;;  %916 = vmatpush.bf16.msra.mxu3 %v1776_v2 }
 0x113   :  { %839 = vmatpush.bf16.msrb.mxu1 %v1784_v15 }
 0x114   :  { %904 = vmatpush.bf16.msrb.mxu2 %v1734_v45  ;;  %917 = vmatpush.bf16.msra.mxu3 %v1787_v16 }
 0x117   :  { %840 = vmatpush.bf16.msrb.mxu1 %v1791_v27  ;;  %v1966_v6 = vpop.f32.mrf.mxu1 }
 0x118   :  { %905 = vmatpush.bf16.msrb.mxu2 %v1737_v58  ;;  %918 = vmatpush.bf16.msra.mxu3 %v1794_v29  ;;  %2134 = vst [vmem:[#allocation13_spill] sm:$0xff] %v1966_v6 }
 0x11b   :  { %841 = vmatpush.bf16.msrb.mxu1 %v1799_v35 }
 0x11c   :  { %906 = vmatpush.bf16.msrb.mxu2 %v1740_v8  ;;  %919 = vmatpush.bf16.msra.mxu3 %v1802_v36 }
 0x17b   :  { %v635_v44 = vpop.f32.mrf.mxu1 }
 0x17c   :  { %v636_v46 = vadd.f32 %v635_v44, %v1881_v47 }
 0x17e   :  { %v665_v50 = vadd.f32 %v636_v46, %v1883_v48 }
 0x180   :  { %v1475_v51 = vmul.f32 -1.442695, %v665_v50 }
 0x181   :  { %v648_v61 = vpop.f32.mrf.mxu2 }
 0x182   :  { %1556 = vpow2.f32 %v1475_v51  ;;  %v649_v59 = vadd.f32 %v648_v61, %v1894_v5  ;;  %v661_v62 = vpop.f32.mrf.mxu3 }
 0x183   :  { %v637_v0 = vpop.f32.mrf.mxu1 }
 0x184   :  { %v685_v13 = vadd.f32 %v649_v59, %v294_v57 }
 0x186   :  { %v1476_v18 = vmul.f32 -1.442695, %v685_v13 }
 0x188   :  { %v1557_v53 = vpop.eup %1556  ;;  %1558 = vpow2.f32 %v1476_v18 }
 0x189   :  { %v669_v22 = vadd.f32 1.0, %v1557_v53  ;;  %v650_v9 = vpop.f32.mrf.mxu2 }
 0x18a   :  { %v663_v12 = vpop.f32.mrf.mxu3 }
 0x18b   :  { %1560 = vrcp.f32 %v669_v22  ;;  %v681_v43 = vand.u32 2147483648, %v669_v22  ;;  %v679_v61 = vand.u32 2147483647, %v669_v22  ;;  %vm675_vm9 = vweird.f32 %v669_v22 }
 0x18c   :  { %v662_v12 = vadd.f32 %v661_v62, %v1912_v3 }
 0x18d   :  { %v682_v59 = vor.u32 1.1754944e-38, %v681_v43  ;;  %vm680_vm11 = vcmp.eq.f32.partialorder %v679_v61, 8.507059e+37 }
 0x18e   :  { %v1559_v44 = vpop.eup %1558 }
 0x18f   :  { %v689_v52 = vadd.f32 1.0, %v1559_v44 }
 0x191   :  { %v1561_v48 = vpop.eup %1560  ;;  %1562 = vrcp.f32 %v689_v52  ;;  %v699_v24 = vand.u32 2147483647, %v689_v52  ;;  %vm695_vm13 = vweird.f32 %v689_v52 }
 0x192   :  { %v671_v46 = vmul.f32 %v1561_v48, %v669_v22  ;;  %vm676_vm8 = vweird.f32 %v1561_v48 }
 0x193   :  { %vm677_vm10 = vmor %vm675_vm9, %vm676_vm8  ;;  %vm700_vm15 = vcmp.eq.f32.partialorder %v699_v24, 8.507059e+37 }
 0x194   :  { %v672_v50 = vsub.f32 1.0, %v671_v46  ;;  %v701_v46 = vand.u32 2147483648, %v689_v52 }
 0x196   :  { %v673_v51 = vmul.f32 %v1561_v48, %v672_v50 }
 0x197   :  { %v1563_v6 = vpop.eup %1562 }
 0x198   :  { %v691_v0 = vmul.f32 %v1563_v6, %v689_v52  ;;  %v674_v57 = vadd.f32 %v1561_v48, %v673_v51  ;;  %vm696_vm12 = vweird.f32 %v1563_v6  ;;  %v702_v51 = vor.u32 1.1754944e-38, %v701_v46 }
 0x199   :  { %vm697_vm14 = vmor %vm695_vm13, %vm696_vm12  ;;  %v297_v52 = vadd.f32 %v1956_v25, %v1890_v63 }
 0x19a   :  { %v692_v13 = vsub.f32 1.0, %v691_v0  ;;  %v678_v9 = vsel %vm677_vm10, %v1561_v48, %v674_v57 }
 0x19b   :  { %v683_v18 = vsel %vm680_vm11, %v682_v59, %v678_v9 }
 0x19c   :  { %v693_v53 = vmul.f32 %v1563_v6, %v692_v13  ;;  %v705_v44 = vmul.f32 %v683_v18, %v662_v12 }
 0x19e   :  { %v706_v50 = vadd.f32 %v705_v44, %v1901_v21  ;;  %v694_v38 = vadd.f32 %v1563_v6, %v693_v53 }
 0x1a0   :  { %1564 = vtanh.f32 %v706_v50  ;;  %v698_v22 = vsel %vm697_vm14, %v1563_v6, %v694_v38 }
 0x1a1   :  { %v703_v43 = vsel %vm700_vm15, %v702_v51, %v698_v22 }
 0x1a2   :  { %v708_v0 = vsub.f32 1.0, %v703_v43  ;;  %v710_v61 = vmul.f32 %v703_v43, %v1925_v39 }
 0x1a6   :  { %v1565_v62 = vpop.eup %1564 }
 0x1a7   :  { %v709_v48 = vmul.f32 %v1565_v62, %v708_v0 }
 0x1a9   :  { %v1977_v57 = vadd.f32 %v710_v61, %v709_v48 }
 0x1ab   :  { %v716_v59 = vpack.c.bf16 %v1977_v57, %v1977_v57 }
 0x1ad   :  { %725 = vmatmul.bf16.vlgmr.msra.gmra.mxu0 %v716_v59  ;;  %738 = vmatmul.bf16.vlgmr.msra.gmra.mxu1 %v716_v59 }
 0x1ae   :  { %751 = vmatmul.bf16.vlgmr.msra.gmra.mxu2 %v716_v59  ;;  %925 = vmatpush.bf16.msra.mxu0 %v1747_v10 }
 0x1af   :  { %990 = vmatpush.bf16.msra.mxu1 %v1719_v7  ;;  %1003 = vmatpush.bf16.msra.mxu2 %v1749_v14 }
 0x1b2   :  { %926 = vmatpush.bf16.msra.mxu0 %v1753_v26 }
 0x1b3   :  { %991 = vmatpush.bf16.msra.mxu1 %v1722_v11  ;;  %1004 = vmatpush.bf16.msra.mxu2 %v1756_v28 }
 0x1b6   :  { %927 = vmatpush.bf16.msra.mxu0 %v1761_v41 }
 0x1b7   :  { %992 = vmatpush.bf16.msra.mxu1 %v1725_v17  ;;  %1005 = vmatpush.bf16.msra.mxu2 %v1764_v42 }
 0x1ba   :  { %928 = vmatpush.bf16.msra.mxu0 %v1767_v54 }
 0x1bb   :  { %993 = vmatpush.bf16.msra.mxu1 %v1728_v23  ;;  %1006 = vmatpush.bf16.msra.mxu2 %v1770_v55 }
 0x1be   :  { %929 = vmatpush.bf16.msra.mxu0 %v1773_v1 }
 0x1bf   :  { %994 = vmatpush.bf16.msra.mxu1 %v1731_v34  ;;  %1007 = vmatpush.bf16.msra.mxu2 %v1776_v2 }
 0x1c2   :  { %930 = vmatpush.bf16.msra.mxu0 %v1784_v15 }
 0x1c3   :  { %995 = vmatpush.bf16.msra.mxu1 %v1734_v45  ;;  %1008 = vmatpush.bf16.msra.mxu2 %v1787_v16 }
 0x1c6   :  { %931 = vmatpush.bf16.msra.mxu0 %v1791_v27 }
 0x1c7   :  { %996 = vmatpush.bf16.msra.mxu1 %v1737_v58  ;;  %1009 = vmatpush.bf16.msra.mxu2 %v1794_v29 }
 0x1ca   :  { %932 = vmatpush.bf16.msra.mxu0 %v1799_v35 }
 0x1cb   :  { %997 = vmatpush.bf16.msra.mxu1 %v1740_v8  ;;  %1010 = vmatpush.bf16.msra.mxu2 %v1802_v36 }
 0x22a   :  { %v726_v21 = vpop.f32.mrf.mxu0  ;;  %v739_v38 = vpop.f32.mrf.mxu1 }
 0x22b   :  { %v727_v39 = vadd.f32 %v726_v21, %v1881_v47  ;;  %v740_v24 = vadd.f32 %v739_v38, %v1894_v5 }
 0x22d   :  { %v756_v6 = vadd.f32 %v727_v39, %v1886_v56  ;;  %v776_v13 = vadd.f32 %v740_v24, %v297_v52 }
 0x22f   :  { %v1477_v12 = vmul.f32 -1.442695, %v756_v6  ;;  %v1478_v9 = vmul.f32 -1.442695, %v776_v13 }
 0x231   :  { %1566 = vpow2.f32 %v1477_v12  ;;  %v752_v18 = vpop.f32.mrf.mxu2 }
 0x232   :  { %1568 = vpow2.f32 %v1478_v9  ;;  %v728_v53 = vpop.f32.mrf.mxu0  ;;  %v741_v44 = vpop.f32.mrf.mxu1  ;;  %v753_v6 = vadd.f32 %v752_v18, %v1912_v3 }
 0x237   :  { %v1567_v46 = vpop.eup %1566 }
 0x238   :  { %v1569_v50 = vpop.eup %1568  ;;  %v760_v22 = vadd.f32 1.0, %v1567_v46 }
 0x239   :  { %v780_v51 = vadd.f32 1.0, %v1569_v50  ;;  %v754_v43 = vpop.f32.mrf.mxu2 }
 0x23a   :  { %1570 = vrcp.f32 %v760_v22  ;;  %v772_v59 = vand.u32 2147483648, %v760_v22  ;;  %v770_v38 = vand.u32 2147483647, %v760_v22  ;;  %vm766_vm1 = vweird.f32 %v760_v22 }
 0x23b   :  { %1572 = vrcp.f32 %v780_v51  ;;  %v792_v44 = vand.u32 2147483648, %v780_v51  ;;  %vm786_vm5 = vweird.f32 %v780_v51  ;;  %v790_v46 = vand.u32 2147483647, %v780_v51 }
 0x23c   :  { %v773_v24 = vor.u32 1.1754944e-38, %v772_v59  ;;  %vm771_vm3 = vcmp.eq.f32.partialorder %v770_v38, 8.507059e+37 }
 0x23d   :  { %vm791_vm7 = vcmp.eq.f32.partialorder %v790_v46, 8.507059e+37 }
 0x240   :  { %v1571_v25 = vpop.eup %1570 }
 0x241   :  { %v1573_v0 = vpop.eup %1572  ;;  %v762_v62 = vmul.f32 %v1571_v25, %v760_v22  ;;  %vm767_vm0 = vweird.f32 %v1571_v25 }
 0x242   :  { %v782_v48 = vmul.f32 %v1573_v0, %v780_v51  ;;  %vm768_vm2 = vmor %vm766_vm1, %vm767_vm0  ;;  %vm787_vm4 = vweird.f32 %v1573_v0 }
 0x243   :  { %v763_v56 = vsub.f32 1.0, %v762_v62  ;;  %vm788_vm6 = vmor %vm786_vm5, %vm787_vm4  ;;  %v793_v62 = vor.u32 1.1754944e-38, %v792_v44 }
 0x244   :  { %v783_v61 = vsub.f32 1.0, %v782_v48 }
 0x245   :  { %v764_v21 = vmul.f32 %v1571_v25, %v763_v56 }
 0x246   :  { %v784_v52 = vmul.f32 %v1573_v0, %v783_v61 }
 0x247   :  { %v765_v39 = vadd.f32 %v1571_v25, %v764_v21 }
 0x248   :  { %v785_v9 = vadd.f32 %v1573_v0, %v784_v52 }
 0x249   :  { %v769_v13 = vsel %vm768_vm2, %v1571_v25, %v765_v39 }
 0x24a   :  { %v774_v12 = vsel %vm771_vm3, %v773_v24, %v769_v13  ;;  %v789_v43 = vsel %vm788_vm6, %v1573_v0, %v785_v9 }
 0x24b   :  { %v796_v53 = vmul.f32 %v774_v12, %v753_v6  ;;  %v794_v22 = vsel %vm791_vm7, %v793_v62, %v789_v43 }
 0x24c   :  { %v799_v48 = vsub.f32 1.0, %v794_v22  ;;  %v801_v25 = vmul.f32 %v794_v22, %v1977_v57  ;;  %v299_v57 = vadd.f32 %v1958_v32, %v1890_v63 }
 0x24d   :  { %v797_v50 = vadd.f32 %v796_v53, %v1908_v49 }
 0x24f   :  { %1574 = vtanh.f32 %v797_v50 }
 0x255   :  { %v1575_v56 = vpop.eup %1574 }
 0x256   :  { %v800_v18 = vmul.f32 %v1575_v56, %v799_v48 }
 0x258   :  { %v2013_v61 = vadd.f32 %v801_v25, %v800_v18 }
 0x25a   :  { %v807_v59 = vpack.c.bf16 %v2013_v61, %v2013_v61 }
 0x25c   :  { %816 = vmatmul.bf16.vlgmr.msrb.gmra.mxu3 %v807_v59  ;;  %829 = vmatmul.bf16.vlgmr.msrb.gmra.mxu0 %v807_v59 }
 0x25d   :  { %842 = vmatmul.bf16.vlgmr.msrb.gmra.mxu1 %v807_v59  ;;  %1016 = vmatpush.bf16.msrb.mxu3 %v1747_v10 }
 0x25e   :  { %1081 = vmatpush.bf16.msrb.mxu0 %v1719_v7  ;;  %1094 = vmatpush.bf16.msrb.mxu1 %v1749_v14 }
 0x261   :  { %1017 = vmatpush.bf16.msrb.mxu3 %v1753_v26 }
 0x262   :  { %1082 = vmatpush.bf16.msrb.mxu0 %v1722_v11  ;;  %1095 = vmatpush.bf16.msrb.mxu1 %v1756_v28 }
 0x265   :  { %1018 = vmatpush.bf16.msrb.mxu3 %v1761_v41 }
 0x266   :  { %1083 = vmatpush.bf16.msrb.mxu0 %v1725_v17  ;;  %1096 = vmatpush.bf16.msrb.mxu1 %v1764_v42 }
 0x269   :  { %1019 = vmatpush.bf16.msrb.mxu3 %v1767_v54 }
 0x26a   :  { %1084 = vmatpush.bf16.msrb.mxu0 %v1728_v23  ;;  %1097 = vmatpush.bf16.msrb.mxu1 %v1770_v55 }
 0x26d   :  { %1020 = vmatpush.bf16.msrb.mxu3 %v1773_v1 }
 0x26e   :  { %1085 = vmatpush.bf16.msrb.mxu0 %v1731_v34  ;;  %1098 = vmatpush.bf16.msrb.mxu1 %v1776_v2 }
 0x271   :  { %1021 = vmatpush.bf16.msrb.mxu3 %v1784_v15 }
 0x272   :  { %1086 = vmatpush.bf16.msrb.mxu0 %v1734_v45  ;;  %1099 = vmatpush.bf16.msrb.mxu1 %v1787_v16 }
 0x275   :  { %1022 = vmatpush.bf16.msrb.mxu3 %v1791_v27 }
 0x276   :  { %1087 = vmatpush.bf16.msrb.mxu0 %v1737_v58  ;;  %1100 = vmatpush.bf16.msrb.mxu1 %v1794_v29 }
 0x279   :  { %1023 = vmatpush.bf16.msrb.mxu3 %v1799_v35 }
 0x27a   :  { %1088 = vmatpush.bf16.msrb.mxu0 %v1740_v8  ;;  %1101 = vmatpush.bf16.msrb.mxu1 %v1802_v36 }
 0x2d9   :  { %v830_v49 = vpop.f32.mrf.mxu0 }
 0x2da   :  { %v831_v51 = vadd.f32 %v830_v49, %v1894_v5  ;;  %v843_v0 = vpop.f32.mrf.mxu1 }
 0x2dc   :  { %v867_v21 = vadd.f32 %v831_v51, %v299_v57  ;;  %v844_v51 = vadd.f32 %v843_v0, %v1912_v3 }
 0x2de   :  { %v1480_v38 = vmul.f32 -1.442695, %v867_v21 }
 0x2df   :  { %v817_v52 = vpop.f32.mrf.mxu3 }
 0x2e0   :  { %1576 = vpow2.f32 %v1480_v38  ;;  %v818_v39 = vadd.f32 %v817_v52, %v1881_v47 }
 0x2e1   :  { %v832_v24 = vpop.f32.mrf.mxu0 }
 0x2e2   :  { %v847_v6 = vadd.f32 %v818_v39, %v1888_v60  ;;  %v845_v13 = vpop.f32.mrf.mxu1 }
 0x2e4   :  { %v1479_v12 = vmul.f32 -1.442695, %v847_v6 }
 0x2e6   :  { %v1577_v9 = vpop.eup %1576  ;;  %1578 = vpow2.f32 %v1479_v12 }
 0x2e7   :  { %v871_v53 = vadd.f32 1.0, %v1577_v9  ;;  %v819_v44 = vpop.f32.mrf.mxu3 }
 0x2e9   :  { %1580 = vrcp.f32 %v871_v53  ;;  %v883_v39 = vand.u32 2147483648, %v871_v53  ;;  %vm877_vm13 = vweird.f32 %v871_v53  ;;  %v881_v6 = vand.u32 2147483647, %v871_v53 }
 0x2eb   :  { %v884_v9 = vor.u32 1.1754944e-38, %v883_v39  ;;  %vm882_vm15 = vcmp.eq.f32.partialorder %v881_v6, 8.507059e+37 }
 0x2ec   :  { %v1579_v32 = vpop.eup %1578 }
 0x2ed   :  { %v851_v46 = vadd.f32 1.0, %v1579_v32 }
 0x2ef   :  { %1582 = vrcp.f32 %v851_v46  ;;  %v1581_v50 = vpop.eup %1580  ;;  %v863_v18 = vand.u32 2147483648, %v851_v46  ;;  %v861_v60 = vand.u32 2147483647, %v851_v46  ;;  %vm857_vm9 = vweird.f32 %v851_v46 }
 0x2f0   :  { %v873_v43 = vmul.f32 %v1581_v50, %v871_v53  ;;  %vm878_vm12 = vweird.f32 %v1581_v50 }
 0x2f1   :  { %v864_v57 = vor.u32 1.1754944e-38, %v863_v18  ;;  %vm862_vm11 = vcmp.eq.f32.partialorder %v861_v60, 8.507059e+37  ;;  %vm879_vm14 = vmor %vm877_vm13, %vm878_vm12 }
 0x2f2   :  { %v874_v48 = vsub.f32 1.0, %v873_v43 }
 0x2f4   :  { %v875_v59 = vmul.f32 %v1581_v50, %v874_v48 }
 0x2f5   :  { %v1583_v62 = vpop.eup %1582 }
 0x2f6   :  { %v853_v22 = vmul.f32 %v1583_v62, %v851_v46  ;;  %vm858_vm8 = vweird.f32 %v1583_v62  ;;  %v876_v52 = vadd.f32 %v1581_v50, %v875_v59 }
 0x2f7   :  { %vm859_vm10 = vmor %vm857_vm9, %vm858_vm8 }
 0x2f8   :  { %v854_v56 = vsub.f32 1.0, %v853_v22  ;;  %v880_v12 = vsel %vm879_vm14, %v1581_v50, %v876_v52 }
 0x2f9   :  { %v885_v44 = vsel %vm882_vm15, %v884_v9, %v880_v12 }
 0x2fa   :  { %v855_v25 = vmul.f32 %v1583_v62, %v854_v56  ;;  %v890_v32 = vsub.f32 1.0, %v885_v44  ;;  %v892_v43 = vmul.f32 %v885_v44, %v2013_v61 }
 0x2fc   :  { %v856_v49 = vadd.f32 %v1583_v62, %v855_v25 }
 0x2fe   :  { %v860_v21 = vsel %vm859_vm10, %v1583_v62, %v856_v49 }
 0x2ff   :  { %v865_v38 = vsel %vm862_vm11, %v864_v57, %v860_v21 }
 0x300   :  { %v887_v24 = vmul.f32 %v865_v38, %v844_v51 }
 0x302   :  { %v888_v13 = vadd.f32 %v887_v24, %v1915_v19 }
 0x304   :  { %1584 = vtanh.f32 %v888_v13 }
 0x30a   :  { %v1585_v46 = vpop.eup %1584 }
 0x30b   :  { %v891_v0 = vmul.f32 %v1585_v46, %v890_v32 }
 0x30d   :  { %v2049_v62 = vadd.f32 %v892_v43, %v891_v0 }
 0x30f   :  { %v898_v22 = vpack.c.bf16 %v2049_v62, %v2049_v62 }
 0x311   :  { %907 = vmatmul.bf16.vlgmr.msrb.gmra.mxu2 %v898_v22  ;;  %920 = vmatmul.bf16.vlgmr.msra.gmra.mxu3 %v898_v22 }
 0x312   :  { %933 = vmatmul.bf16.vlgmr.msra.gmra.mxu0 %v898_v22  ;;  %1107 = vmatpush.bf16.msrb.mxu2 %v1747_v10 }
 0x313   :  { %1172 = vmatpush.bf16.msra.mxu3 %v1719_v7  ;;  %1185 = vmatpush.bf16.msra.mxu0 %v1749_v14 }
 0x316   :  { %1108 = vmatpush.bf16.msrb.mxu2 %v1753_v26 }
 0x317   :  { %1173 = vmatpush.bf16.msra.mxu3 %v1722_v11  ;;  %1186 = vmatpush.bf16.msra.mxu0 %v1756_v28 }
 0x31a   :  { %1109 = vmatpush.bf16.msrb.mxu2 %v1761_v41 }
 0x31b   :  { %1174 = vmatpush.bf16.msra.mxu3 %v1725_v17  ;;  %1187 = vmatpush.bf16.msra.mxu0 %v1764_v42 }
 0x31e   :  { %1110 = vmatpush.bf16.msrb.mxu2 %v1767_v54 }
 0x31f   :  { %1175 = vmatpush.bf16.msra.mxu3 %v1728_v23  ;;  %1188 = vmatpush.bf16.msra.mxu0 %v1770_v55  ;;  %v302_v23 = vadd.f32 %v1960_v33, %v1890_v63 }
 0x322   :  { %1111 = vmatpush.bf16.msrb.mxu2 %v1773_v1 }
 0x323   :  { %1176 = vmatpush.bf16.msra.mxu3 %v1731_v34  ;;  %1189 = vmatpush.bf16.msra.mxu0 %v1776_v2 }
 0x326   :  { %1112 = vmatpush.bf16.msrb.mxu2 %v1784_v15 }
 0x327   :  { %1177 = vmatpush.bf16.msra.mxu3 %v1734_v45  ;;  %1190 = vmatpush.bf16.msra.mxu0 %v1787_v16 }
 0x32a   :  { %1113 = vmatpush.bf16.msrb.mxu2 %v1791_v27 }
 0x32b   :  { %1178 = vmatpush.bf16.msra.mxu3 %v1737_v58  ;;  %1191 = vmatpush.bf16.msra.mxu0 %v1794_v29 }
 0x32e   :  { %1114 = vmatpush.bf16.msrb.mxu2 %v1799_v35 }
 0x32f   :  { %1179 = vmatpush.bf16.msra.mxu3 %v1740_v8  ;;  %1192 = vmatpush.bf16.msra.mxu0 %v1802_v36 }
 0x38f   :  { %v934_v7 = vpop.f32.mrf.mxu0 }
 0x390   :  { %v935_v57 = vadd.f32 %v934_v7, %v1912_v3 }
 0x394   :  { %v908_v11 = vpop.f32.mrf.mxu2  ;;  %v921_v17 = vpop.f32.mrf.mxu3 }
 0x395   :  { %v909_v34 = vadd.f32 %v908_v11, %v1881_v47  ;;  %v922_v45 = vadd.f32 %v921_v17, %v1894_v5 }
 0x397   :  { %v938_v58 = vadd.f32 %v909_v34, %v1892_v4  ;;  %v958_v14 = vadd.f32 %v922_v45, %v302_v23  ;;  %v936_v28 = vpop.f32.mrf.mxu0 }
 0x399   :  { %v1481_v42 = vmul.f32 -1.442695, %v938_v58  ;;  %v1482_v55 = vmul.f32 -1.442695, %v958_v14 }
 0x39b   :  { %1586 = vpow2.f32 %v1481_v42 }
 0x39c   :  { %1588 = vpow2.f32 %v1482_v55  ;;  %v910_v8 = vpop.f32.mrf.mxu2  ;;  %v923_v2 = vpop.f32.mrf.mxu3 }
 0x3a1   :  { %v1587_v16 = vpop.eup %1586 }
 0x3a2   :  { %v1589_v29 = vpop.eup %1588  ;;  %v942_v36 = vadd.f32 1.0, %v1587_v16 }
 0x3a3   :  { %v962_v19 = vadd.f32 1.0, %v1589_v29 }
 0x3a4   :  { %1590 = vrcp.f32 %v942_v36  ;;  %v954_v4 = vand.u32 2147483648, %v942_v36  ;;  %v952_v25 = vand.u32 2147483647, %v942_v36  ;;  %vm948_vm1 = vweird.f32 %v942_v36 }
 0x3a5   :  { %1592 = vrcp.f32 %v962_v19  ;;  %v974_v52 = vand.u32 2147483648, %v962_v19  ;;  %vm968_vm5 = vweird.f32 %v962_v19  ;;  %v972_v24 = vand.u32 2147483647, %v962_v19 }
 0x3a6   :  { %v955_v49 = vor.u32 1.1754944e-38, %v954_v4  ;;  %vm953_vm3 = vcmp.eq.f32.partialorder %v952_v25, 8.507059e+37 }
 0x3a7   :  { %v975_v12 = vor.u32 1.1754944e-38, %v974_v52  ;;  %vm973_vm7 = vcmp.eq.f32.partialorder %v972_v24, 8.507059e+37 }
 0x3aa   :  { %v1591_v33 = vpop.eup %1590 }
 0x3ab   :  { %v1593_v61 = vpop.eup %1592  ;;  %v944_v53 = vmul.f32 %v1591_v33, %v942_v36  ;;  %vm949_vm0 = vweird.f32 %v1591_v33 }
 0x3ac   :  { %v964_v50 = vmul.f32 %v1593_v61, %v962_v19  ;;  %vm950_vm2 = vmor %vm948_vm1, %vm949_vm0  ;;  %vm969_vm4 = vweird.f32 %v1593_v61 }
 0x3ad   :  { %v945_v48 = vsub.f32 1.0, %v944_v53  ;;  %vm970_vm6 = vmor %vm968_vm5, %vm969_vm4 }
 0x3ae   :  { %v965_v56 = vsub.f32 1.0, %v964_v50 }
 0x3af   :  { %v946_v18 = vmul.f32 %v1591_v33, %v945_v48 }
 0x3b0   :  { %v966_v60 = vmul.f32 %v1593_v61, %v965_v56 }
 0x3b1   :  { %v947_v59 = vadd.f32 %v1591_v33, %v946_v18 }
 0x3b2   :  { %v967_v38 = vadd.f32 %v1593_v61, %v966_v60 }
 0x3b3   :  { %v951_v51 = vsel %vm950_vm2, %v1591_v33, %v947_v59 }
 0x3b4   :  { %v956_v21 = vsel %vm953_vm3, %v955_v49, %v951_v51  ;;  %v971_v13 = vsel %vm970_vm6, %v1593_v61, %v967_v38 }
 0x3b5   :  { %v978_v39 = vmul.f32 %v956_v21, %v935_v57  ;;  %v976_v9 = vsel %vm973_vm7, %v975_v12, %v971_v13  ;;  %v2136_v12 = vld [vmem:[#allocation10_spill] sm:$0xff] }
 0x3b6   :  { %v981_v44 = vsub.f32 1.0, %v976_v9  ;;  %v983_v0 = vmul.f32 %v976_v9, %v2049_v62 }
 0x3b7   :  { %v979_v6 = vadd.f32 %v978_v39, %v1920_v31 }
 0x3b9   :  { %1594 = vtanh.f32 %v979_v6 }
 0x3bf   :  { %v1595_v32 = vpop.eup %1594 }
 0x3c0   :  { %v982_v46 = vmul.f32 %v1595_v32, %v981_v44 }
 0x3c2   :  { %v2085_v43 = vadd.f32 %v983_v0, %v982_v46 }
 0x3c4   :  { %v989_v22 = vpack.c.bf16 %v2085_v43, %v2085_v43 }
 0x3c6   :  { %998 = vmatmul.bf16.vlgmr.msra.gmra.mxu1 %v989_v22  ;;  %1011 = vmatmul.bf16.vlgmr.msra.gmra.mxu2 %v989_v22 }
 0x3c7   :  { %1024 = vmatmul.bf16.vlgmr.msrb.gmra.mxu3 %v989_v22  ;;  %1198 = vmatpush.bf16.msra.mxu1 %v1747_v10 }
 0x3cb   :  { %1199 = vmatpush.bf16.msra.mxu1 %v1753_v26  ;;  %v304_v26 = vadd.f32 %v1962_v37, %v1890_v63 }
 0x3cf   :  { %1200 = vmatpush.bf16.msra.mxu1 %v1761_v41 }
 0x3d3   :  { %1201 = vmatpush.bf16.msra.mxu1 %v1767_v54 }
 0x3d7   :  { %1202 = vmatpush.bf16.msra.mxu1 %v1773_v1 }
 0x3db   :  { %1203 = vmatpush.bf16.msra.mxu1 %v1784_v15 }
 0x3df   :  { %1204 = vmatpush.bf16.msra.mxu1 %v1791_v27 }
 0x3e3   :  { %1205 = vmatpush.bf16.msra.mxu1 %v1799_v35 }
 0x443   :  { %v999_v31 = vpop.f32.mrf.mxu1 }
 0x444   :  { %v1000_v62 = vadd.f32 %v999_v31, %v1881_v47 }
 0x446   :  { %v1029_v7 = vadd.f32 %v1000_v62, %v1903_v30 }
 0x448   :  { %v1483_v10 = vmul.f32 -1.442695, %v1029_v7 }
 0x449   :  { %v1012_v11 = vpop.f32.mrf.mxu2 }
 0x44a   :  { %1596 = vpow2.f32 %v1483_v10  ;;  %v1013_v41 = vadd.f32 %v1012_v11, %v1894_v5  ;;  %v1025_v54 = vpop.f32.mrf.mxu3 }
 0x44b   :  { %v1001_v1 = vpop.f32.mrf.mxu1  ;;  %v1026_v19 = vadd.f32 %v1025_v54, %v1912_v3 }
 0x44c   :  { %v1049_v15 = vadd.f32 %v1013_v41, %v304_v26 }
 0x44e   :  { %v1484_v17 = vmul.f32 -1.442695, %v1049_v15 }
 0x450   :  { %v1597_v27 = vpop.eup %1596  ;;  %1598 = vpow2.f32 %v1484_v17 }
 0x451   :  { %v1033_v35 = vadd.f32 1.0, %v1597_v27  ;;  %v1014_v23 = vpop.f32.mrf.mxu2 }
 0x452   :  { %v1027_v34 = vpop.f32.mrf.mxu3 }
 0x453   :  { %1600 = vrcp.f32 %v1033_v35  ;;  %v1045_v37 = vand.u32 2147483648, %v1033_v35  ;;  %v1043_v55 = vand.u32 2147483647, %v1033_v35  ;;  %vm1039_vm9 = vweird.f32 %v1033_v35 }
 0x455   :  { %v1046_v29 = vor.u32 1.1754944e-38, %v1045_v37  ;;  %vm1044_vm11 = vcmp.eq.f32.partialorder %v1043_v55, 8.507059e+37 }
 0x456   :  { %v1599_v45 = vpop.eup %1598 }
 0x457   :  { %v1053_v30 = vadd.f32 1.0, %v1599_v45 }
 0x459   :  { %v1601_v58 = vpop.eup %1600  ;;  %1602 = vrcp.f32 %v1053_v30  ;;  %v1065_v48 = vand.u32 2147483648, %v1053_v30  ;;  %v1063_v4 = vand.u32 2147483647, %v1053_v30  ;;  %vm1059_vm13 = vweird.f32 %v1053_v30 }
 0x45a   :  { %v1035_v14 = vmul.f32 %v1601_v58, %v1033_v35  ;;  %vm1040_vm8 = vweird.f32 %v1601_v58 }
 0x45b   :  { %vm1041_vm10 = vmor %vm1039_vm9, %vm1040_vm8  ;;  %v1066_v60 = vor.u32 1.1754944e-38, %v1065_v48  ;;  %vm1064_vm15 = vcmp.eq.f32.partialorder %v1063_v4, 8.507059e+37 }
 0x45c   :  { %v1036_v28 = vsub.f32 1.0, %v1035_v14 }
 0x45e   :  { %v1037_v42 = vmul.f32 %v1601_v58, %v1036_v28 }
 0x45f   :  { %v1603_v8 = vpop.eup %1602 }
 0x460   :  { %v1055_v2 = vmul.f32 %v1603_v8, %v1053_v30  ;;  %v1038_v16 = vadd.f32 %v1601_v58, %v1037_v42  ;;  %vm1060_vm12 = vweird.f32 %v1603_v8 }
 0x461   :  { %vm1061_vm14 = vmor %vm1059_vm13, %vm1060_vm12 }
 0x462   :  { %v1056_v36 = vsub.f32 1.0, %v1055_v2  ;;  %v1042_v33 = vsel %vm1041_vm10, %v1601_v58, %v1038_v16 }
 0x463   :  { %v1047_v61 = vsel %vm1044_vm11, %v1046_v29, %v1042_v33 }
 0x464   :  { %v1057_v53 = vmul.f32 %v1603_v8, %v1056_v36  ;;  %v1069_v50 = vmul.f32 %v1047_v61, %v1026_v19 }
 0x466   :  { %v1070_v56 = vadd.f32 %v1069_v50, %v1923_v20  ;;  %v1058_v18 = vadd.f32 %v1603_v8, %v1057_v53  ;;  %v307_v20 = vadd.f32 %v1964_v40, %v1890_v63 }
 0x468   :  { %1604 = vtanh.f32 %v1070_v56  ;;  %v1062_v25 = vsel %vm1061_vm14, %v1603_v8, %v1058_v18  ;;  %v2137_v8 = vld [vmem:[#allocation12_spill] sm:$0xff]  ;;  %v2138_v56 = vld [vmem:[#allocation13_spill] sm:$0xff] }
 0x469   :  { %v1067_v59 = vsel %vm1064_vm15, %v1066_v60, %v1062_v25  ;;  %v309_v18 = vadd.f32 %v2138_v56, %v1890_v63 }
 0x46a   :  { %v1072_v49 = vsub.f32 1.0, %v1067_v59  ;;  %v1074_v21 = vmul.f32 %v1067_v59, %v2085_v43 }
 0x46e   :  { %v1605_v57 = vpop.eup %1604 }
 0x46f   :  { %v1073_v51 = vmul.f32 %v1605_v57, %v1072_v49 }
 0x471   :  { %v1075_v38 = vadd.f32 %v1074_v21, %v1073_v51 }
 0x473   :  { %v1080_v52 = vpack.c.bf16 %v1075_v38, %v1075_v38 }
 0x475   :  { %1089 = vmatmul.bf16.vlgmr.msrb.gmra.mxu0 %v1080_v52  ;;  %1102 = vmatmul.bf16.vlgmr.msrb.gmra.mxu1 %v1080_v52 }
 0x476   :  { %1115 = vmatmul.bf16.vlgmr.msrb.gmra.mxu2 %v1080_v52 }
 0x4f2   :  { %v1090_v39 = vpop.f32.mrf.mxu0  ;;  %v1103_v24 = vpop.f32.mrf.mxu1 }
 0x4f3   :  { %v1091_v6 = vadd.f32 %v1090_v39, %v1881_v47  ;;  %v1104_v13 = vadd.f32 %v1103_v24, %v1894_v5 }
 0x4f5   :  { %v1120_v9 = vadd.f32 %v1091_v6, %v2136_v12  ;;  %v1140_v44 = vadd.f32 %v1104_v13, %v307_v20 }
 0x4f7   :  { %v1485_v32 = vmul.f32 -1.442695, %v1120_v9  ;;  %v1486_v46 = vmul.f32 -1.442695, %v1140_v44 }
 0x4f9   :  { %1606 = vpow2.f32 %v1485_v32  ;;  %v1116_v0 = vpop.f32.mrf.mxu2 }
 0x4fa   :  { %1608 = vpow2.f32 %v1486_v46  ;;  %v1092_v43 = vpop.f32.mrf.mxu0  ;;  %v1105_v22 = vpop.f32.mrf.mxu1  ;;  %v1117_v30 = vadd.f32 %v1116_v0, %v1912_v3 }
 0x4ff   :  { %v1607_v31 = vpop.eup %1606 }
 0x500   :  { %v1609_v62 = vpop.eup %1608  ;;  %v1124_v7 = vadd.f32 1.0, %v1607_v31 }
 0x501   :  { %v1144_v10 = vadd.f32 1.0, %v1609_v62  ;;  %v1118_v11 = vpop.f32.mrf.mxu2 }
 0x502   :  { %1610 = vrcp.f32 %v1124_v7  ;;  %v1136_v17 = vand.u32 2147483648, %v1124_v7  ;;  %v1134_v35 = vand.u32 2147483647, %v1124_v7  ;;  %vm1130_vm1 = vweird.f32 %v1124_v7 }
 0x503   :  { %1612 = vrcp.f32 %v1144_v10  ;;  %v1156_v42 = vand.u32 2147483648, %v1144_v10  ;;  %vm1150_vm5 = vweird.f32 %v1144_v10  ;;  %v1154_v55 = vand.u32 2147483647, %v1144_v10 }
 0x504   :  { %v1137_v45 = vor.u32 1.1754944e-38, %v1136_v17  ;;  %vm1135_vm3 = vcmp.eq.f32.partialorder %v1134_v35, 8.507059e+37 }
 0x505   :  { %v1157_v29 = vor.u32 1.1754944e-38, %v1156_v42  ;;  %vm1155_vm7 = vcmp.eq.f32.partialorder %v1154_v55, 8.507059e+37 }
 0x508   :  { %v1611_v40 = vpop.eup %1610 }
 0x509   :  { %v1613_v26 = vpop.eup %1612  ;;  %v1126_v41 = vmul.f32 %v1611_v40, %v1124_v7  ;;  %vm1131_vm0 = vweird.f32 %v1611_v40 }
 0x50a   :  { %v1146_v54 = vmul.f32 %v1613_v26, %v1144_v10  ;;  %vm1132_vm2 = vmor %vm1130_vm1, %vm1131_vm0  ;;  %vm1151_vm4 = vweird.f32 %v1613_v26 }
 0x50b   :  { %v1127_v1 = vsub.f32 1.0, %v1126_v41  ;;  %vm1152_vm6 = vmor %vm1150_vm5, %vm1151_vm4  ;;  %v2140_v41 = vld [vmem:[#allocation9_spill] sm:$0xff] }
 0x50c   :  { %v1147_v15 = vsub.f32 1.0, %v1146_v54  ;;  %v2141_v54 = vld [vmem:[#allocation14_spill] sm:$0xff] }
 0x50d   :  { %v1128_v27 = vmul.f32 %v1611_v40, %v1127_v1  ;;  %v338_v1 = vadd.f32 %v2141_v54, %v2140_v41 }
 0x50e   :  { %v1148_v23 = vmul.f32 %v1613_v26, %v1147_v15 }
 0x50f   :  { %v1129_v34 = vadd.f32 %v1611_v40, %v1128_v27 }
 0x510   :  { %v1149_v28 = vadd.f32 %v1613_v26, %v1148_v23 }
 0x511   :  { %v1133_v58 = vsel %vm1132_vm2, %v1611_v40, %v1129_v34 }
 0x512   :  { %v1138_v14 = vsel %vm1135_vm3, %v1137_v45, %v1133_v58  ;;  %v1153_v16 = vsel %vm1152_vm6, %v1613_v26, %v1149_v28 }
 0x513   :  { %v1160_v37 = vmul.f32 %v1138_v14, %v1117_v30  ;;  %v1158_v36 = vsel %vm1155_vm7, %v1157_v29, %v1153_v16 }
 0x514   :  { %v1163_v19 = vsub.f32 1.0, %v1158_v36  ;;  %v1165_v53 = vmul.f32 %v1158_v36, %v1075_v38  ;;  %v2139_v38 = vld [vmem:[#allocation11_spill] sm:$0xff] }
 0x515   :  { %v1161_v2 = vadd.f32 %v1160_v37, %v2137_v8 }
 0x517   :  { %1614 = vtanh.f32 %v1161_v2 }
 0x51d   :  { %v1615_v33 = vpop.eup %1614 }
 0x51e   :  { %v1164_v61 = vmul.f32 %v1615_v33, %v1163_v19 }
 0x520   :  { %v1166_v50 = vadd.f32 %v1165_v53, %v1164_v61 }
 0x522   :  { %v1171_v48 = vpack.c.bf16 %v1166_v50, %v1166_v50 }
 0x524   :  { %1180 = vmatmul.bf16.vlgmr.msra.gmra.mxu3 %v1171_v48  ;;  %1193 = vmatmul.bf16.vlgmr.msra.gmra.mxu0 %v1171_v48 }
 0x525   :  { %1206 = vmatmul.bf16.vlgmr.msra.gmra.mxu1 %v1171_v48 }
 0x5a1   :  { %v1194_v4 = vpop.f32.mrf.mxu0 }
 0x5a2   :  { %v1195_v25 = vadd.f32 %v1194_v4, %v1894_v5  ;;  %v1207_v60 = vpop.f32.mrf.mxu1 }
 0x5a3   :  { %v1208_v10 = vadd.f32 %v1207_v60, %v1912_v3 }
 0x5a4   :  { %v1231_v59 = vadd.f32 %v1195_v25, %v309_v18 }
 0x5a6   :  { %v1488_v49 = vmul.f32 -1.442695, %v1231_v59 }
 0x5a7   :  { %v1181_v57 = vpop.f32.mrf.mxu3 }
 0x5a8   :  { %1616 = vpow2.f32 %v1488_v49  ;;  %v1182_v51 = vadd.f32 %v1181_v57, %v1881_v47 }
 0x5a9   :  { %v1196_v21 = vpop.f32.mrf.mxu0 }
 0x5aa   :  { %v1211_v52 = vadd.f32 %v1182_v51, %v2139_v38  ;;  %v1209_v39 = vpop.f32.mrf.mxu1 }
 0x5ac   :  { %v1487_v24 = vmul.f32 -1.442695, %v1211_v52 }
 0x5ae   :  { %v1617_v20 = vpop.eup %1616  ;;  %1618 = vpow2.f32 %v1487_v24 }
 0x5af   :  { %v1235_v6 = vadd.f32 1.0, %v1617_v20  ;;  %v1183_v13 = vpop.f32.mrf.mxu3 }
 0x5b1   :  { %1620 = vrcp.f32 %v1235_v6  ;;  %v1247_v15 = vand.u32 2147483648, %v1235_v6  ;;  %vm1241_vm13 = vweird.f32 %v1235_v6  ;;  %v1245_v27 = vand.u32 2147483647, %v1235_v6 }
 0x5b3   :  { %v1248_v34 = vor.u32 1.1754944e-38, %v1247_v15  ;;  %vm1246_vm15 = vcmp.eq.f32.partialorder %v1245_v27, 8.507059e+37 }
 0x5b4   :  { %v1619_v63 = vpop.eup %1618 }
 0x5b5   :  { %v1215_v12 = vadd.f32 1.0, %v1619_v63 }
 0x5b7   :  { %1622 = vrcp.f32 %v1215_v12  ;;  %v1621_v5 = vpop.eup %1620  ;;  %v1227_v47 = vand.u32 2147483648, %v1215_v12  ;;  %v1225_v22 = vand.u32 2147483647, %v1215_v12  ;;  %vm1221_vm9 = vweird.f32 %v1215_v12 }
 0x5b8   :  { %v1237_v9 = vmul.f32 %v1621_v5, %v1235_v6  ;;  %vm1242_vm12 = vweird.f32 %v1621_v5 }
 0x5b9   :  { %v1228_v7 = vor.u32 1.1754944e-38, %v1227_v47  ;;  %vm1226_vm11 = vcmp.eq.f32.partialorder %v1225_v22, 8.507059e+37  ;;  %vm1243_vm14 = vmor %vm1241_vm13, %vm1242_vm12 }
 0x5ba   :  { %v1238_v46 = vsub.f32 1.0, %v1237_v9 }
 0x5bc   :  { %v1239_v31 = vmul.f32 %v1621_v5, %v1238_v46 }
 0x5bd   :  { %v1623_v44 = vpop.eup %1622 }
 0x5be   :  { %v1217_v32 = vmul.f32 %v1623_v44, %v1215_v12  ;;  %vm1222_vm8 = vweird.f32 %v1623_v44  ;;  %v1240_v40 = vadd.f32 %v1621_v5, %v1239_v31 }
 0x5bf   :  { %vm1223_vm10 = vmor %vm1221_vm9, %vm1222_vm8 }
 0x5c0   :  { %v1218_v0 = vsub.f32 1.0, %v1217_v32  ;;  %v1244_v23 = vsel %vm1243_vm14, %v1621_v5, %v1240_v40 }
 0x5c1   :  { %v1249_v45 = vsel %vm1246_vm15, %v1248_v34, %v1244_v23 }
 0x5c2   :  { %v1219_v43 = vmul.f32 %v1623_v44, %v1218_v0  ;;  %v1254_v3 = vsub.f32 1.0, %v1249_v45  ;;  %v1256_v58 = vmul.f32 %v1249_v45, %v1166_v50 }
 0x5c4   :  { %v1220_v62 = vadd.f32 %v1623_v44, %v1219_v43 }
 0x5c6   :  { %v1224_v11 = vsel %vm1223_vm10, %v1623_v44, %v1220_v62 }
 0x5c7   :  { %v1229_v26 = vsel %vm1226_vm11, %v1228_v7, %v1224_v11 }
 0x5c8   :  { %v1251_v17 = vmul.f32 %v1229_v26, %v1208_v10 }
 0x5ca   :  { %v1252_v35 = vadd.f32 %v1251_v17, %v338_v1 }
 0x5cc   :  { %1624 = vtanh.f32 %v1252_v35 }
 0x5d2   :  { %v1625_v30 = vpop.eup %1624 }
 0x5d3   :  { %v1255_v14 = vmul.f32 %v1625_v30, %v1254_v3 }
 0x5d5   :  { %v1257_v28 = vadd.f32 %v1256_v58, %v1255_v14 }
 0x5d7   :  { %1258 = vst [vmem:[%s2128_s5] sm:$0xff] %v1257_v28 }
 0x5d8   :  { %1263 = vsyncpa [#allocation4], 1 }
 0x5d9   :  { %1264 = vsyncpa [#allocation6], 1 }

// kernel: seq2seq_forward.3
= control target key start
LH: loop header
LB: loop body
LE: loop exit
PB: predicated region body
PF: predicated region fallthrough
CT: control target
= control target key end

     0   :  { %13 = vsyncpa [#allocation4], 0  ;;  %s3923_s0 = inlined_call_operand.vmem [shape: s32[8], index: 0, kind: input, shape index: {}]   ;;  %s3924_s1 = inlined_call_operand.vmem [shape: s32[8,8,1], index: 1, kind: input, shape index: {}]   ;;  %s3925_s2 = inlined_call_operand.vmem [shape: f32[8,128], index: 2, kind: input, shape index: {}]   ;;  %s3926_s3 = inlined_call_operand.vmem [shape: bf16[128,512], index: 3, kind: input, shape index: {}]   ;;  %s3927_s4 = inlined_call_operand.hbm [shape: bf16[128,512], index: 4, kind: input, shape index: {}]   ;;  %s3928_s5 = inlined_call_operand.vmem [shape: f32[1,512], index: 5, kind: input, shape index: {}]   ;;  %s3929_s6 = inlined_call_operand.vmem [shape: bf16[128,128], index: 6, kind: input, shape index: {}]   ;;  %s3930_s7 = inlined_call_operand.vmem [shape: f32[1,128], index: 7, kind: input, shape index: {}]   ;;  %s3931_s8 = inlined_call_operand.vmem [shape: f32[8,8,128], index: 8, kind: output, shape index: {}]  }
   0x1   :  { %s20_s29 = sshll.u32 %s3923_s0, 4  ;;  %s21_s29 = int_to_ptr.vmem [resolvable:$true] %s20_s29 }
   0x2   :  { %14 = vsyncpa [#allocation3], 0  ;;  %s34_s10 = sshll.u32 %s3927_s4, 4  ;;  %s2699_s11 = smov [#allocation2]   ;;  %s35_s10 = int_to_ptr.hbm [resolvable:$true] %s34_s10 }
   0x3   :  { %23 = dma.vmem_to_smem %s21_s29, 16, %s2699_s11, [#allocation4]  }
   0x4   :  { %s2700_s12 = smov [#allocation5]   ;;  %s2701_s14 = smov 256  }
   0x5   :  { %s36_s13 = sshll.u32 %s2700_s12, 4  ;;  %s2702_s15 = smov 16   ;;  %s37_s13 = int_to_ptr.vmem [resolvable:$true] %s36_s13 }
   0x6   :  { %42 = dma.hbm_to_vmem [thread:$0]  %s35_s10, 4096, %s37_s13, [#allocation3], %s2701_s14, %s2701_s14, %s2702_s15  }
   0x7   :  { %2695 = dma.done.wait [#allocation4], 16  }
   0x8   :  { %2696 = vsyncadd [#allocation4], 4294967280 }
   0x9   :  { %2697 = dma.done.wait [#allocation3], 4096  }
   0xa   :  { %2698 = vsyncadd [#allocation3], 4294963200 }
   0xb   :  { %57 = sfence }
   0xc   :  { %v157_v0 = vld [vmem:[%s3924_s1] sm:$0xff]  ;;  %v2507_v2 = vld [vmem:[#allocation5 + $0xec] sm:$0xf0]  ;;  %v2703_v3 = vmov 0   ;;  %v2171_v6 = vld [vmem:[#allocation5 + $0xf0] sm:$0xf0] }
   0xd   :  { %v2169_v1 = vld [vmem:[#allocation5 + $0xe0] sm:$0xf]  ;;  %2525 = vset.pattern.permute.xlu0 %v2703_v3  ;;  %v2505_v5 = vld [vmem:[#allocation5 + $0xe4] sm:$0xf]  ;;  %2526 = vset.pattern.permute.xlu2 %v2703_v3  ;;  %v2704_v7 = vmov 0.0   ;;  %s2355_s18 = sld [smem:[#allocation2 + $0x1]] }
   0xe   :  { %v2761_v4 = vor.u32 %v2507_v2, %v2169_v1  ;;  %159 = vperm.xlu0 %2525, %v157_v0   ;;  %156 = vst [vmem:[%s3931_s8] sm:$0xff] %v2704_v7  ;;  %v2766_v8 = vor.u32 %v2505_v5, %v2171_v6  ;;  %v2177_v9 = vld [vmem:[#allocation5 + $0xe8] sm:$0xf]  ;;  %v2508_v10 = vld [vmem:[#allocation5 + $0xf4] sm:$0xf0]  ;;  %v2506_v11 = vld [vmem:[#allocation5 + $0xec] sm:$0xf]  ;;  %2527 = vset.pattern.permute.xlu1 %v2703_v3 }
   0xf   :  { %v2769_v12 = vor.u32 %v2508_v10, %v2177_v9  ;;  %v2179_v13 = vld [vmem:[#allocation5 + $0xf8] sm:$0xf0]  ;;  %v2153_v14 = vld [vmem:[#allocation5 + $0xc0] sm:$0xf]  ;;  %v2503_v15 = vld [vmem:[#allocation5 + $0xcc] sm:$0xf0] }
  0x10   :  { %327 = vmatpush.bf16.msra.mxu0 %v2761_v4  ;;  %340 = vmatpush.bf16.msra.mxu1 %v2766_v8  ;;  %v2772_v16 = vor.u32 %v2506_v11, %v2179_v13  ;;  %v2774_v17 = vor.u32 %v2503_v15, %v2153_v14  ;;  %v2501_v18 = vld [vmem:[#allocation5 + $0xc4] sm:$0xf]  ;;  %v2155_v19 = vld [vmem:[#allocation5 + $0xd0] sm:$0xf0]  ;;  %v2161_v20 = vld [vmem:[#allocation5 + $0xc8] sm:$0xf] }
  0x11   :  { %353 = vmatpush.bf16.msra.mxu2 %v2769_v12  ;;  %v2777_v21 = vor.u32 %v2501_v18, %v2155_v19  ;;  %v2504_v22 = vld [vmem:[#allocation5 + $0xd4] sm:$0xf0]  ;;  %v2502_v23 = vld [vmem:[#allocation5 + $0xcc] sm:$0xf]  ;;  %v2163_v24 = vld [vmem:[#allocation5 + $0xd8] sm:$0xf0] }
  0x12   :  { %4039 = vst [vmem:[#allocation8_spill] sm:$0xff] %v2772_v16  ;;  %366 = vmatpush.bf16.msra.mxu3 %v2772_v16  ;;  %v2780_v25 = vor.u32 %v2504_v22, %v2161_v20  ;;  %v2782_v26 = vor.u32 %v2502_v23, %v2163_v24  ;;  %v2137_v27 = vld [vmem:[#allocation5 + $0xa0] sm:$0xf]  ;;  %v2499_v28 = vld [vmem:[#allocation5 + $0xac] sm:$0xf0]  ;;  %s2370_s23 = sld [smem:[#allocation2 + $0x2]] }
  0x13   :  { %v2497_v29 = vld [vmem:[#allocation5 + $0xa4] sm:$0xf]  ;;  %v2785_v30 = vor.u32 %v2499_v28, %v2137_v27  ;;  %v2139_v31 = vld [vmem:[#allocation5 + $0xb0] sm:$0xf0]  ;;  %v2145_v32 = vld [vmem:[#allocation5 + $0xa8] sm:$0xf] }
  0x14   :  { %4040 = vst [vmem:[#allocation9_spill] sm:$0xff] %v2782_v26  ;;  %328 = vmatpush.bf16.msra.mxu0 %v2774_v17  ;;  %v2500_v33 = vld [vmem:[#allocation5 + $0xb4] sm:$0xf0]  ;;  %341 = vmatpush.bf16.msra.mxu1 %v2777_v21  ;;  %v2788_v34 = vor.u32 %v2497_v29, %v2139_v31  ;;  %v2498_v35 = vld [vmem:[#allocation5 + $0xac] sm:$0xf]  ;;  %p742_p0 = scmp.gt.s32.totalorder %s2355_s18, 0 }
  0x15   :  { %v2147_v36 = vld [vmem:[#allocation5 + $0xb8] sm:$0xf0]  ;;  %v2121_v37 = vld [vmem:[#allocation5 + $0x80] sm:$0xf]  ;;  %354 = vmatpush.bf16.msra.mxu2 %v2780_v25  ;;  %v2791_v38 = vor.u32 %v2500_v33, %v2145_v32  ;;  %v2495_v39 = vld [vmem:[#allocation5 + $0x8c] sm:$0xf0] }
  0x16   :  { %v2493_v40 = vld [vmem:[#allocation5 + $0x84] sm:$0xf]  ;;  %v2123_v41 = vld [vmem:[#allocation5 + $0x90] sm:$0xf0]  ;;  %367 = vmatpush.bf16.msra.mxu3 %v2782_v26  ;;  %v2794_v42 = vor.u32 %v2498_v35, %v2147_v36  ;;  %v2129_v43 = vld [vmem:[#allocation5 + $0x88] sm:$0xf]  ;;  %v2797_v45 = vor.u32 %v2495_v39, %v2121_v37 }
  0x17   :  { %v2496_v44 = vld [vmem:[#allocation5 + $0x94] sm:$0xf0]  ;;  %v2494_v46 = vld [vmem:[#allocation5 + $0x8c] sm:$0xf]  ;;  %v2131_v47 = vld [vmem:[#allocation5 + $0x98] sm:$0xf0]  ;;  %v2800_v48 = vor.u32 %v2493_v40, %v2123_v41 }
  0x18   :  { %4041 = vst [vmem:[#allocation10_spill] sm:$0xff] %v2794_v42  ;;  %329 = vmatpush.bf16.msra.mxu0 %v2785_v30  ;;  %342 = vmatpush.bf16.msra.mxu1 %v2788_v34  ;;  %v2105_v49 = vld [vmem:[#allocation5 + $0x60] sm:$0xf]  ;;  %v2491_v50 = vld [vmem:[#allocation5 + $0x6c] sm:$0xf0]  ;;  %v2803_v51 = vor.u32 %v2496_v44, %v2129_v43  ;;  %v2806_v54 = vor.u32 %v2494_v46, %v2131_v47  ;;  %p963_p1 = scmp.gt.s32.totalorder %s2370_s23, 0 }
  0x19   :  { %355 = vmatpush.bf16.msra.mxu2 %v2791_v38  ;;  %v2489_v52 = vld [vmem:[#allocation5 + $0x64] sm:$0xf]  ;;  %v2107_v53 = vld [vmem:[#allocation5 + $0x70] sm:$0xf0]  ;;  %v2113_v55 = vld [vmem:[#allocation5 + $0x68] sm:$0xf]  ;;  %v2809_v57 = vor.u32 %v2491_v50, %v2105_v49 }
  0x1a   :  { %368 = vmatpush.bf16.msra.mxu3 %v2794_v42  ;;  %4042 = vst [vmem:[#allocation11_spill] sm:$0xff] %v2806_v54  ;;  %v2492_v56 = vld [vmem:[#allocation5 + $0x74] sm:$0xf0]  ;;  %v2490_v58 = vld [vmem:[#allocation5 + $0x6c] sm:$0xf]  ;;  %v2812_v60 = vor.u32 %v2489_v52, %v2107_v53  ;;  %s2400_s26 = sld [smem:[#allocation2 + $0x4]] }
  0x1b   :  { %v2115_v59 = vld [vmem:[#allocation5 + $0x78] sm:$0xf0]  ;;  %v2089_v61 = vld [vmem:[#allocation5 + $0x40] sm:$0xf]  ;;  %v2487_v62 = vld [vmem:[#allocation5 + $0x4c] sm:$0xf0]  ;;  %v2815_v63 = vor.u32 %v2492_v56, %v2113_v55 }
  0x1c   :  { %330 = vmatpush.bf16.msra.mxu0 %v2797_v45  ;;  %343 = vmatpush.bf16.msra.mxu1 %v2800_v48  ;;  %v2485_v0 = vld [vmem:[#allocation5 + $0x44] sm:$0xf]  ;;  %v2091_v1 = vld [vmem:[#allocation5 + $0x50] sm:$0xf0]  ;;  %v2818_v2 = vor.u32 %v2490_v58, %v2115_v59  ;;  %v2097_v3 = vld [vmem:[#allocation5 + $0x48] sm:$0xf]  ;;  %v2821_v6 = vor.u32 %v2487_v62, %v2089_v61 }
  0x1d   :  { %356 = vmatpush.bf16.msra.mxu2 %v2803_v51  ;;  %v2488_v5 = vld [vmem:[#allocation5 + $0x54] sm:$0xf0]  ;;  %v2486_v7 = vld [vmem:[#allocation5 + $0x4c] sm:$0xf]  ;;  %v2099_v9 = vld [vmem:[#allocation5 + $0x58] sm:$0xf0]  ;;  %v2824_v10 = vor.u32 %v2485_v0, %v2091_v1 }
  0x1e   :  { %369 = vmatpush.bf16.msra.mxu3 %v2806_v54  ;;  %4043 = vst [vmem:[#allocation12_spill] sm:$0xff] %v2818_v2  ;;  %v2073_v11 = vld [vmem:[#allocation5 + $0x20] sm:$0xf]  ;;  %v2483_v13 = vld [vmem:[#allocation5 + $0x2c] sm:$0xf0]  ;;  %v2827_v14 = vor.u32 %v2488_v5, %v2097_v3  ;;  %v2830_v19 = vor.u32 %v2486_v7, %v2099_v9  ;;  %s2415_s10 = sld [smem:[#allocation2 + $0x5]] }
  0x1f   :  { %v2481_v15 = vld [vmem:[#allocation5 + $0x24] sm:$0xf]  ;;  %v2075_v18 = vld [vmem:[#allocation5 + $0x30] sm:$0xf0]  ;;  %v2081_v20 = vld [vmem:[#allocation5 + $0x28] sm:$0xf]  ;;  %v2833_v24 = vor.u32 %v2483_v13, %v2073_v11 }
  0x20   :  { %331 = vmatpush.bf16.msra.mxu0 %v2809_v57  ;;  %344 = vmatpush.bf16.msra.mxu1 %v2812_v60  ;;  %4044 = vst [vmem:[#allocation13_spill] sm:$0xff] %v2830_v19  ;;  %v2484_v22 = vld [vmem:[#allocation5 + $0x34] sm:$0xf0]  ;;  %v2482_v23 = vld [vmem:[#allocation5 + $0x2c] sm:$0xf]  ;;  %v2836_v31 = vor.u32 %v2481_v15, %v2075_v18  ;;  %v165_v59 = vld [vmem:[%s3925_s2] sm:$0xff] }
  0x21   :  { %357 = vmatpush.bf16.msra.mxu2 %v2815_v63  ;;  %v2083_v27 = vld [vmem:[#allocation5 + $0x38] sm:$0xf0]  ;;  %v2057_v28 = vld [vmem:[#allocation5] sm:$0xf]  ;;  %v2479_v29 = vld [vmem:[#allocation5 + $0xc] sm:$0xf0]  ;;  %v2839_v36 = vor.u32 %v2484_v22, %v2081_v20  ;;  %v166_v18 = vpack.c.bf16 %v165_v59, %v165_v59 }
  0x22   :  { %370 = vmatpush.bf16.msra.mxu3 %v2818_v2  ;;  %v2477_v32 = vld [vmem:[#allocation5 + $0x4] sm:$0xf]  ;;  %v2059_v33 = vld [vmem:[#allocation5 + $0x10] sm:$0xf0]  ;;  %v2065_v35 = vld [vmem:[#allocation5 + $0x8] sm:$0xf]  ;;  %v2848_v41 = vor.u32 %v2482_v23, %v2083_v27  ;;  %v2857_v47 = vor.u32 %v2479_v29, %v2057_v28 }
  0x23   :  { %4045 = vst [vmem:[#allocation14_spill] sm:$0xff] %v2839_v36  ;;  %v2480_v37 = vld [vmem:[#allocation5 + $0x14] sm:$0xf0]  ;;  %v2297_v39 = vld [vmem:[%s3926_s3 + $0xe0] sm:$0xf]  ;;  %v2866_v53 = vor.u32 %v2477_v32, %v2059_v33  ;;  %p1405_p3 = scmp.gt.s32.totalorder %s2400_s26, 0 }
  0x24   :  { %332 = vmatpush.bf16.msra.mxu0 %v2821_v6  ;;  %345 = vmatpush.bf16.msra.mxu1 %v2824_v10  ;;  %v2475_v40 = vld [vmem:[%s3926_s3 + $0xec] sm:$0xf0]  ;;  %4046 = vst [vmem:[#allocation15_spill] sm:$0xff] %v2848_v41  ;;  %v2478_v43 = vld [vmem:[#allocation5 + $0xc] sm:$0xf]  ;;  %v2880_v61 = vor.u32 %v2480_v37, %v2065_v35  ;;  %p1626_p4 = scmp.gt.s32.totalorder %s2415_s10, 0 }
  0x25   :  { %358 = vmatpush.bf16.msra.mxu2 %v2827_v14  ;;  %v2473_v44 = vld [vmem:[%s3926_s3 + $0xe4] sm:$0xf]  ;;  %v2299_v46 = vld [vmem:[%s3926_s3 + $0xf0] sm:$0xf0]  ;;  %v2067_v49 = vld [vmem:[#allocation5 + $0x18] sm:$0xf0]  ;;  %v2868_v55 = vor.u32 %v2475_v40, %v2297_v39 }
  0x26   :  { %371 = vmatpush.bf16.msra.mxu3 %v2830_v19  ;;  %v2305_v50 = vld [vmem:[%s3926_s3 + $0xe8] sm:$0xf]  ;;  %v2476_v52 = vld [vmem:[%s3926_s3 + $0xf4] sm:$0xf0]  ;;  %v2474_v56 = vld [vmem:[%s3926_s3 + $0xec] sm:$0xf]  ;;  %v2882_v62 = vor.u32 %v2473_v44, %v2299_v46  ;;  %v2891_v3 = vor.u32 %v2478_v43, %v2067_v49 }
  0x27   :  { %4047 = vst [vmem:[#allocation16_spill] sm:$0xff] %v2868_v55  ;;  %v2307_v58 = vld [vmem:[%s3926_s3 + $0xf8] sm:$0xf0]  ;;  %v2281_v0 = vld [vmem:[%s3926_s3 + $0xc0] sm:$0xf]  ;;  %v2893_v5 = vor.u32 %v2476_v52, %v2305_v50 }
  0x28   :  { %333 = vmatpush.bf16.msra.mxu0 %v2833_v24  ;;  %346 = vmatpush.bf16.msra.mxu1 %v2836_v31  ;;  %4048 = vst [vmem:[#allocation17_spill] sm:$0xff] %v2880_v61  ;;  %v2471_v1 = vld [vmem:[%s3926_s3 + $0xcc] sm:$0xf0]  ;;  %v2469_v7 = vld [vmem:[%s3926_s3 + $0xc4] sm:$0xf]  ;;  %v2902_v11 = vor.u32 %v2474_v56, %v2307_v58 }
  0x29   :  { %359 = vmatpush.bf16.msra.mxu2 %v2839_v36  ;;  %4049 = vst [vmem:[#allocation18_spill] sm:$0xff] %v2882_v62  ;;  %v2283_v9 = vld [vmem:[%s3926_s3 + $0xd0] sm:$0xf0]  ;;  %v2289_v13 = vld [vmem:[%s3926_s3 + $0xc8] sm:$0xf]  ;;  %v2912_v20 = vor.u32 %v2471_v1, %v2281_v0 }
  0x2a   :  { %372 = vmatpush.bf16.msra.mxu3 %v2848_v41  ;;  %4050 = vst [vmem:[#allocation19_spill] sm:$0xff] %v2891_v3  ;;  %v2472_v15 = vld [vmem:[%s3926_s3 + $0xd4] sm:$0xf0]  ;;  %v2470_v22 = vld [vmem:[%s3926_s3 + $0xcc] sm:$0xf]  ;;  %v2922_v27 = vor.u32 %v2469_v7, %v2283_v9 }
  0x2b   :  { %4051 = vst [vmem:[#allocation20_spill] sm:$0xff] %v2893_v5  ;;  %v2291_v23 = vld [vmem:[%s3926_s3 + $0xd8] sm:$0xf0]  ;;  %v2265_v28 = vld [vmem:[%s3926_s3 + $0xa0] sm:$0xf]  ;;  %v2932_v32 = vor.u32 %v2472_v15, %v2289_v13 }
  0x2c   :  { %334 = vmatpush.bf16.msra.mxu0 %v2857_v47  ;;  %347 = vmatpush.bf16.msra.mxu1 %v2866_v53  ;;  %4052 = vst [vmem:[#allocation21_spill] sm:$0xff] %v2912_v20  ;;  %v2467_v29 = vld [vmem:[%s3926_s3 + $0xac] sm:$0xf0]  ;;  %v2465_v33 = vld [vmem:[%s3926_s3 + $0xa4] sm:$0xf]  ;;  %v2941_v37 = vor.u32 %v2470_v22, %v2291_v23 }
  0x2d   :  { %360 = vmatpush.bf16.msra.mxu2 %v2880_v61  ;;  %4053 = vst [vmem:[#allocation22_spill] sm:$0xff] %v2922_v27  ;;  %v2267_v35 = vld [vmem:[%s3926_s3 + $0xb0] sm:$0xf0]  ;;  %v2273_v39 = vld [vmem:[%s3926_s3 + $0xa8] sm:$0xf]  ;;  %v2950_v43 = vor.u32 %v2467_v29, %v2265_v28 }
  0x2e   :  { %373 = vmatpush.bf16.msra.mxu3 %v2891_v3  ;;  %4054 = vst [vmem:[#allocation23_spill] sm:$0xff] %v2932_v32  ;;  %v2468_v40 = vld [vmem:[%s3926_s3 + $0xb4] sm:$0xf0]  ;;  %v2466_v44 = vld [vmem:[%s3926_s3 + $0xac] sm:$0xf]  ;;  %v2959_v49 = vor.u32 %v2465_v33, %v2267_v35 }
  0x2f   :  { %4055 = vst [vmem:[#allocation24_spill] sm:$0xff] %v2941_v37  ;;  %335 = vmatmul.bf16.vlgmr.msra.gmra.mxu0 %v166_v18  ;;  %348 = vmatmul.bf16.vlgmr.msra.gmra.mxu1 %v166_v18  ;;  %v2275_v46 = vld [vmem:[%s3926_s3 + $0xb8] sm:$0xf0]  ;;  %v2249_v50 = vld [vmem:[%s3926_s3 + $0x80] sm:$0xf]  ;;  %v2968_v56 = vor.u32 %v2468_v40, %v2273_v39 }
  0x30   :  { %539 = vmatpush.bf16.msrb.mxu0 %v2868_v55  ;;  %552 = vmatpush.bf16.msrb.mxu1 %v2882_v62  ;;  %4056 = vst [vmem:[#allocation25_spill] sm:$0xff] %v2950_v43  ;;  %v2463_v52 = vld [vmem:[%s3926_s3 + $0x8c] sm:$0xf0]  ;;  %v2461_v58 = vld [vmem:[%s3926_s3 + $0x84] sm:$0xf]  ;;  %v2977_v0 = vor.u32 %v2466_v44, %v2275_v46 }
  0x31   :  { %565 = vmatpush.bf16.msrb.mxu2 %v2893_v5  ;;  %4057 = vst [vmem:[#allocation26_spill] sm:$0xff] %v2959_v49  ;;  %374 = vmatmul.bf16.vlgmr.msra.gmra.mxu3 %v166_v18  ;;  %v2251_v59 = vld [vmem:[%s3926_s3 + $0x90] sm:$0xf0]  ;;  %v2257_v1 = vld [vmem:[%s3926_s3 + $0x88] sm:$0xf]  ;;  %v2986_v9 = vor.u32 %v2463_v52, %v2249_v50 }
  0x32   :  { %578 = vmatpush.bf16.msrb.mxu3 %v2902_v11  ;;  %4058 = vst [vmem:[#allocation27_spill] sm:$0xff] %v2968_v56  ;;  %v2464_v7 = vld [vmem:[%s3926_s3 + $0x94] sm:$0xf0]  ;;  %361 = vmatmul.bf16.vlgmr.msra.gmra.mxu2 %v166_v18  ;;  %v2462_v13 = vld [vmem:[%s3926_s3 + $0x8c] sm:$0xf]  ;;  %v2995_v22 = vor.u32 %v2461_v58, %v2251_v59 }
  0x33   :  { %4059 = vst [vmem:[#allocation28_spill] sm:$0xff] %v2977_v0  ;;  %v2259_v15 = vld [vmem:[%s3926_s3 + $0x98] sm:$0xf0]  ;;  %v2233_v18 = vld [vmem:[%s3926_s3 + $0x60] sm:$0xf]  ;;  %v3004_v28 = vor.u32 %v2464_v7, %v2257_v1 }
  0x34   :  { %540 = vmatpush.bf16.msrb.mxu0 %v2912_v20  ;;  %553 = vmatpush.bf16.msrb.mxu1 %v2922_v27  ;;  %4060 = vst [vmem:[#allocation29_spill] sm:$0xff] %v2986_v9  ;;  %v2459_v23 = vld [vmem:[%s3926_s3 + $0x6c] sm:$0xf0]  ;;  %v2457_v29 = vld [vmem:[%s3926_s3 + $0x64] sm:$0xf]  ;;  %v3013_v35 = vor.u32 %v2462_v13, %v2259_v15 }
  0x35   :  { %566 = vmatpush.bf16.msrb.mxu2 %v2932_v32  ;;  %4061 = vst [vmem:[#allocation30_spill] sm:$0xff] %v2995_v22  ;;  %v2235_v33 = vld [vmem:[%s3926_s3 + $0x70] sm:$0xf0]  ;;  %v2241_v39 = vld [vmem:[%s3926_s3 + $0x68] sm:$0xf]  ;;  %v3022_v44 = vor.u32 %v2459_v23, %v2233_v18 }
  0x36   :  { %579 = vmatpush.bf16.msrb.mxu3 %v2941_v37  ;;  %4062 = vst [vmem:[#allocation31_spill] sm:$0xff] %v3004_v28  ;;  %v2460_v40 = vld [vmem:[%s3926_s3 + $0x74] sm:$0xf0]  ;;  %v2458_v46 = vld [vmem:[%s3926_s3 + $0x6c] sm:$0xf]  ;;  %v3031_v52 = vor.u32 %v2457_v29, %v2235_v33 }
  0x37   :  { %4063 = vst [vmem:[#allocation32_spill] sm:$0xff] %v3013_v35  ;;  %v2243_v50 = vld [vmem:[%s3926_s3 + $0x78] sm:$0xf0]  ;;  %v2217_v58 = vld [vmem:[%s3926_s3 + $0x40] sm:$0xf]  ;;  %v3040_v1 = vor.u32 %v2460_v40, %v2241_v39 }
  0x38   :  { %541 = vmatpush.bf16.msrb.mxu0 %v2950_v43  ;;  %554 = vmatpush.bf16.msrb.mxu1 %v2959_v49  ;;  %4064 = vst [vmem:[#allocation33_spill] sm:$0xff] %v3022_v44  ;;  %v2455_v59 = vld [vmem:[%s3926_s3 + $0x4c] sm:$0xf0]  ;;  %v2453_v7 = vld [vmem:[%s3926_s3 + $0x44] sm:$0xf]  ;;  %v3049_v15 = vor.u32 %v2458_v46, %v2243_v50 }
  0x39   :  { %567 = vmatpush.bf16.msrb.mxu2 %v2968_v56  ;;  %4065 = vst [vmem:[#allocation34_spill] sm:$0xff] %v3031_v52  ;;  %v2219_v13 = vld [vmem:[%s3926_s3 + $0x50] sm:$0xf0]  ;;  %v2225_v18 = vld [vmem:[%s3926_s3 + $0x48] sm:$0xf]  ;;  %v3058_v29 = vor.u32 %v2455_v59, %v2217_v58 }
  0x3a   :  { %580 = vmatpush.bf16.msrb.mxu3 %v2977_v0  ;;  %4066 = vst [vmem:[#allocation35_spill] sm:$0xff] %v3040_v1  ;;  %v2456_v23 = vld [vmem:[%s3926_s3 + $0x54] sm:$0xf0]  ;;  %v2454_v33 = vld [vmem:[%s3926_s3 + $0x4c] sm:$0xf]  ;;  %v3067_v40 = vor.u32 %v2453_v7, %v2219_v13 }
  0x3b   :  { %4067 = vst [vmem:[#allocation36_spill] sm:$0xff] %v3049_v15  ;;  %v2227_v39 = vld [vmem:[%s3926_s3 + $0x58] sm:$0xf0]  ;;  %v2201_v46 = vld [vmem:[%s3926_s3 + $0x20] sm:$0xf]  ;;  %v3076_v58 = vor.u32 %v2456_v23, %v2225_v18 }
  0x3c   :  { %542 = vmatpush.bf16.msrb.mxu0 %v2986_v9  ;;  %555 = vmatpush.bf16.msrb.mxu1 %v2995_v22  ;;  %4068 = vst [vmem:[#allocation37_spill] sm:$0xff] %v3058_v29  ;;  %v2451_v50 = vld [vmem:[%s3926_s3 + $0x2c] sm:$0xf0]  ;;  %v2449_v59 = vld [vmem:[%s3926_s3 + $0x24] sm:$0xf]  ;;  %v3085_v13 = vor.u32 %v2454_v33, %v2227_v39 }
  0x3d   :  { %568 = vmatpush.bf16.msrb.mxu2 %v3004_v28  ;;  %4069 = vst [vmem:[#allocation38_spill] sm:$0xff] %v3067_v40  ;;  %v2203_v7 = vld [vmem:[%s3926_s3 + $0x30] sm:$0xf0]  ;;  %v2452_v18 = vld [vmem:[%s3926_s3 + $0x34] sm:$0xf0]  ;;  %v3094_v23 = vor.u32 %v2451_v50, %v2201_v46 }
  0x3e   :  { %581 = vmatpush.bf16.msrb.mxu3 %v3013_v35  ;;  %4070 = vst [vmem:[#allocation39_spill] sm:$0xff] %v3076_v58  ;;  %v2209_v35 = vld [vmem:[%s3926_s3 + $0x28] sm:$0xf]  ;;  %v2450_v0 = vld [vmem:[%s3926_s3 + $0x2c] sm:$0xf]  ;;  %v3103_v39 = vor.u32 %v2449_v59, %v2203_v7 }
  0x3f   :  { %4071 = vst [vmem:[#allocation40_spill] sm:$0xff] %v3085_v13  ;;  %v2211_v33 = vld [vmem:[%s3926_s3 + $0x38] sm:$0xf0]  ;;  %v2185_v50 = vld [vmem:[%s3926_s3] sm:$0xf] }
  0x40   :  { %543 = vmatpush.bf16.msrb.mxu0 %v3022_v44  ;;  %556 = vmatpush.bf16.msrb.mxu1 %v3031_v52  ;;  %4072 = vst [vmem:[#allocation41_spill] sm:$0xff] %v3094_v23  ;;  %v3109_v46 = vor.u32 %v2450_v0, %v2211_v33  ;;  %v2445_v0 = vld [vmem:[%s3926_s3 + $0x4] sm:$0xf]  ;;  %v2187_v7 = vld [vmem:[%s3926_s3 + $0x10] sm:$0xf0] }
  0x41   :  { %569 = vmatpush.bf16.msrb.mxu2 %v3040_v1  ;;  %4073 = vst [vmem:[#allocation42_spill] sm:$0xff] %v3103_v39  ;;  %v2448_v33 = vld [vmem:[%s3926_s3 + $0x14] sm:$0xf0]  ;;  %s745_s19 = scalar_select %p742_p0, 1, 0 }
  0x42   :  { %582 = vmatpush.bf16.msrb.mxu3 %v3049_v15  ;;  %v3106_v15 = vor.u32 %v2452_v18, %v2209_v35  ;;  %4075 = vst [vmem:[#allocation44_spill] sm:$0xff] %v3109_v46  ;;  %v2447_v35 = vld [vmem:[%s3926_s3 + $0xc] sm:$0xf0]  ;;  %v2193_v18 = vld [vmem:[%s3926_s3 + $0x8] sm:$0xf] }
  0x43   :  { %v3124_v59 = vor.u32 %v2447_v35, %v2185_v50  ;;  %v2446_v50 = vld [vmem:[%s3926_s3 + $0xc] sm:$0xf]  ;;  %v2195_v35 = vld [vmem:[%s3926_s3 + $0x18] sm:$0xf0]  ;;  %s966_s24 = scalar_select %p963_p1, 1, 0 }
  0x44   :  { %544 = vmatpush.bf16.msrb.mxu0 %v3058_v29  ;;  %557 = vmatpush.bf16.msrb.mxu1 %v3067_v40  ;;  %4074 = vst [vmem:[#allocation43_spill] sm:$0xff] %v3106_v15  ;;  %v3146_v37 = vor.u32 %v2446_v50, %v2195_v35  ;;  %s1408_s27 = scalar_select %p1405_p3, 1, 0 }
  0x45   :  { %570 = vmatpush.bf16.msrb.mxu2 %v3076_v58  ;;  %4076 = vst [vmem:[#allocation45_spill] sm:$0xff] %v3124_v59  ;;  %s1629_s11 = scalar_select %p1626_p4, 1, 0 }
  0x46   :  { %583 = vmatpush.bf16.msrb.mxu3 %v3085_v13  ;;  %v3137_v13 = vor.u32 %v2448_v33, %v2193_v18  ;;  %v3944_v33 = vmov 1.0|1.0  }
  0x48   :  { %545 = vmatpush.bf16.msrb.mxu0 %v3094_v23  ;;  %558 = vmatpush.bf16.msrb.mxu1 %v3103_v39  ;;  %4078 = vst [vmem:[#allocation47_spill] sm:$0xff] %v3137_v13 }
  0x49   :  { %571 = vmatpush.bf16.msrb.mxu2 %v3106_v15 }
  0x4a   :  { %584 = vmatpush.bf16.msrb.mxu3 %v3109_v46  ;;  %v3135_v46 = vor.u32 %v2445_v0, %v2187_v7  ;;  %v152_v0 = vlaneseq }
  0x4c   :  { %4077 = vst [vmem:[#allocation46_spill] sm:$0xff] %v3135_v46  ;;  %546 = vmatpush.bf16.msrb.mxu0 %v3124_v59  ;;  %559 = vmatpush.bf16.msrb.mxu1 %v3135_v46  ;;  %v3172_v7 = vand.u32 127, %v152_v0 }
  0x4d   :  { %572 = vmatpush.bf16.msrb.mxu2 %v3137_v13 }
  0x4e   :  { %585 = vmatpush.bf16.msrb.mxu3 %v3146_v37  ;;  %4079 = vst [vmem:[#allocation48_spill] sm:$0xff] %v3172_v7  ;;  %vm154_vm14 = vcmp.lt.s32.totalorder %v3172_v7, 32 }
  0x50   :  { %756 = vmatpush.bf16.msra.mxu1 %v2761_v4 }
  0x51   :  { %769 = vmatpush.bf16.msra.mxu2 %v2766_v8 }
  0x52   :  { %782 = vmatpush.bf16.msra.mxu3 %v2769_v12 }
  0x54   :  { %757 = vmatpush.bf16.msra.mxu1 %v2774_v17 }
  0x55   :  { %770 = vmatpush.bf16.msra.mxu2 %v2777_v21 }
  0x56   :  { %783 = vmatpush.bf16.msra.mxu3 %v2780_v25 }
  0x58   :  { %758 = vmatpush.bf16.msra.mxu1 %v2785_v30 }
  0x59   :  { %771 = vmatpush.bf16.msra.mxu2 %v2788_v34 }
  0x5a   :  { %784 = vmatpush.bf16.msra.mxu3 %v2791_v38 }
  0x5c   :  { %759 = vmatpush.bf16.msra.mxu1 %v2797_v45 }
  0x5d   :  { %772 = vmatpush.bf16.msra.mxu2 %v2800_v48 }
  0x5e   :  { %785 = vmatpush.bf16.msra.mxu3 %v2803_v51 }
  0x60   :  { %760 = vmatpush.bf16.msra.mxu1 %v2809_v57 }
  0x61   :  { %773 = vmatpush.bf16.msra.mxu2 %v2812_v60 }
  0x62   :  { %786 = vmatpush.bf16.msra.mxu3 %v2815_v63 }
  0x64   :  { %761 = vmatpush.bf16.msra.mxu1 %v2821_v6 }
  0x65   :  { %774 = vmatpush.bf16.msra.mxu2 %v2824_v10 }
  0x66   :  { %787 = vmatpush.bf16.msra.mxu3 %v2827_v14 }
  0x68   :  { %762 = vmatpush.bf16.msra.mxu1 %v2833_v24 }
  0x69   :  { %775 = vmatpush.bf16.msra.mxu2 %v2836_v31 }
  0x6a   :  { %788 = vmatpush.bf16.msra.mxu3 %v2839_v36 }
  0x6c   :  { %763 = vmatpush.bf16.msra.mxu1 %v2857_v47 }
  0x6d   :  { %776 = vmatpush.bf16.msra.mxu2 %v2866_v53 }
  0x6e   :  { %789 = vmatpush.bf16.msra.mxu3 %v2880_v61 }
  0x80   :  { %v160_v18 = vpop.permute.xlu0 %159 }
  0x81   :  { %vm161_vm0 = vcmp.eq.s32.totalorder %v3172_v7, %v160_v18 }
  0x82   :  { %vm2311_vm1 = vmpackc.low %vm161_vm0, %vm161_vm0 }
  0x83   :  { %2312 = vmatmul.msk.bf16.vlgmr.msrb.gmra.mxu0 %vm2311_vm1, %v3944_v33  ;;  %2314 = vmatmul.msk.bf16.vlgmr.msrb.gmra.mxu1 %vm2311_vm1, %v3944_v33 }
  0x84   :  { %2316 = vmatmul.msk.bf16.vlgmr.msrb.gmra.mxu2 %vm2311_vm1, %v3944_v33  ;;  %2318 = vmatmul.msk.bf16.vlgmr.msrb.gmra.mxu3 %vm2311_vm1, %v3944_v33 }
  0x85   :  { %808 = vmatpush.bf16.msrb.mxu1 %v2868_v55  ;;  %821 = vmatpush.bf16.msrb.mxu2 %v2882_v62 }
  0x86   :  { %834 = vmatpush.bf16.msrb.mxu3 %v2893_v5 }
  0x89   :  { %809 = vmatpush.bf16.msrb.mxu1 %v2912_v20  ;;  %822 = vmatpush.bf16.msrb.mxu2 %v2922_v27 }
  0x8a   :  { %835 = vmatpush.bf16.msrb.mxu3 %v2932_v32 }
  0x8d   :  { %810 = vmatpush.bf16.msrb.mxu1 %v2950_v43  ;;  %823 = vmatpush.bf16.msrb.mxu2 %v2959_v49 }
  0x8e   :  { %836 = vmatpush.bf16.msrb.mxu3 %v2968_v56 }
  0x91   :  { %811 = vmatpush.bf16.msrb.mxu1 %v2986_v9  ;;  %824 = vmatpush.bf16.msrb.mxu2 %v2995_v22 }
  0x92   :  { %837 = vmatpush.bf16.msrb.mxu3 %v3004_v28 }
  0x95   :  { %812 = vmatpush.bf16.msrb.mxu1 %v3022_v44  ;;  %825 = vmatpush.bf16.msrb.mxu2 %v3031_v52  ;;  %v3258_v44 = vld [vmem:[%s3929_s6] sm:$0xff] }
  0x96   :  { %838 = vmatpush.bf16.msrb.mxu3 %v3040_v1 }
  0x99   :  { %813 = vmatpush.bf16.msrb.mxu1 %v3058_v29  ;;  %826 = vmatpush.bf16.msrb.mxu2 %v3067_v40 }
  0x9a   :  { %839 = vmatpush.bf16.msrb.mxu3 %v3076_v58 }
  0x9d   :  { %814 = vmatpush.bf16.msrb.mxu1 %v3094_v23  ;;  %827 = vmatpush.bf16.msrb.mxu2 %v3103_v39  ;;  %v3209_v39 = vld [vmem:[%s3929_s6 + $0x38] sm:$0xff] }
  0x9e   :  { %840 = vmatpush.bf16.msrb.mxu3 %v3106_v15  ;;  %707 = vmatpush.bf16.msra.mxu0 %v3209_v39 }
  0xa1   :  { %815 = vmatpush.bf16.msrb.mxu1 %v3124_v59  ;;  %828 = vmatpush.bf16.msrb.mxu2 %v3135_v46  ;;  %v3215_v46 = vld [vmem:[%s3929_s6 + $0x30] sm:$0xff]  ;;  %v3248_v59 = vld [vmem:[%s3929_s6 + $0x8] sm:$0xff] }
  0xa2   :  { %841 = vmatpush.bf16.msrb.mxu3 %v3137_v13  ;;  %708 = vmatpush.bf16.msra.mxu0 %v3215_v46  ;;  %v138_v13 = vld [vmem:[%s3928_s5] sm:$0xf] }
  0xa3   :  { %v3251_v15 = vperm.slane %v138_v13, 0  ;;  %v3253_v23 = vperm.slane %v138_v13, 1  ;;  %v3264_v32 = vperm.slane %v138_v13, 3 }
  0xa5   :  { %4080 = vst [vmem:[#allocation49_spill] sm:$0xff] %v3251_v15 }
  0xa6   :  { %4081 = vst [vmem:[#allocation50_spill] sm:$0xff] %v3253_v23 }
  0xa7   :  { %4082 = vst [vmem:[#allocation51_spill] sm:$0xff] %v3264_v32 }
  0xac   :  { %v336_v50 = vpop.f32.mrf.mxu0  ;;  %v349_v35 = vpop.f32.mrf.mxu1 }
  0xb4   :  { %v338_v0 = vpop.f32.mrf.mxu0  ;;  %v375_v18 = vpop.f32.mrf.mxu3 }
  0xb5   :  { %v351_v33 = vpop.f32.mrf.mxu1  ;;  %v362_v40 = vpop.f32.mrf.mxu2  ;;  %v3239_v0 = vld [vmem:[%s3929_s6 + $0x10] sm:$0xff] }
  0xb6   :  { %v3221_v33 = vld [vmem:[%s3929_s6 + $0x28] sm:$0xff] }
  0xb7   :  { %709 = vmatpush.bf16.msra.mxu0 %v3221_v33 }
  0xbc   :  { %v377_v29 = vpop.f32.mrf.mxu3 }
  0xbd   :  { %v364_v58 = vpop.f32.mrf.mxu2  ;;  %v3227_v29 = vld [vmem:[%s3929_s6 + $0x20] sm:$0xff] }
  0xbe   :  { %710 = vmatpush.bf16.msra.mxu0 %v3227_v29  ;;  %v3233_v58 = vld [vmem:[%s3929_s6 + $0x18] sm:$0xff] }
  0xc2   :  { %711 = vmatpush.bf16.msra.mxu0 %v3233_v58 }
  0xc6   :  { %712 = vmatpush.bf16.msra.mxu0 %v3239_v0 }
  0xca   :  { %713 = vmatpush.bf16.msra.mxu0 %v3248_v59 }
  0xce   :  { %714 = vmatpush.bf16.msra.mxu0 %v3258_v44 }
  0xd2   :  { %795 = vmatpush.bf16.msrb.mxu0 %v2772_v16 }
  0xd6   :  { %796 = vmatpush.bf16.msrb.mxu0 %v2782_v26 }
  0xda   :  { %797 = vmatpush.bf16.msrb.mxu0 %v2794_v42 }
  0xde   :  { %798 = vmatpush.bf16.msrb.mxu0 %v2806_v54 }
  0xe2   :  { %799 = vmatpush.bf16.msrb.mxu0 %v2818_v2 }
  0xe6   :  { %800 = vmatpush.bf16.msrb.mxu0 %v2830_v19 }
  0xea   :  { %801 = vmatpush.bf16.msrb.mxu0 %v2848_v41 }
  0xee   :  { %802 = vmatpush.bf16.msrb.mxu0 %v2891_v3 }
 0x100   :  { %v548_v1 = vpop.f32.mrf.mxu0  ;;  %v561_v52 = vpop.f32.mrf.mxu1 }
 0x101   :  { %v549_v28 = vadd.f32 %v548_v1, %v336_v50  ;;  %v562_v22 = vadd.f32 %v561_v52, %v349_v35 }
 0x103   :  { %v591_v9 = vadd.f32 %v549_v28, %v3251_v15  ;;  %v592_v56 = vadd.f32 %v562_v22, %v3253_v23 }
 0x105   :  { %v2319_v49 = vmul.f32 -1.442695, %v591_v9  ;;  %v2320_v43 = vmul.f32 -1.442695, %v592_v56 }
 0x107   :  { %2529 = vpow2.f32 %v2319_v49  ;;  %v574_v27 = vpop.f32.mrf.mxu2  ;;  %v587_v20 = vpop.f32.mrf.mxu3 }
 0x108   :  { %2531 = vpow2.f32 %v2320_v43  ;;  %v588_v1 = vadd.f32 %v587_v20, %v375_v18  ;;  %v550_v52 = vpop.f32.mrf.mxu0  ;;  %v563_v50 = vpop.f32.mrf.mxu1  ;;  %v3270_v43 = vperm.slane %v138_v13, 2  ;;  %v575_v20 = vadd.f32 %v574_v27, %v362_v40 }
 0x10a   :  { %v594_v35 = vadd.f32 %v588_v1, %v3264_v32  ;;  %4083 = vst [vmem:[#allocation52_spill] sm:$0xff] %v3270_v43  ;;  %v593_v50 = vadd.f32 %v575_v20, %v3270_v43 }
 0x10c   :  { %v2321_v22 = vmul.f32 -1.442695, %v594_v35 }
 0x10d   :  { %v2530_v28 = vpop.eup %2529 }
 0x10e   :  { %v2532_v23 = vpop.eup %2531  ;;  %v598_v9 = vadd.f32 1.0, %v2530_v28  ;;  %2533 = vpow2.f32 %v2321_v22 }
 0x10f   :  { %v617_v56 = vadd.f32 1.0, %v2532_v23  ;;  %v576_v15 = vpop.f32.mrf.mxu2  ;;  %v589_v49 = vpop.f32.mrf.mxu3 }
 0x110   :  { %2535 = vrcp.f32 %v598_v9  ;;  %v610_v49 = vand.u32 2147483648, %v598_v9  ;;  %v608_v27 = vand.u32 2147483647, %v598_v9  ;;  %vm604_vm4 = vweird.f32 %v598_v9 }
 0x111   :  { %2537 = vrcp.f32 %v617_v56  ;;  %v629_v13 = vand.u32 2147483648, %v617_v56  ;;  %vm623_vm5 = vweird.f32 %v617_v56 }
 0x112   :  { %v611_v19 = vor.u32 1.1754944e-38, %v610_v49  ;;  %vm609_vm7 = vcmp.eq.f32.partialorder %v608_v27, 8.507059e+37 }
 0x114   :  { %v2534_v18 = vpop.eup %2533 }
 0x115   :  { %v637_v1 = vadd.f32 1.0, %v2534_v18  ;;  %v627_v18 = vand.u32 2147483647, %v617_v56 }
 0x116   :  { %v2536_v52 = vpop.eup %2535 }
 0x117   :  { %v2538_v35 = vpop.eup %2537  ;;  %v600_v28 = vmul.f32 %v2536_v52, %v598_v9  ;;  %2539 = vrcp.f32 %v637_v1  ;;  %vm605_vm2 = vweird.f32 %v2536_v52  ;;  %vm628_vm9 = vcmp.eq.f32.partialorder %v627_v18, 8.507059e+37  ;;  %v4089_v18 = vld [vmem:[#allocation44_spill] sm:$0xff] }
 0x118   :  { %v619_v15 = vmul.f32 %v2538_v35, %v617_v56  ;;  %2541 = vtanh.f32 %v593_v50  ;;  %vm624_vm3 = vweird.f32 %v2538_v35  ;;  %vm606_vm6 = vmor %vm604_vm4, %vm605_vm2  ;;  %vm643_vm11 = vweird.f32 %v637_v1 }
 0x119   :  { %v601_v23 = vsub.f32 1.0, %v600_v28  ;;  %vm625_vm8 = vmor %vm623_vm5, %vm624_vm3 }
 0x11a   :  { %v620_v22 = vsub.f32 1.0, %v619_v15  ;;  %v630_v15 = vor.u32 1.1754944e-38, %v629_v13 }
 0x11b   :  { %v602_v32 = vmul.f32 %v2536_v52, %v601_v23 }
 0x11c   :  { %v621_v40 = vmul.f32 %v2538_v35, %v620_v22 }
 0x11d   :  { %v2540_v20 = vpop.eup %2539  ;;  %v603_v43 = vadd.f32 %v2536_v52, %v602_v32 }
 0x11e   :  { %v622_v2 = vadd.f32 %v2538_v35, %v621_v40  ;;  %v639_v28 = vmul.f32 %v2540_v20, %v637_v1  ;;  %v2542_v50 = vpop.eup %2541  ;;  %vm644_vm10 = vweird.f32 %v2540_v20  ;;  %v4088_v40 = vld [vmem:[#allocation40_spill] sm:$0xff] }
 0x11f   :  { %v607_v54 = vsel %vm606_vm6, %v2536_v52, %v603_v43  ;;  %v649_v43 = vand.u32 2147483648, %v637_v1  ;;  %v647_v52 = vand.u32 2147483647, %v637_v1  ;;  %vm645_vm12 = vmor %vm643_vm11, %vm644_vm10  ;;  %v4086_v1 = vld [vmem:[#allocation32_spill] sm:$0xff] }
 0x120   :  { %v612_v23 = vsel %vm609_vm7, %v611_v19, %v607_v54  ;;  %v626_v41 = vsel %vm625_vm8, %v2538_v35, %v622_v2  ;;  %v640_v22 = vsub.f32 1.0, %v639_v28  ;;  %v4087_v35 = vld [vmem:[#allocation36_spill] sm:$0xff] }
 0x121   :  { %v631_v42 = vsel %vm628_vm9, %v630_v15, %v626_v41  ;;  %v654_v26 = vmul.f32 %v2542_v50, %v612_v23  ;;  %v650_v27 = vor.u32 1.1754944e-38, %v649_v43  ;;  %vm648_vm13 = vcmp.eq.f32.partialorder %v647_v52, 8.507059e+37 }
 0x122   :  { %v653_v32 = vmul.f32 0.0, %v631_v42  ;;  %v641_v9 = vmul.f32 %v2540_v20, %v640_v22  ;;  %v4085_v42 = vld [vmem:[#allocation28_spill] sm:$0xff]  ;;  %v2706_v50 = vmov -1e+30  }
 0x123   :  { %v3328_v23 = vsel %vm154_vm14, 0.0, %v2706_v50 }
 0x124   :  { %v3277_v56 = vadd.f32 %v654_v26, %v653_v32  ;;  %v642_v49 = vadd.f32 %v2540_v20, %v641_v9  ;;  %v4084_v26 = vld [vmem:[#allocation24_spill] sm:$0xff]  ;;  %4091 = vst [vmem:[#allocation28_spill] sm:$0xff] %v3328_v23 }
 0x126   :  { %2543 = vtanh.f32 %v3277_v56  ;;  %v646_v13 = vsel %vm645_vm12, %v2540_v20, %v642_v49  ;;  %v3323_v20 = vld [vmem:[%s3930_s7] ss:$0 sm:$0xff] }
 0x127   :  { %v651_v2 = vsel %vm648_vm13, %v650_v27, %v646_v13  ;;  %4090 = vst [vmem:[#allocation24_spill] sm:$0xff] %v3323_v20 }
 0x12c   :  { %v2544_v54 = vpop.eup %2543 }
 0x12d   :  { %v657_v19 = vmul.f32 %v2544_v54, %v651_v2 }
 0x12f   :  { %v658_v41 = vpack.c.bf16 %v657_v19, %v657_v19 }
 0x131   :  { %715 = vmatmul.bf16.vlgmr.msra.gmra.mxu0 %v658_v41  ;;  %764 = vmatmul.bf16.vlgmr.msra.gmra.mxu1 %v658_v41 }
 0x132   :  { %777 = vmatmul.bf16.vlgmr.msra.gmra.mxu2 %v658_v41  ;;  %790 = vmatmul.bf16.vlgmr.msra.gmra.mxu3 %v658_v41 }
 0x133   :  { %847 = vmatpush.bf16.msra.mxu0 %v2902_v11  ;;  %928 = vmatpush.bf16.msra.mxu1 %v3209_v39 }
 0x134   :  { %977 = vmatpush.bf16.msra.mxu2 %v2761_v4  ;;  %990 = vmatpush.bf16.msra.mxu3 %v2766_v8 }
 0x137   :  { %848 = vmatpush.bf16.msra.mxu0 %v4084_v26  ;;  %929 = vmatpush.bf16.msra.mxu1 %v3215_v46 }
 0x138   :  { %978 = vmatpush.bf16.msra.mxu2 %v2774_v17  ;;  %991 = vmatpush.bf16.msra.mxu3 %v2777_v21 }
 0x13b   :  { %849 = vmatpush.bf16.msra.mxu0 %v4085_v42  ;;  %930 = vmatpush.bf16.msra.mxu1 %v3221_v33 }
 0x13c   :  { %979 = vmatpush.bf16.msra.mxu2 %v2785_v30  ;;  %992 = vmatpush.bf16.msra.mxu3 %v2788_v34 }
 0x13f   :  { %850 = vmatpush.bf16.msra.mxu0 %v4086_v1  ;;  %931 = vmatpush.bf16.msra.mxu1 %v3227_v29 }
 0x140   :  { %980 = vmatpush.bf16.msra.mxu2 %v2797_v45  ;;  %993 = vmatpush.bf16.msra.mxu3 %v2800_v48 }
 0x141   :  { %803 = vmatmul.bf16.vlgmr.msrb.gmra.mxu0 %v658_v41 }
 0x143   :  { %851 = vmatpush.bf16.msra.mxu0 %v4087_v35  ;;  %932 = vmatpush.bf16.msra.mxu1 %v3233_v58 }
 0x144   :  { %981 = vmatpush.bf16.msra.mxu2 %v2809_v57  ;;  %994 = vmatpush.bf16.msra.mxu3 %v2812_v60 }
 0x147   :  { %852 = vmatpush.bf16.msra.mxu0 %v4088_v40  ;;  %933 = vmatpush.bf16.msra.mxu1 %v3239_v0 }
 0x148   :  { %982 = vmatpush.bf16.msra.mxu2 %v2821_v6  ;;  %995 = vmatpush.bf16.msra.mxu3 %v2824_v10 }
 0x14b   :  { %853 = vmatpush.bf16.msra.mxu0 %v4089_v18  ;;  %934 = vmatpush.bf16.msra.mxu1 %v3248_v59 }
 0x14c   :  { %983 = vmatpush.bf16.msra.mxu2 %v2833_v24  ;;  %996 = vmatpush.bf16.msra.mxu3 %v2836_v31 }
 0x14f   :  { %854 = vmatpush.bf16.msra.mxu0 %v3146_v37  ;;  %935 = vmatpush.bf16.msra.mxu1 %v3258_v44 }
 0x150   :  { %984 = vmatpush.bf16.msra.mxu2 %v2857_v47  ;;  %997 = vmatpush.bf16.msra.mxu3 %v2866_v53 }
 0x153   :  { %1003 = vmatpush.bf16.msrb.mxu0 %v2769_v12 }
 0x157   :  { %1004 = vmatpush.bf16.msrb.mxu0 %v2780_v25 }
 0x15b   :  { %1005 = vmatpush.bf16.msrb.mxu0 %v2791_v38 }
 0x15f   :  { %1006 = vmatpush.bf16.msrb.mxu0 %v2803_v51 }
 0x163   :  { %1007 = vmatpush.bf16.msrb.mxu0 %v2815_v63 }
 0x167   :  { %1008 = vmatpush.bf16.msrb.mxu0 %v2827_v14 }
 0x16b   :  { %1009 = vmatpush.bf16.msrb.mxu0 %v2839_v36 }
 0x16f   :  { %1010 = vmatpush.bf16.msrb.mxu0 %v2880_v61 }
 0x1ae   :  { %v716_v28 = vpop.f32.mrf.mxu0  ;;  %v3326_v15 = vpop.f32.mrf.mxu1 }
 0x1af   :  { %v717_v22 = vadd.f32 %v3323_v20, %v716_v28 }
 0x1b1   :  { %2354 = vst [vmem:[%s3931_s8 + $0x8] sm:$0xff] %v717_v22  ;;  %v722_v32 = vadd.f32 %v717_v22, %v3328_v23 }
 0x1b3   :  { %723 = vmax.xlane.f32.xlu0 %v722_v32 }
 0x1b5   :  { %v3335_v9 = vpop.f32.mrf.mxu2  ;;  %v3337_v49 = vpop.f32.mrf.mxu3 }
 0x1b6   :  { %v718_v43 = vpop.f32.mrf.mxu0  ;;  %v767_v52 = vpop.f32.mrf.mxu1 }
 0x1b7   :  { %v746_v52 = vstv %s745_s19  ;;  %s2385_s19 = sld [smem:[#allocation2 + $0x3]] }
 0x1b8   :  { %vm747_vm1 = vcmp.eq.s32.totalorder %v746_v52, 1  ;;  %v4098_v52 = vld [vmem:[#allocation25_spill] sm:$0xff] }
 0x1bd   :  { %v780_v13 = vpop.f32.mrf.mxu2  ;;  %v793_v27 = vpop.f32.mrf.mxu3  ;;  %p1184_p2 = scmp.gt.s32.totalorder %s2385_s19, 0 }
 0x1be   :  { %v3339_v54 = vpop.f32.mrf.mxu0 }
 0x1bf   :  { %s1187_s20 = scalar_select %p1184_p2, 1, 0 }
 0x1c6   :  { %v806_v2 = vpop.f32.mrf.mxu0 }
 0x226   :  { %v724_v19 = vpop.xlane.xlu0 %723 }
 0x227   :  { %vm725_vm15 = vcmp.eq.f32.partialorder %v722_v32, %v724_v19  ;;  %v2356_v32 = vld [vmem:[%s3924_s1 + $0x8] sm:$0xff] }
 0x228   :  { %v726_v41 = vsel %vm725_vm15, %v3172_v7, 128 }
 0x229   :  { %v728_v28 = vshra.s32 %v726_v41, 16  ;;  %v727_v22 = vand.u32 65535, %v726_v41 }
 0x22b   :  { %v730_v50 = vcvt.s32.f32 %v728_v28  ;;  %v729_v20 = vcvt.s32.f32 %v727_v22  ;;  %v4096_v22 = vld [vmem:[#allocation23_spill] sm:$0xff] }
 0x22d   :  { %731 = vmin.xlane.f32.xlu1 %v730_v50 }
 0x2a0   :  { %v732_v23 = vpop.xlane.xlu1 %731 }
 0x2a1   :  { %vm733_vm0 = vcmp.eq.f32.partialorder %v730_v50, %v732_v23  ;;  %v738_v43 = vcvt.f32.s32 %v732_v23  ;;  %v4094_v23 = vld [vmem:[#allocation21_spill] sm:$0xff]  ;;  %v4095_v50 = vld [vmem:[#allocation22_spill] sm:$0xff] }
 0x2a2   :  { %v734_v61 = vsel %vm733_vm0, %v729_v20, inf  ;;  %v4093_v20 = vld [vmem:[#allocation9_spill] sm:$0xff] }
 0x2a3   :  { %735 = vmin.xlane.f32.xlu1 %v734_v61  ;;  %v739_v27 = vshll.u32 %v738_v43, 16  ;;  %v4092_v61 = vmov 1.0|1.0   ;;  %v4097_v43 = vld [vmem:[#allocation10_spill] sm:$0xff] }
 0x316   :  { %v736_v13 = vpop.xlane.xlu1 %735 }
 0x317   :  { %v737_v2 = vcvt.f32.s32 %v736_v13  ;;  %v4099_v13 = vld [vmem:[#allocation26_spill] sm:$0xff] }
 0x319   :  { %v740_v19 = vadd.s32 %v739_v27, %v737_v2  ;;  %v4100_v27 = vld [vmem:[#allocation27_spill] sm:$0xff] }
 0x31a   :  { %v4101_v2 = vld [vmem:[#allocation11_spill] sm:$0xff] }
 0x31b   :  { %v748_v41 = vsel %vm747_vm1, %v2356_v32, %v740_v19  ;;  %v4102_v32 = vld [vmem:[#allocation29_spill] sm:$0xff]  ;;  %v4103_v19 = vld [vmem:[#allocation30_spill] sm:$0xff] }
 0x31c   :  { %750 = vperm.xlu2 %2526, %v748_v41   ;;  %v4104_v41 = vld [vmem:[#allocation31_spill] sm:$0xff] }
 0x376   :  { %v751_v28 = vpop.permute.xlu2 %750 }
 0x377   :  { %vm752_vm2 = vcmp.eq.s32.totalorder %v3172_v7, %v751_v28  ;;  %v4105_v28 = vld [vmem:[#allocation12_spill] sm:$0xff] }
 0x378   :  { %vm2358_vm3 = vmpackc.low %vm752_vm2, %vm752_vm2 }
 0x379   :  { %2359 = vmatmul.msk.bf16.vlgmr.msrb.gmra.mxu1 %vm2358_vm3, %v4092_v61  ;;  %2361 = vmatmul.msk.bf16.vlgmr.msrb.gmra.mxu2 %vm2358_vm3, %v4092_v61 }
 0x37a   :  { %2363 = vmatmul.msk.bf16.vlgmr.msrb.gmra.mxu3 %vm2358_vm3, %v4092_v61  ;;  %2365 = vmatmul.msk.bf16.vlgmr.msra.gmra.mxu0 %vm2358_vm3, %v4092_v61 }
 0x37b   :  { %1016 = vmatpush.bf16.msrb.mxu1 %v2772_v16  ;;  %1029 = vmatpush.bf16.msrb.mxu2 %v2868_v55 }
 0x37c   :  { %1042 = vmatpush.bf16.msrb.mxu3 %v2882_v62  ;;  %1055 = vmatpush.bf16.msra.mxu0 %v2893_v5 }
 0x37f   :  { %1017 = vmatpush.bf16.msrb.mxu1 %v4093_v20  ;;  %1030 = vmatpush.bf16.msrb.mxu2 %v4094_v23  ;;  %v4121_v23 = vld [vmem:[#allocation51_spill] sm:$0xff] }
 0x380   :  { %1043 = vmatpush.bf16.msrb.mxu3 %v4095_v50  ;;  %1056 = vmatpush.bf16.msra.mxu0 %v4096_v22  ;;  %v4106_v50 = vld [vmem:[#allocation33_spill] sm:$0xff]  ;;  %v4107_v22 = vld [vmem:[#allocation34_spill] sm:$0xff] }
 0x383   :  { %1018 = vmatpush.bf16.msrb.mxu1 %v4097_v43  ;;  %1031 = vmatpush.bf16.msrb.mxu2 %v4098_v52  ;;  %v4108_v43 = vld [vmem:[#allocation35_spill] sm:$0xff]  ;;  %v4109_v52 = vld [vmem:[#allocation13_spill] sm:$0xff] }
 0x384   :  { %1044 = vmatpush.bf16.msrb.mxu3 %v4099_v13  ;;  %1057 = vmatpush.bf16.msra.mxu0 %v4100_v27  ;;  %v4110_v13 = vld [vmem:[#allocation37_spill] sm:$0xff]  ;;  %v4111_v27 = vld [vmem:[#allocation38_spill] sm:$0xff] }
 0x387   :  { %1019 = vmatpush.bf16.msrb.mxu1 %v4101_v2  ;;  %1032 = vmatpush.bf16.msrb.mxu2 %v4102_v32  ;;  %v4112_v2 = vld [vmem:[#allocation39_spill] sm:$0xff] }
 0x388   :  { %1045 = vmatpush.bf16.msrb.mxu3 %v4103_v19  ;;  %1058 = vmatpush.bf16.msra.mxu0 %v4104_v41  ;;  %v4113_v32 = vld [vmem:[#allocation15_spill] sm:$0xff]  ;;  %v4114_v19 = vld [vmem:[#allocation41_spill] sm:$0xff]  ;;  %v4115_v41 = vld [vmem:[#allocation42_spill] sm:$0xff] }
 0x38b   :  { %1020 = vmatpush.bf16.msrb.mxu1 %v4105_v28  ;;  %1033 = vmatpush.bf16.msrb.mxu2 %v4106_v50  ;;  %v4116_v28 = vld [vmem:[#allocation43_spill] sm:$0xff]  ;;  %v4120_v50 = vld [vmem:[#allocation49_spill] sm:$0xff] }
 0x38c   :  { %1046 = vmatpush.bf16.msrb.mxu3 %v4107_v22  ;;  %1059 = vmatpush.bf16.msra.mxu0 %v4108_v43  ;;  %v4117_v22 = vld [vmem:[#allocation45_spill] sm:$0xff]  ;;  %v4118_v43 = vld [vmem:[#allocation46_spill] sm:$0xff] }
 0x38f   :  { %1021 = vmatpush.bf16.msrb.mxu1 %v4109_v52  ;;  %1034 = vmatpush.bf16.msrb.mxu2 %v4110_v13  ;;  %v4119_v52 = vld [vmem:[#allocation47_spill] sm:$0xff] }
 0x390   :  { %1047 = vmatpush.bf16.msrb.mxu3 %v4111_v27  ;;  %1060 = vmatpush.bf16.msra.mxu0 %v4112_v2 }
 0x393   :  { %1022 = vmatpush.bf16.msrb.mxu1 %v4113_v32  ;;  %1035 = vmatpush.bf16.msrb.mxu2 %v4114_v19 }
 0x394   :  { %1048 = vmatpush.bf16.msrb.mxu3 %v4115_v41  ;;  %1061 = vmatpush.bf16.msra.mxu0 %v4116_v28 }
 0x397   :  { %1023 = vmatpush.bf16.msrb.mxu1 %v2891_v3  ;;  %1036 = vmatpush.bf16.msrb.mxu2 %v4117_v22 }
 0x398   :  { %1049 = vmatpush.bf16.msrb.mxu3 %v4118_v43  ;;  %1062 = vmatpush.bf16.msra.mxu0 %v4119_v52  ;;  %v4122_v52 = vld [vmem:[#allocation50_spill] sm:$0xff] }
 0x3f6   :  { %v817_v13 = vpop.f32.mrf.mxu1 }
 0x3f7   :  { %v818_v27 = vadd.f32 %v817_v13, %v3326_v15  ;;  %v856_v2 = vpop.f32.mrf.mxu0 }
 0x3f8   :  { %v857_v32 = vadd.f32 %v856_v2, %v3339_v54 }
 0x3f9   :  { %v860_v19 = vadd.f32 %v818_v27, %v4120_v50 }
 0x3fa   :  { %v863_v41 = vadd.f32 %v857_v32, %v4121_v23 }
 0x3fb   :  { %v2366_v20 = vmul.f32 -1.442695, %v860_v19 }
 0x3fc   :  { %v2368_v28 = vmul.f32 -1.442695, %v863_v41  ;;  %v830_v5 = vpop.f32.mrf.mxu2 }
 0x3fd   :  { %2545 = vpow2.f32 %v2366_v20  ;;  %v831_v22 = vadd.f32 %v830_v5, %v3335_v9  ;;  %v843_v3 = vpop.f32.mrf.mxu3 }
 0x3fe   :  { %2547 = vpow2.f32 %v2368_v28  ;;  %v819_v43 = vpop.f32.mrf.mxu1  ;;  %v844_v9 = vadd.f32 %v843_v3, %v3337_v49  ;;  %v4123_v28 = vld [vmem:[#allocation52_spill] sm:$0xff] }
 0x3ff   :  { %v861_v62 = vadd.f32 %v831_v22, %v4122_v52  ;;  %v858_v55 = vpop.f32.mrf.mxu0 }
 0x401   :  { %v2367_v15 = vmul.f32 -1.442695, %v861_v62 }
 0x403   :  { %v2546_v13 = vpop.eup %2545  ;;  %2549 = vpow2.f32 %v2367_v15  ;;  %v862_v15 = vadd.f32 %v844_v9, %v4123_v28 }
 0x404   :  { %v2548_v54 = vpop.eup %2547  ;;  %v867_v2 = vadd.f32 1.0, %v2546_v13  ;;  %v832_v27 = vpop.f32.mrf.mxu2 }
 0x405   :  { %v845_v50 = vpop.f32.mrf.mxu3  ;;  %v906_v32 = vadd.f32 1.0, %v2548_v54 }
 0x406   :  { %2551 = vrcp.f32 %v867_v2  ;;  %v879_v27 = vand.u32 2147483648, %v867_v2  ;;  %vm873_vm5 = vweird.f32 %v867_v2 }
 0x407   :  { %2553 = vrcp.f32 %v906_v32  ;;  %vm912_vm13 = vweird.f32 %v906_v32 }
 0x409   :  { %v2550_v19 = vpop.eup %2549 }
 0x40a   :  { %v886_v41 = vadd.f32 1.0, %v2550_v19  ;;  %v877_v19 = vand.u32 2147483647, %v867_v2 }
 0x40c   :  { %v2552_v20 = vpop.eup %2551  ;;  %2555 = vrcp.f32 %v886_v41  ;;  %v898_v23 = vand.u32 2147483648, %v886_v41  ;;  %v896_v49 = vand.u32 2147483647, %v886_v41  ;;  %vm892_vm8 = vweird.f32 %v886_v41 }
 0x40d   :  { %v869_v5 = vmul.f32 %v2552_v20, %v867_v2  ;;  %v2554_v22 = vpop.eup %2553  ;;  %vm874_vm4 = vweird.f32 %v2552_v20  ;;  %2557 = vtanh.f32 %v862_v15  ;;  %vm878_vm9 = vcmp.eq.f32.partialorder %v877_v19, 8.507059e+37 }
 0x40e   :  { %v908_v50 = vmul.f32 %v2554_v22, %v906_v32  ;;  %vm875_vm6 = vmor %vm873_vm5, %vm874_vm4  ;;  %vm897_vm11 = vcmp.eq.f32.partialorder %v896_v49, 8.507059e+37  ;;  %vm913_vm12 = vweird.f32 %v2554_v22 }
 0x40f   :  { %v870_v43 = vsub.f32 1.0, %v869_v5  ;;  %vm914_vm14 = vmor %vm912_vm13, %vm913_vm12 }
 0x410   :  { %v909_v5 = vsub.f32 1.0, %v908_v50 }
 0x411   :  { %v871_v55 = vmul.f32 %v2552_v20, %v870_v43  ;;  %v880_v43 = vor.u32 1.1754944e-38, %v879_v27 }
 0x412   :  { %v2556_v62 = vpop.eup %2555  ;;  %v910_v7 = vmul.f32 %v2554_v22, %v909_v5  ;;  %v4128_v5 = vld [vmem:[#allocation48_spill] sm:$0xff] }
 0x413   :  { %v888_v52 = vmul.f32 %v2556_v62, %v886_v41  ;;  %v872_v13 = vadd.f32 %v2552_v20, %v871_v55  ;;  %vm893_vm7 = vweird.f32 %v2556_v62  ;;  %v899_v55 = vor.u32 1.1754944e-38, %v898_v23 }
 0x414   :  { %vm894_vm10 = vmor %vm892_vm8, %vm893_vm7 }
 0x415   :  { %v889_v54 = vsub.f32 1.0, %v888_v52  ;;  %v876_v3 = vsel %vm875_vm6, %v2552_v20, %v872_v13  ;;  %v2558_v52 = vpop.eup %2557  ;;  %v911_v20 = vadd.f32 %v2554_v22, %v910_v7  ;;  %v918_v13 = vand.u32 2147483648, %v906_v32 }
 0x416   :  { %v881_v28 = vsel %vm878_vm9, %v880_v43, %v876_v3 }
 0x417   :  { %v890_v16 = vmul.f32 %v2556_v62, %v889_v54  ;;  %v923_v15 = vmul.f32 %v2558_v52, %v881_v28  ;;  %v915_v23 = vsel %vm914_vm14, %v2554_v22, %v911_v20  ;;  %v919_v41 = vor.u32 1.1754944e-38, %v918_v13 }
 0x419   :  { %v891_v9 = vadd.f32 %v2556_v62, %v890_v16  ;;  %v916_v16 = vand.u32 2147483647, %v906_v32 }
 0x41b   :  { %v895_v61 = vsel %vm894_vm10, %v2556_v62, %v891_v9  ;;  %vm917_vm15 = vcmp.eq.f32.partialorder %v916_v16, 8.507059e+37  ;;  %v967_v16 = vstv %s966_s24 }
 0x41c   :  { %v900_v2 = vsel %vm897_vm11, %v899_v55, %v895_v61  ;;  %v920_v50 = vsel %vm917_vm15, %v919_v41, %v915_v23  ;;  %vm968_vm2 = vcmp.eq.s32.totalorder %v967_v16, 1  ;;  %v4145_v16 = vld [vmem:[#allocation31_spill] sm:$0xff] }
 0x41d   :  { %v922_v36 = vmul.f32 %v900_v2, %v3277_v56 }
 0x41f   :  { %v3391_v54 = vadd.f32 %v923_v15, %v922_v36  ;;  %v4124_v36 = vld [vmem:[#allocation14_spill] sm:$0xff] }
 0x421   :  { %2559 = vtanh.f32 %v3391_v54 }
 0x427   :  { %v2560_v62 = vpop.eup %2559 }
 0x428   :  { %v926_v27 = vmul.f32 %v2560_v62, %v920_v50  ;;  %v2371_v50 = vld [vmem:[%s3924_s1 + $0x10] sm:$0xff] }
 0x42a   :  { %v927_v61 = vpack.c.bf16 %v926_v27, %v926_v27 }
 0x42c   :  { %936 = vmatmul.bf16.vlgmr.msra.gmra.mxu1 %v927_v61  ;;  %985 = vmatmul.bf16.vlgmr.msra.gmra.mxu2 %v927_v61 }
 0x42d   :  { %998 = vmatmul.bf16.vlgmr.msra.gmra.mxu3 %v927_v61  ;;  %1011 = vmatmul.bf16.vlgmr.msrb.gmra.mxu0 %v927_v61 }
 0x42e   :  { %1068 = vmatpush.bf16.msra.mxu1 %v2902_v11  ;;  %1149 = vmatpush.bf16.msra.mxu2 %v3209_v39  ;;  %v4125_v39 = vld [vmem:[#allocation17_spill] sm:$0xff] }
 0x42f   :  { %1198 = vmatpush.bf16.msra.mxu3 %v2761_v4  ;;  %1211 = vmatpush.bf16.msrb.mxu0 %v2766_v8 }
 0x432   :  { %1069 = vmatpush.bf16.msra.mxu1 %v4084_v26  ;;  %1150 = vmatpush.bf16.msra.mxu2 %v3215_v46  ;;  %v4126_v46 = vld [vmem:[#allocation24_spill] sm:$0xff] }
 0x433   :  { %1199 = vmatpush.bf16.msra.mxu3 %v2774_v17  ;;  %1212 = vmatpush.bf16.msrb.mxu0 %v2777_v21 }
 0x436   :  { %1070 = vmatpush.bf16.msra.mxu1 %v4085_v42  ;;  %1151 = vmatpush.bf16.msra.mxu2 %v3221_v33  ;;  %v4127_v33 = vld [vmem:[#allocation28_spill] sm:$0xff] }
 0x437   :  { %1200 = vmatpush.bf16.msra.mxu3 %v2785_v30  ;;  %1213 = vmatpush.bf16.msrb.mxu0 %v2788_v34 }
 0x43a   :  { %1071 = vmatpush.bf16.msra.mxu1 %v4086_v1  ;;  %1152 = vmatpush.bf16.msra.mxu2 %v3227_v29 }
 0x43b   :  { %1201 = vmatpush.bf16.msra.mxu3 %v2797_v45  ;;  %1214 = vmatpush.bf16.msrb.mxu0 %v2800_v48 }
 0x43c   :  { %1024 = vmatmul.bf16.vlgmr.msrb.gmra.mxu1 %v927_v61 }
 0x43e   :  { %1072 = vmatpush.bf16.msra.mxu1 %v4087_v35  ;;  %1153 = vmatpush.bf16.msra.mxu2 %v3233_v58 }
 0x43f   :  { %1202 = vmatpush.bf16.msra.mxu3 %v2809_v57  ;;  %1215 = vmatpush.bf16.msrb.mxu0 %v2812_v60 }
 0x442   :  { %1073 = vmatpush.bf16.msra.mxu1 %v4088_v40  ;;  %1154 = vmatpush.bf16.msra.mxu2 %v3239_v0 }
 0x443   :  { %1203 = vmatpush.bf16.msra.mxu3 %v2821_v6  ;;  %1216 = vmatpush.bf16.msrb.mxu0 %v2824_v10 }
 0x446   :  { %1074 = vmatpush.bf16.msra.mxu1 %v4089_v18  ;;  %1155 = vmatpush.bf16.msra.mxu2 %v3248_v59 }
 0x447   :  { %1204 = vmatpush.bf16.msra.mxu3 %v2833_v24  ;;  %1217 = vmatpush.bf16.msrb.mxu0 %v2836_v31 }
 0x44a   :  { %1075 = vmatpush.bf16.msra.mxu1 %v3146_v37  ;;  %1156 = vmatpush.bf16.msra.mxu2 %v3258_v44 }
 0x44b   :  { %1205 = vmatpush.bf16.msra.mxu3 %v2857_v47  ;;  %1218 = vmatpush.bf16.msrb.mxu0 %v2866_v53 }
 0x44e   :  { %1224 = vmatpush.bf16.msrb.mxu1 %v2769_v12 }
 0x452   :  { %1225 = vmatpush.bf16.msrb.mxu1 %v2780_v25 }
 0x456   :  { %1226 = vmatpush.bf16.msrb.mxu1 %v2791_v38 }
 0x45a   :  { %1227 = vmatpush.bf16.msrb.mxu1 %v2803_v51 }
 0x45e   :  { %1228 = vmatpush.bf16.msrb.mxu1 %v2815_v63 }
 0x462   :  { %1229 = vmatpush.bf16.msrb.mxu1 %v2827_v14 }
 0x466   :  { %1230 = vmatpush.bf16.msrb.mxu1 %v4124_v36 }
 0x46a   :  { %1231 = vmatpush.bf16.msrb.mxu1 %v4125_v39 }
 0x4a9   :  { %v937_v44 = vpop.f32.mrf.mxu1 }
 0x4aa   :  { %v938_v59 = vadd.f32 %v4126_v46, %v937_v44  ;;  %v3435_v7 = vpop.f32.mrf.mxu0 }
 0x4ac   :  { %2369 = vst [vmem:[%s3931_s8 + $0x10] sm:$0xff] %v938_v59  ;;  %v943_v29 = vadd.f32 %v938_v59, %v4127_v33  ;;  %v4129_v59 = vmov 1.0|1.0  }
 0x4ae   :  { %944 = vmax.xlane.f32.xlu2 %v943_v29 }
 0x4af   :  { %v3441_v58 = vpop.f32.mrf.mxu2 }
 0x4b0   :  { %v3443_v0 = vpop.f32.mrf.mxu3 }
 0x4b1   :  { %v939_v56 = vpop.f32.mrf.mxu1 }
 0x4b2   :  { %v1014_v32 = vpop.f32.mrf.mxu0  ;;  %v4131_v56 = vld [vmem:[#allocation16_spill] sm:$0xff] }
 0x4b3   :  { %v4132_v32 = vld [vmem:[#allocation18_spill] sm:$0xff] }
 0x4b7   :  { %v988_v22 = vpop.f32.mrf.mxu2 }
 0x4b8   :  { %v1001_v28 = vpop.f32.mrf.mxu3  ;;  %v4133_v22 = vld [vmem:[#allocation20_spill] sm:$0xff] }
 0x4b9   :  { %v3445_v19 = vpop.f32.mrf.mxu1  ;;  %v4134_v28 = vld [vmem:[#allocation9_spill] sm:$0xff] }
 0x4c1   :  { %v1027_v3 = vpop.f32.mrf.mxu1 }
 0x4c2   :  { %v4135_v3 = vld [vmem:[#allocation21_spill] sm:$0xff] }
 0x521   :  { %v945_v49 = vpop.xlane.xlu2 %944 }
 0x522   :  { %vm946_vm0 = vcmp.eq.f32.partialorder %v943_v29, %v945_v49  ;;  %v4130_v29 = vld [vmem:[#allocation8_spill] sm:$0xff]  ;;  %v4136_v49 = vld [vmem:[#allocation22_spill] sm:$0xff] }
 0x523   :  { %v947_v43 = vsel %vm946_vm0, %v4128_v5, 128 }
 0x524   :  { %v949_v9 = vshra.s32 %v947_v43, 16  ;;  %v948_v52 = vand.u32 65535, %v947_v43  ;;  %v4137_v43 = vld [vmem:[#allocation23_spill] sm:$0xff] }
 0x526   :  { %v951_v55 = vcvt.s32.f32 %v949_v9  ;;  %v950_v15 = vcvt.s32.f32 %v948_v52  ;;  %v4138_v9 = vld [vmem:[#allocation10_spill] sm:$0xff] }
 0x527   :  { %v4140_v52 = vld [vmem:[#allocation26_spill] sm:$0xff] }
 0x528   :  { %952 = vmin.xlane.f32.xlu1 %v951_v55 }
 0x59b   :  { %v953_v2 = vpop.xlane.xlu1 %952 }
 0x59c   :  { %vm954_vm1 = vcmp.eq.f32.partialorder %v951_v55, %v953_v2  ;;  %v959_v13 = vcvt.f32.s32 %v953_v2  ;;  %v4139_v55 = vld [vmem:[#allocation25_spill] sm:$0xff]  ;;  %v4141_v2 = vld [vmem:[#allocation27_spill] sm:$0xff] }
 0x59d   :  { %v955_v20 = vsel %vm954_vm1, %v950_v15, inf  ;;  %v4142_v15 = vld [vmem:[#allocation11_spill] sm:$0xff] }
 0x59e   :  { %956 = vmin.xlane.f32.xlu1 %v955_v20  ;;  %v960_v41 = vshll.u32 %v959_v13, 16  ;;  %v4143_v20 = vld [vmem:[#allocation29_spill] sm:$0xff]  ;;  %v4144_v13 = vld [vmem:[#allocation30_spill] sm:$0xff] }
 0x611   :  { %v957_v23 = vpop.xlane.xlu1 %956 }
 0x612   :  { %v958_v62 = vcvt.f32.s32 %v957_v23  ;;  %v4146_v23 = vld [vmem:[#allocation12_spill] sm:$0xff] }
 0x614   :  { %v961_v27 = vadd.s32 %v960_v41, %v958_v62  ;;  %v4147_v41 = vld [vmem:[#allocation33_spill] sm:$0xff]  ;;  %v4148_v62 = vld [vmem:[#allocation34_spill] sm:$0xff] }
 0x616   :  { %v969_v61 = vsel %vm968_vm2, %v2371_v50, %v961_v27  ;;  %v4149_v50 = vld [vmem:[#allocation35_spill] sm:$0xff]  ;;  %v4150_v27 = vld [vmem:[#allocation13_spill] sm:$0xff] }
 0x617   :  { %971 = vperm.xlu1 %2527, %v969_v61   ;;  %v4151_v61 = vld [vmem:[#allocation37_spill] sm:$0xff] }
 0x689   :  { %v972_v44 = vpop.permute.xlu1 %971 }
 0x68a   :  { %vm973_vm3 = vcmp.eq.s32.totalorder %v4128_v5, %v972_v44  ;;  %v4152_v44 = vld [vmem:[#allocation38_spill] sm:$0xff] }
 0x68b   :  { %vm2373_vm4 = vmpackc.low %vm973_vm3, %vm973_vm3 }
 0x68c   :  { %2374 = vmatmul.msk.bf16.vlgmr.msrb.gmra.mxu2 %vm2373_vm4, %v4129_v59  ;;  %2376 = vmatmul.msk.bf16.vlgmr.msrb.gmra.mxu3 %vm2373_vm4, %v4129_v59 }
 0x68d   :  { %2378 = vmatmul.msk.bf16.vlgmr.msra.gmra.mxu0 %vm2373_vm4, %v4129_v59  ;;  %2380 = vmatmul.msk.bf16.vlgmr.msra.gmra.mxu1 %vm2373_vm4, %v4129_v59 }
 0x68e   :  { %1237 = vmatpush.bf16.msrb.mxu2 %v4130_v29  ;;  %1250 = vmatpush.bf16.msrb.mxu3 %v4131_v56 }
 0x68f   :  { %1263 = vmatpush.bf16.msra.mxu0 %v4132_v32  ;;  %1276 = vmatpush.bf16.msra.mxu1 %v4133_v22 }
 0x692   :  { %1238 = vmatpush.bf16.msrb.mxu2 %v4134_v28  ;;  %1251 = vmatpush.bf16.msrb.mxu3 %v4135_v3 }
 0x693   :  { %1264 = vmatpush.bf16.msra.mxu0 %v4136_v49  ;;  %1277 = vmatpush.bf16.msra.mxu1 %v4137_v43 }
 0x696   :  { %1239 = vmatpush.bf16.msrb.mxu2 %v4138_v9  ;;  %1252 = vmatpush.bf16.msrb.mxu3 %v4139_v55  ;;  %v4164_v9 = vld [vmem:[#allocation50_spill] sm:$0xff] }
 0x697   :  { %1265 = vmatpush.bf16.msra.mxu0 %v4140_v52  ;;  %1278 = vmatpush.bf16.msra.mxu1 %v4141_v2  ;;  %v4162_v2 = vld [vmem:[#allocation51_spill] sm:$0xff] }
 0x69a   :  { %1240 = vmatpush.bf16.msrb.mxu2 %v4142_v15  ;;  %1253 = vmatpush.bf16.msrb.mxu3 %v4143_v20  ;;  %v4153_v15 = vld [vmem:[#allocation39_spill] sm:$0xff] }
 0x69b   :  { %1266 = vmatpush.bf16.msra.mxu0 %v4144_v13  ;;  %1279 = vmatpush.bf16.msra.mxu1 %v4145_v16  ;;  %v4154_v20 = vld [vmem:[#allocation15_spill] sm:$0xff]  ;;  %v4155_v13 = vld [vmem:[#allocation41_spill] sm:$0xff]  ;;  %v4156_v16 = vld [vmem:[#allocation42_spill] sm:$0xff] }
 0x69e   :  { %1241 = vmatpush.bf16.msrb.mxu2 %v4146_v23  ;;  %1254 = vmatpush.bf16.msrb.mxu3 %v4147_v41  ;;  %v4157_v23 = vld [vmem:[#allocation43_spill] sm:$0xff] }
 0x69f   :  { %1267 = vmatpush.bf16.msra.mxu0 %v4148_v62  ;;  %1280 = vmatpush.bf16.msra.mxu1 %v4149_v50  ;;  %v4158_v41 = vld [vmem:[#allocation19_spill] sm:$0xff]  ;;  %v4159_v62 = vld [vmem:[#allocation45_spill] sm:$0xff]  ;;  %v4160_v50 = vld [vmem:[#allocation46_spill] sm:$0xff] }
 0x6a2   :  { %1242 = vmatpush.bf16.msrb.mxu2 %v4150_v27  ;;  %1255 = vmatpush.bf16.msrb.mxu3 %v4151_v61  ;;  %v4161_v27 = vld [vmem:[#allocation47_spill] sm:$0xff] }
 0x6a3   :  { %1268 = vmatpush.bf16.msra.mxu0 %v4152_v44  ;;  %1281 = vmatpush.bf16.msra.mxu1 %v4153_v15 }
 0x6a6   :  { %1243 = vmatpush.bf16.msrb.mxu2 %v4154_v20  ;;  %1256 = vmatpush.bf16.msrb.mxu3 %v4155_v13 }
 0x6a7   :  { %1269 = vmatpush.bf16.msra.mxu0 %v4156_v16  ;;  %1282 = vmatpush.bf16.msra.mxu1 %v4157_v23 }
 0x6aa   :  { %1244 = vmatpush.bf16.msrb.mxu2 %v4158_v41  ;;  %1257 = vmatpush.bf16.msrb.mxu3 %v4159_v62  ;;  %v4163_v41 = vld [vmem:[#allocation49_spill] sm:$0xff] }
 0x6ab   :  { %1270 = vmatpush.bf16.msra.mxu0 %v4160_v50  ;;  %1283 = vmatpush.bf16.msra.mxu1 %v4161_v27 }
 0x70a   :  { %v1064_v61 = vpop.f32.mrf.mxu0  ;;  %v1077_v44 = vpop.f32.mrf.mxu1 }
 0x70b   :  { %v1078_v15 = vadd.f32 %v1077_v44, %v3445_v19 }
 0x70d   :  { %v1084_v20 = vadd.f32 %v1078_v15, %v4162_v2 }
 0x70f   :  { %v2383_v52 = vmul.f32 -1.442695, %v1084_v20  ;;  %v1038_v13 = vpop.f32.mrf.mxu2  ;;  %v1051_v55 = vpop.f32.mrf.mxu3 }
 0x710   :  { %v1039_v16 = vadd.f32 %v1038_v13, %v3441_v58  ;;  %v1052_v23 = vadd.f32 %v1051_v55, %v3443_v0  ;;  %v1065_v55 = vadd.f32 %v1064_v61, %v3435_v7  ;;  %v4165_v13 = vld [vmem:[#allocation52_spill] sm:$0xff] }
 0x711   :  { %2561 = vpow2.f32 %v2383_v52 }
 0x712   :  { %v1081_v62 = vadd.f32 %v1039_v16, %v4163_v41  ;;  %v1082_v50 = vadd.f32 %v1052_v23, %v4164_v9  ;;  %v1066_v43 = vpop.f32.mrf.mxu0  ;;  %v1079_v27 = vpop.f32.mrf.mxu1  ;;  %v1083_v16 = vadd.f32 %v1065_v55, %v4165_v13 }
 0x714   :  { %v2381_v49 = vmul.f32 -1.442695, %v1081_v62  ;;  %v2382_v3 = vmul.f32 -1.442695, %v1082_v50 }
 0x716   :  { %2563 = vpow2.f32 %v2381_v49 }
 0x717   :  { %v2562_v19 = vpop.eup %2561  ;;  %2565 = vpow2.f32 %v2382_v3  ;;  %v1040_v15 = vpop.f32.mrf.mxu2 }
 0x718   :  { %v1053_v20 = vpop.f32.mrf.mxu3  ;;  %v1127_v44 = vadd.f32 1.0, %v2562_v19 }
 0x71a   :  { %2567 = vrcp.f32 %v1127_v44  ;;  %vm1133_vm14 = vweird.f32 %v1127_v44 }
 0x71c   :  { %v2564_v2 = vpop.eup %2563 }
 0x71d   :  { %v2566_v28 = vpop.eup %2565  ;;  %v1088_v58 = vadd.f32 1.0, %v2564_v2 }
 0x71e   :  { %v1107_v0 = vadd.f32 1.0, %v2566_v28 }
 0x71f   :  { %2569 = vrcp.f32 %v1088_v58  ;;  %v1100_v27 = vand.u32 2147483648, %v1088_v58  ;;  %v1098_v2 = vand.u32 2147483647, %v1088_v58  ;;  %vm1094_vm7 = vweird.f32 %v1088_v58 }
 0x720   :  { %2571 = vrcp.f32 %v1107_v0  ;;  %v2568_v52 = vpop.eup %2567  ;;  %v1119_v28 = vand.u32 2147483648, %v1107_v0  ;;  %v1117_v41 = vand.u32 2147483647, %v1107_v0  ;;  %vm1113_vm9 = vweird.f32 %v1107_v0 }
 0x721   :  { %v1129_v3 = vmul.f32 %v2568_v52, %v1127_v44  ;;  %2573 = vtanh.f32 %v1083_v16  ;;  %v1101_v55 = vor.u32 1.1754944e-38, %v1100_v27  ;;  %vm1099_vm10 = vcmp.eq.f32.partialorder %v1098_v2, 8.507059e+37  ;;  %v3558_v2 = vld [vmem:[%s3929_s6 + $0x8] sm:$0xff] }
 0x722   :  { %v1120_v16 = vor.u32 1.1754944e-38, %v1119_v28  ;;  %vm1118_vm12 = vcmp.eq.f32.partialorder %v1117_v41, 8.507059e+37  ;;  %vm1134_vm13 = vweird.f32 %v2568_v52  ;;  %v1139_v27 = vand.u32 2147483648, %v1127_v44  ;;  %v3567_v28 = vld [vmem:[%s3929_s6] sm:$0xff] }
 0x723   :  { %v1130_v7 = vsub.f32 1.0, %v1129_v3  ;;  %vm1135_vm15 = vmor %vm1133_vm14, %vm1134_vm13 }
 0x725   :  { %v2570_v43 = vpop.eup %2569  ;;  %v1131_v22 = vmul.f32 %v2568_v52, %v1130_v7 }
 0x726   :  { %v2572_v23 = vpop.eup %2571  ;;  %v1090_v49 = vmul.f32 %v2570_v43, %v1088_v58  ;;  %vm1095_vm5 = vweird.f32 %v2570_v43 }
 0x727   :  { %v1109_v62 = vmul.f32 %v2572_v23, %v1107_v0  ;;  %vm1114_vm6 = vweird.f32 %v2572_v23  ;;  %vm1096_vm8 = vmor %vm1094_vm7, %vm1095_vm5  ;;  %v1132_v58 = vadd.f32 %v2568_v52, %v1131_v22  ;;  %v1137_v0 = vand.u32 2147483647, %v1127_v44  ;;  %v3531_v22 = vld [vmem:[%s3929_s6 + $0x20] sm:$0xff]  ;;  %v3540_v44 = vld [vmem:[%s3929_s6 + $0x18] sm:$0xff] }
 0x728   :  { %v1091_v50 = vsub.f32 1.0, %v1090_v49  ;;  %vm1115_vm11 = vmor %vm1113_vm9, %vm1114_vm6  ;;  %v2574_v49 = vpop.eup %2573 }
 0x729   :  { %v1110_v19 = vsub.f32 1.0, %v1109_v62  ;;  %vm1138_vm0 = vcmp.eq.f32.partialorder %v1137_v0, 8.507059e+37 }
 0x72a   :  { %v1092_v15 = vmul.f32 %v2570_v43, %v1091_v50 }
 0x72b   :  { %v1111_v20 = vmul.f32 %v2572_v23, %v1110_v19 }
 0x72c   :  { %v1093_v61 = vadd.f32 %v2570_v43, %v1092_v15  ;;  %v1140_v15 = vor.u32 1.1754944e-38, %v1139_v27 }
 0x72d   :  { %v1112_v13 = vadd.f32 %v2572_v23, %v1111_v20 }
 0x72e   :  { %v1097_v9 = vsel %vm1096_vm8, %v2570_v43, %v1093_v61  ;;  %v1136_v43 = vsel %vm1135_vm15, %v2568_v52, %v1132_v58  ;;  %v3549_v52 = vld [vmem:[%s3929_s6 + $0x10] sm:$0xff] }
 0x72f   :  { %v1102_v62 = vsel %vm1099_vm10, %v1101_v55, %v1097_v9  ;;  %v1116_v50 = vsel %vm1115_vm11, %v2572_v23, %v1112_v13  ;;  %v1141_v41 = vsel %vm1138_vm0, %v1140_v15, %v1136_v43 }
 0x730   :  { %v1144_v32 = vmul.f32 %v2574_v49, %v1102_v62  ;;  %v1121_v19 = vsel %vm1118_vm12, %v1120_v16, %v1116_v50 }
 0x731   :  { %v1143_v56 = vmul.f32 %v1121_v19, %v3391_v54  ;;  %v3504_v54 = vld [vmem:[%s3929_s6 + $0x38] sm:$0xff] }
 0x733   :  { %v3497_v3 = vadd.f32 %v1144_v32, %v1143_v56  ;;  %v3513_v56 = vld [vmem:[%s3929_s6 + $0x30] sm:$0xff]  ;;  %v3522_v32 = vld [vmem:[%s3929_s6 + $0x28] sm:$0xff] }
 0x735   :  { %2575 = vtanh.f32 %v3497_v3 }
 0x73b   :  { %v2576_v9 = vpop.eup %2575 }
 0x73c   :  { %v1147_v13 = vmul.f32 %v2576_v9, %v1141_v41 }
 0x73e   :  { %v1148_v23 = vpack.c.bf16 %v1147_v13, %v1147_v13 }
 0x740   :  { %1157 = vmatmul.bf16.vlgmr.msra.gmra.mxu2 %v1148_v23  ;;  %1206 = vmatmul.bf16.vlgmr.msra.gmra.mxu3 %v1148_v23 }
 0x741   :  { %1219 = vmatmul.bf16.vlgmr.msrb.gmra.mxu0 %v1148_v23  ;;  %1232 = vmatmul.bf16.vlgmr.msrb.gmra.mxu1 %v1148_v23 }
 0x742   :  { %1289 = vmatpush.bf16.msra.mxu2 %v2902_v11  ;;  %1370 = vmatpush.bf16.msra.mxu3 %v3504_v54 }
 0x743   :  { %1419 = vmatpush.bf16.msrb.mxu0 %v2761_v4  ;;  %1432 = vmatpush.bf16.msrb.mxu1 %v2766_v8 }
 0x746   :  { %1290 = vmatpush.bf16.msra.mxu2 %v4084_v26  ;;  %1371 = vmatpush.bf16.msra.mxu3 %v3513_v56 }
 0x747   :  { %1420 = vmatpush.bf16.msrb.mxu0 %v2774_v17  ;;  %1433 = vmatpush.bf16.msrb.mxu1 %v2777_v21 }
 0x74a   :  { %1291 = vmatpush.bf16.msra.mxu2 %v4085_v42  ;;  %1372 = vmatpush.bf16.msra.mxu3 %v3522_v32 }
 0x74b   :  { %1421 = vmatpush.bf16.msrb.mxu0 %v2785_v30  ;;  %1434 = vmatpush.bf16.msrb.mxu1 %v2788_v34 }
 0x74e   :  { %1292 = vmatpush.bf16.msra.mxu2 %v4086_v1  ;;  %1373 = vmatpush.bf16.msra.mxu3 %v3531_v22 }
 0x74f   :  { %1422 = vmatpush.bf16.msrb.mxu0 %v2797_v45  ;;  %1435 = vmatpush.bf16.msrb.mxu1 %v2800_v48 }
 0x750   :  { %1245 = vmatmul.bf16.vlgmr.msrb.gmra.mxu2 %v1148_v23 }
 0x752   :  { %1293 = vmatpush.bf16.msra.mxu2 %v4087_v35  ;;  %1374 = vmatpush.bf16.msra.mxu3 %v3540_v44 }
 0x753   :  { %1423 = vmatpush.bf16.msrb.mxu0 %v2809_v57  ;;  %1436 = vmatpush.bf16.msrb.mxu1 %v2812_v60 }
 0x756   :  { %1294 = vmatpush.bf16.msra.mxu2 %v4088_v40  ;;  %1375 = vmatpush.bf16.msra.mxu3 %v3549_v52 }
 0x757   :  { %1424 = vmatpush.bf16.msrb.mxu0 %v2821_v6  ;;  %1437 = vmatpush.bf16.msrb.mxu1 %v2824_v10 }
 0x75a   :  { %1295 = vmatpush.bf16.msra.mxu2 %v4089_v18  ;;  %1376 = vmatpush.bf16.msra.mxu3 %v3558_v2 }
 0x75b   :  { %1425 = vmatpush.bf16.msrb.mxu0 %v2833_v24  ;;  %1438 = vmatpush.bf16.msrb.mxu1 %v2836_v31 }
 0x75e   :  { %1296 = vmatpush.bf16.msra.mxu2 %v3146_v37  ;;  %1377 = vmatpush.bf16.msra.mxu3 %v3567_v28 }
 0x75f   :  { %1426 = vmatpush.bf16.msrb.mxu0 %v2857_v47  ;;  %1439 = vmatpush.bf16.msrb.mxu1 %v2866_v53 }
 0x762   :  { %1445 = vmatpush.bf16.msrb.mxu2 %v2769_v12 }
 0x766   :  { %1446 = vmatpush.bf16.msrb.mxu2 %v2780_v25 }
 0x76a   :  { %1447 = vmatpush.bf16.msrb.mxu2 %v2791_v38 }
 0x76e   :  { %1448 = vmatpush.bf16.msrb.mxu2 %v2803_v51 }
 0x772   :  { %1449 = vmatpush.bf16.msrb.mxu2 %v2815_v63 }
 0x776   :  { %1450 = vmatpush.bf16.msrb.mxu2 %v2827_v14 }
 0x77a   :  { %1451 = vmatpush.bf16.msrb.mxu2 %v4124_v36 }
 0x77e   :  { %1452 = vmatpush.bf16.msrb.mxu2 %v4125_v39 }
 0x7be   :  { %v3580_v20 = vpop.f32.mrf.mxu0  ;;  %v3582_v7 = vpop.f32.mrf.mxu1 }
 0x7c3   :  { %v1158_v61 = vpop.f32.mrf.mxu2  ;;  %v3584_v55 = vpop.f32.mrf.mxu3 }
 0x7c4   :  { %v1159_v16 = vadd.f32 %v4126_v46, %v1158_v61 }
 0x7c6   :  { %2384 = vst [vmem:[%s3931_s8 + $0x18] sm:$0xff] %v1159_v16  ;;  %v1222_v49 = vpop.f32.mrf.mxu0  ;;  %v1235_v62 = vpop.f32.mrf.mxu1  ;;  %v1164_v50 = vadd.f32 %v1159_v16, %v4127_v33 }
 0x7c7   :  { %v1188_v49 = vstv %s1187_s20 }
 0x7c8   :  { %1165 = vmax.xlane.f32.xlu2 %v1164_v50  ;;  %vm1189_vm3 = vcmp.eq.s32.totalorder %v1188_v49, 1  ;;  %v4173_v49 = vld [vmem:[#allocation10_spill] sm:$0xff] }
 0x7cb   :  { %v1160_v19 = vpop.f32.mrf.mxu2  ;;  %v1209_v58 = vpop.f32.mrf.mxu3 }
 0x7d3   :  { %v3591_v27 = vpop.f32.mrf.mxu2 }
 0x7db   :  { %v1248_v0 = vpop.f32.mrf.mxu2 }
 0x83b   :  { %v1166_v43 = vpop.xlane.xlu2 %1165 }
 0x83c   :  { %vm1167_vm1 = vcmp.eq.f32.partialorder %v1164_v50, %v1166_v43  ;;  %v2386_v50 = vld [vmem:[%s3924_s1 + $0x18] sm:$0xff] }
 0x83d   :  { %v1168_v15 = vsel %vm1167_vm1, %v4128_v5, 128 }
 0x83e   :  { %v1170_v9 = vshra.s32 %v1168_v15, 16  ;;  %v1169_v41 = vand.u32 65535, %v1168_v15 }
 0x840   :  { %v1172_v46 = vcvt.s32.f32 %v1170_v9  ;;  %v1171_v23 = vcvt.s32.f32 %v1169_v41  ;;  %v4166_v9 = vld [vmem:[#allocation16_spill] sm:$0xff] }
 0x841   :  { %v4168_v41 = vld [vmem:[#allocation20_spill] sm:$0xff] }
 0x842   :  { %1173 = vmin.xlane.f32.xlu0 %v1172_v46 }
 0x8b5   :  { %v1174_v13 = vpop.xlane.xlu0 %1173 }
 0x8b6   :  { %vm1175_vm2 = vcmp.eq.f32.partialorder %v1172_v46, %v1174_v13  ;;  %v1180_v16 = vcvt.f32.s32 %v1174_v13  ;;  %v4167_v46 = vld [vmem:[#allocation18_spill] sm:$0xff]  ;;  %v4169_v13 = vld [vmem:[#allocation9_spill] sm:$0xff] }
 0x8b7   :  { %v1176_v61 = vsel %vm1175_vm2, %v1171_v23, inf  ;;  %v4170_v23 = vld [vmem:[#allocation21_spill] sm:$0xff] }
 0x8b8   :  { %1177 = vmin.xlane.f32.xlu1 %v1176_v61  ;;  %v1181_v19 = vshll.u32 %v1180_v16, 16  ;;  %v4171_v61 = vld [vmem:[#allocation22_spill] sm:$0xff]  ;;  %v4172_v16 = vld [vmem:[#allocation23_spill] sm:$0xff] }
 0x92b   :  { %v1178_v62 = vpop.xlane.xlu1 %1177 }
 0x92c   :  { %v1179_v58 = vcvt.f32.s32 %v1178_v62  ;;  %v4174_v62 = vld [vmem:[#allocation25_spill] sm:$0xff] }
 0x92e   :  { %v1182_v0 = vadd.s32 %v1181_v19, %v1179_v58  ;;  %v4175_v19 = vld [vmem:[#allocation26_spill] sm:$0xff]  ;;  %v4176_v58 = vld [vmem:[#allocation27_spill] sm:$0xff] }
 0x930   :  { %v1190_v43 = vsel %vm1189_vm3, %v2386_v50, %v1182_v0  ;;  %v4177_v50 = vld [vmem:[#allocation11_spill] sm:$0xff]  ;;  %v4178_v0 = vld [vmem:[#allocation29_spill] sm:$0xff] }
 0x931   :  { %1192 = vperm.xlu2 %2526, %v1190_v43   ;;  %v4179_v43 = vld [vmem:[#allocation30_spill] sm:$0xff] }
 0x98b   :  { %v1193_v15 = vpop.permute.xlu2 %1192 }
 0x98c   :  { %vm1194_vm4 = vcmp.eq.s32.totalorder %v4128_v5, %v1193_v15  ;;  %v4180_v15 = vld [vmem:[#allocation31_spill] sm:$0xff] }
 0x98d   :  { %vm2388_vm5 = vmpackc.low %vm1194_vm4, %vm1194_vm4 }
 0x98e   :  { %2389 = vmatmul.msk.bf16.vlgmr.msrb.gmra.mxu3 %vm2388_vm5, %v4129_v59  ;;  %2391 = vmatmul.msk.bf16.vlgmr.msra.gmra.mxu0 %vm2388_vm5, %v4129_v59 }
 0x98f   :  { %2393 = vmatmul.msk.bf16.vlgmr.msra.gmra.mxu1 %vm2388_vm5, %v4129_v59  ;;  %2395 = vmatmul.msk.bf16.vlgmr.msra.gmra.mxu2 %vm2388_vm5, %v4129_v59 }
 0x990   :  { %1458 = vmatpush.bf16.msrb.mxu3 %v4130_v29  ;;  %1471 = vmatpush.bf16.msra.mxu0 %v4166_v9  ;;  %v4199_v29 = vld [vmem:[#allocation51_spill] sm:$0xff] }
 0x991   :  { %1484 = vmatpush.bf16.msra.mxu1 %v4167_v46  ;;  %1497 = vmatpush.bf16.msra.mxu2 %v4168_v41 }
 0x994   :  { %1459 = vmatpush.bf16.msrb.mxu3 %v4169_v13  ;;  %1472 = vmatpush.bf16.msra.mxu0 %v4170_v23  ;;  %v4181_v23 = vld [vmem:[#allocation12_spill] sm:$0xff]  ;;  %v4197_v13 = vld [vmem:[#allocation50_spill] sm:$0xff] }
 0x995   :  { %1485 = vmatpush.bf16.msra.mxu1 %v4171_v61  ;;  %1498 = vmatpush.bf16.msra.mxu2 %v4172_v16  ;;  %v4182_v61 = vld [vmem:[#allocation33_spill] sm:$0xff]  ;;  %v4183_v16 = vld [vmem:[#allocation34_spill] sm:$0xff] }
 0x998   :  { %1460 = vmatpush.bf16.msrb.mxu3 %v4173_v49  ;;  %1473 = vmatpush.bf16.msra.mxu0 %v4174_v62  ;;  %v4184_v49 = vld [vmem:[#allocation35_spill] sm:$0xff]  ;;  %v4185_v62 = vld [vmem:[#allocation13_spill] sm:$0xff] }
 0x999   :  { %1486 = vmatpush.bf16.msra.mxu1 %v4175_v19  ;;  %1499 = vmatpush.bf16.msra.mxu2 %v4176_v58  ;;  %v4186_v19 = vld [vmem:[#allocation37_spill] sm:$0xff]  ;;  %v4187_v58 = vld [vmem:[#allocation38_spill] sm:$0xff] }
 0x99c   :  { %1461 = vmatpush.bf16.msrb.mxu3 %v4177_v50  ;;  %1474 = vmatpush.bf16.msra.mxu0 %v4178_v0  ;;  %v4188_v50 = vld [vmem:[#allocation39_spill] sm:$0xff] }
 0x99d   :  { %1487 = vmatpush.bf16.msra.mxu1 %v4179_v43  ;;  %1500 = vmatpush.bf16.msra.mxu2 %v4180_v15  ;;  %v4189_v0 = vld [vmem:[#allocation15_spill] sm:$0xff]  ;;  %v4190_v43 = vld [vmem:[#allocation41_spill] sm:$0xff]  ;;  %v4191_v15 = vld [vmem:[#allocation42_spill] sm:$0xff] }
 0x9a0   :  { %1462 = vmatpush.bf16.msrb.mxu3 %v4181_v23  ;;  %1475 = vmatpush.bf16.msra.mxu0 %v4182_v61  ;;  %v4192_v23 = vld [vmem:[#allocation43_spill] sm:$0xff] }
 0x9a1   :  { %1488 = vmatpush.bf16.msra.mxu1 %v4183_v16  ;;  %1501 = vmatpush.bf16.msra.mxu2 %v4184_v49  ;;  %v4193_v61 = vld [vmem:[#allocation19_spill] sm:$0xff]  ;;  %v4194_v16 = vld [vmem:[#allocation45_spill] sm:$0xff]  ;;  %v4195_v49 = vld [vmem:[#allocation46_spill] sm:$0xff] }
 0x9a4   :  { %1463 = vmatpush.bf16.msrb.mxu3 %v4185_v62  ;;  %1476 = vmatpush.bf16.msra.mxu0 %v4186_v19  ;;  %v4196_v62 = vld [vmem:[#allocation47_spill] sm:$0xff] }
 0x9a5   :  { %1489 = vmatpush.bf16.msra.mxu1 %v4187_v58  ;;  %1502 = vmatpush.bf16.msra.mxu2 %v4188_v50 }
 0x9a8   :  { %1464 = vmatpush.bf16.msrb.mxu3 %v4189_v0  ;;  %1477 = vmatpush.bf16.msra.mxu0 %v4190_v43 }
 0x9a9   :  { %1490 = vmatpush.bf16.msra.mxu1 %v4191_v15  ;;  %1503 = vmatpush.bf16.msra.mxu2 %v4192_v23 }
 0x9ac   :  { %1465 = vmatpush.bf16.msrb.mxu3 %v4193_v61  ;;  %1478 = vmatpush.bf16.msra.mxu0 %v4194_v16  ;;  %v4198_v16 = vld [vmem:[#allocation49_spill] sm:$0xff] }
 0x9ad   :  { %1491 = vmatpush.bf16.msra.mxu1 %v4195_v49  ;;  %1504 = vmatpush.bf16.msra.mxu2 %v4196_v62 }
 0xa0b   :  { %v1272_v19 = vpop.f32.mrf.mxu0 }
 0xa0c   :  { %v1273_v58 = vadd.f32 %v1272_v19, %v3580_v20  ;;  %v1285_v50 = vpop.f32.mrf.mxu1 }
 0xa0e   :  { %v1303_v0 = vadd.f32 %v1273_v58, %v4197_v13 }
 0xa10   :  { %v2397_v41 = vmul.f32 -1.442695, %v1303_v0 }
 0xa11   :  { %v1259_v43 = vpop.f32.mrf.mxu3 }
 0xa12   :  { %2577 = vpow2.f32 %v2397_v41  ;;  %v1260_v15 = vadd.f32 %v1259_v43, %v3584_v55  ;;  %v1298_v23 = vpop.f32.mrf.mxu2 }
 0xa13   :  { %v1299_v61 = vadd.f32 %v1298_v23, %v3591_v27  ;;  %v1274_v46 = vpop.f32.mrf.mxu0  ;;  %v1286_v23 = vadd.f32 %v1285_v50, %v3582_v7 }
 0xa14   :  { %v1302_v9 = vadd.f32 %v1260_v15, %v4198_v16  ;;  %v1287_v49 = vpop.f32.mrf.mxu1 }
 0xa15   :  { %v1305_v62 = vadd.f32 %v1299_v61, %v4199_v29 }
 0xa16   :  { %v2396_v59 = vmul.f32 -1.442695, %v1302_v9 }
 0xa17   :  { %v2398_v5 = vmul.f32 -1.442695, %v1305_v62  ;;  %v4200_v62 = vld [vmem:[#allocation52_spill] sm:$0xff] }
 0xa18   :  { %v2578_v20 = vpop.eup %2577  ;;  %2579 = vpow2.f32 %v2396_v59  ;;  %v1304_v59 = vadd.f32 %v1286_v23, %v4200_v62 }
 0xa19   :  { %v1328_v19 = vadd.f32 1.0, %v2578_v20  ;;  %2581 = vpow2.f32 %v2398_v5  ;;  %v1261_v58 = vpop.f32.mrf.mxu3 }
 0xa1a   :  { %v1300_v0 = vpop.f32.mrf.mxu2 }
 0xa1b   :  { %2583 = vrcp.f32 %v1328_v19  ;;  %v1340_v58 = vand.u32 2147483648, %v1328_v19  ;;  %vm1334_vm7 = vweird.f32 %v1328_v19 }
 0xa1d   :  { %v1341_v50 = vor.u32 1.1754944e-38, %v1340_v58 }
 0xa1e   :  { %v2580_v41 = vpop.eup %2579 }
 0xa1f   :  { %v2582_v55 = vpop.eup %2581  ;;  %v1309_v43 = vadd.f32 1.0, %v2580_v41  ;;  %v1338_v41 = vand.u32 2147483647, %v1328_v19 }
 0xa20   :  { %v1348_v13 = vadd.f32 1.0, %v2582_v55 }
 0xa21   :  { %v2584_v27 = vpop.eup %2583  ;;  %2585 = vrcp.f32 %v1309_v43  ;;  %v1321_v29 = vand.u32 2147483648, %v1309_v43  ;;  %v1319_v7 = vand.u32 2147483647, %v1309_v43  ;;  %vm1339_vm10 = vcmp.eq.f32.partialorder %v1338_v41, 8.507059e+37  ;;  %v3693_v41 = vld [vmem:[%s3930_s7] ss:$0 sm:$0xff] }
 0xa22   :  { %v1330_v46 = vmul.f32 %v2584_v27, %v1328_v19  ;;  %2587 = vrcp.f32 %v1348_v13  ;;  %vm1335_vm6 = vweird.f32 %v2584_v27  ;;  %vm1315_vm11 = vweird.f32 %v1309_v43  ;;  %4203 = vst [vmem:[#allocation32_spill] sm:$0xff] %v3693_v41 }
 0xa23   :  { %vm1336_vm8 = vmor %vm1334_vm7, %vm1335_vm6  ;;  %2589 = vtanh.f32 %v1304_v59  ;;  %vm1320_vm13 = vcmp.eq.f32.partialorder %v1319_v7, 8.507059e+37  ;;  %v1360_v58 = vand.u32 2147483648, %v1348_v13  ;;  %vm1354_vm15 = vweird.f32 %v1348_v13 }
 0xa24   :  { %v1331_v61 = vsub.f32 1.0, %v1330_v46 }
 0xa26   :  { %v1332_v9 = vmul.f32 %v2584_v27, %v1331_v61 }
 0xa27   :  { %v2586_v49 = vpop.eup %2585 }
 0xa28   :  { %v2588_v15 = vpop.eup %2587  ;;  %v1333_v5 = vadd.f32 %v2584_v27, %v1332_v9  ;;  %v1311_v20 = vmul.f32 %v2586_v49, %v1309_v43  ;;  %vm1316_vm9 = vweird.f32 %v2586_v49  ;;  %v1322_v9 = vor.u32 1.1754944e-38, %v1321_v29 }
 0xa29   :  { %v1350_v0 = vmul.f32 %v2588_v15, %v1348_v13  ;;  %vm1317_vm12 = vmor %vm1315_vm11, %vm1316_vm9  ;;  %v2590_v39 = vpop.eup %2589  ;;  %vm1355_vm14 = vweird.f32 %v2588_v15  ;;  %v1361_v29 = vor.u32 1.1754944e-38, %v1360_v58  ;;  %v4205_v58 = vld [vmem:[#allocation48_spill] sm:$0xff] }
 0xa2a   :  { %v1312_v55 = vsub.f32 1.0, %v1311_v20  ;;  %v1337_v16 = vsel %vm1336_vm8, %v2584_v27, %v1333_v5  ;;  %vm1356_vm0 = vmor %vm1354_vm15, %vm1355_vm14 }
 0xa2b   :  { %v1351_v46 = vsub.f32 1.0, %v1350_v0  ;;  %v1342_v61 = vsel %vm1339_vm10, %v1341_v50, %v1337_v16 }
 0xa2c   :  { %v1313_v33 = vmul.f32 %v2586_v49, %v1312_v55  ;;  %v1364_v59 = vmul.f32 %v1342_v61, %v3497_v3 }
 0xa2d   :  { %v1352_v20 = vmul.f32 %v2588_v15, %v1351_v46 }
 0xa2e   :  { %v1314_v23 = vadd.f32 %v2586_v49, %v1313_v33  ;;  %v1358_v33 = vand.u32 2147483647, %v1348_v13 }
 0xa2f   :  { %v1353_v5 = vadd.f32 %v2588_v15, %v1352_v20 }
 0xa30   :  { %v1318_v62 = vsel %vm1317_vm12, %v2586_v49, %v1314_v23  ;;  %vm1359_vm1 = vcmp.eq.f32.partialorder %v1358_v33, 8.507059e+37  ;;  %v4204_v23 = vld [vmem:[#allocation28_spill] sm:$0xff] }
 0xa31   :  { %v1323_v19 = vsel %vm1320_vm13, %v1322_v9, %v1318_v62  ;;  %v1357_v16 = vsel %vm1356_vm0, %v2588_v15, %v1353_v5 }
 0xa32   :  { %v1365_v36 = vmul.f32 %v2590_v39, %v1323_v19  ;;  %v1362_v49 = vsel %vm1359_vm1, %v1361_v29, %v1357_v16  ;;  %v4202_v39 = vld [vmem:[#allocation17_spill] sm:$0xff] }
 0xa34   :  { %v3643_v27 = vadd.f32 %v1365_v36, %v1364_v59  ;;  %v4201_v36 = vld [vmem:[#allocation14_spill] sm:$0xff] }
 0xa36   :  { %2591 = vtanh.f32 %v3643_v27 }
 0xa3c   :  { %v2592_v43 = vpop.eup %2591 }
 0xa3d   :  { %v1368_v62 = vmul.f32 %v2592_v43, %v1362_v49 }
 0xa3f   :  { %v1369_v0 = vpack.c.bf16 %v1368_v62, %v1368_v62 }
 0xa41   :  { %1378 = vmatmul.bf16.vlgmr.msra.gmra.mxu3 %v1369_v0  ;;  %1427 = vmatmul.bf16.vlgmr.msrb.gmra.mxu0 %v1369_v0 }
 0xa42   :  { %1440 = vmatmul.bf16.vlgmr.msrb.gmra.mxu1 %v1369_v0  ;;  %1453 = vmatmul.bf16.vlgmr.msrb.gmra.mxu2 %v1369_v0 }
 0xa43   :  { %1510 = vmatpush.bf16.msra.mxu3 %v2902_v11  ;;  %1591 = vmatpush.bf16.msrb.mxu0 %v3504_v54 }
 0xa44   :  { %1640 = vmatpush.bf16.msrb.mxu1 %v2761_v4  ;;  %1653 = vmatpush.bf16.msrb.mxu2 %v2766_v8 }
 0xa47   :  { %1511 = vmatpush.bf16.msra.mxu3 %v4084_v26  ;;  %1592 = vmatpush.bf16.msrb.mxu0 %v3513_v56 }
 0xa48   :  { %1641 = vmatpush.bf16.msrb.mxu1 %v2774_v17  ;;  %1654 = vmatpush.bf16.msrb.mxu2 %v2777_v21 }
 0xa4b   :  { %1512 = vmatpush.bf16.msra.mxu3 %v4085_v42  ;;  %1593 = vmatpush.bf16.msrb.mxu0 %v3522_v32 }
 0xa4c   :  { %1642 = vmatpush.bf16.msrb.mxu1 %v2785_v30  ;;  %1655 = vmatpush.bf16.msrb.mxu2 %v2788_v34 }
 0xa4f   :  { %1513 = vmatpush.bf16.msra.mxu3 %v4086_v1  ;;  %1594 = vmatpush.bf16.msrb.mxu0 %v3531_v22 }
 0xa50   :  { %1643 = vmatpush.bf16.msrb.mxu1 %v2797_v45  ;;  %1656 = vmatpush.bf16.msrb.mxu2 %v2800_v48 }
 0xa51   :  { %1466 = vmatmul.bf16.vlgmr.msrb.gmra.mxu3 %v1369_v0 }
 0xa53   :  { %1514 = vmatpush.bf16.msra.mxu3 %v4087_v35  ;;  %1595 = vmatpush.bf16.msrb.mxu0 %v3540_v44 }
 0xa54   :  { %1644 = vmatpush.bf16.msrb.mxu1 %v2809_v57  ;;  %1657 = vmatpush.bf16.msrb.mxu2 %v2812_v60 }
 0xa57   :  { %1515 = vmatpush.bf16.msra.mxu3 %v4088_v40  ;;  %1596 = vmatpush.bf16.msrb.mxu0 %v3549_v52 }
 0xa58   :  { %1645 = vmatpush.bf16.msrb.mxu1 %v2821_v6  ;;  %1658 = vmatpush.bf16.msrb.mxu2 %v2824_v10 }
 0xa5b   :  { %1516 = vmatpush.bf16.msra.mxu3 %v4089_v18  ;;  %1597 = vmatpush.bf16.msrb.mxu0 %v3558_v2 }
 0xa5c   :  { %1646 = vmatpush.bf16.msrb.mxu1 %v2833_v24  ;;  %1659 = vmatpush.bf16.msrb.mxu2 %v2836_v31 }
 0xa5f   :  { %1517 = vmatpush.bf16.msra.mxu3 %v3146_v37  ;;  %1598 = vmatpush.bf16.msrb.mxu0 %v3567_v28 }
 0xa60   :  { %1647 = vmatpush.bf16.msrb.mxu1 %v2857_v47  ;;  %1660 = vmatpush.bf16.msrb.mxu2 %v2866_v53 }
 0xa63   :  { %1666 = vmatpush.bf16.msrb.mxu3 %v2769_v12 }
 0xa67   :  { %1667 = vmatpush.bf16.msrb.mxu3 %v2780_v25 }
 0xa6b   :  { %1668 = vmatpush.bf16.msrb.mxu3 %v2791_v38 }
 0xa6f   :  { %1669 = vmatpush.bf16.msrb.mxu3 %v2803_v51 }
 0xa73   :  { %1670 = vmatpush.bf16.msrb.mxu3 %v2815_v63 }
 0xa77   :  { %1671 = vmatpush.bf16.msrb.mxu3 %v2827_v14 }
 0xa7b   :  { %1672 = vmatpush.bf16.msrb.mxu3 %v4201_v36 }
 0xa7f   :  { %1673 = vmatpush.bf16.msrb.mxu3 %v4202_v39 }
 0xabe   :  { %v3686_v3 = vpop.f32.mrf.mxu0 }
 0xabf   :  { %v3688_v13 = vpop.f32.mrf.mxu1 }
 0xac4   :  { %v1379_v15 = vpop.f32.mrf.mxu3 }
 0xac5   :  { %v1380_v55 = vadd.f32 %v3693_v41, %v1379_v15  ;;  %v3696_v7 = vpop.f32.mrf.mxu2 }
 0xac6   :  { %v1430_v50 = vpop.f32.mrf.mxu0 }
 0xac7   :  { %2399 = vst [vmem:[%s3931_s8 + $0x20] sm:$0xff] %v1380_v55  ;;  %v1443_v46 = vpop.f32.mrf.mxu1  ;;  %v1385_v61 = vadd.f32 %v1380_v55, %v4204_v23  ;;  %v1409_v55 = vstv %s1408_s27 }
 0xac8   :  { %vm1410_vm4 = vcmp.eq.s32.totalorder %v1409_v55, 1  ;;  %v4214_v55 = vld [vmem:[#allocation23_spill] sm:$0xff] }
 0xac9   :  { %1386 = vmax.xlane.f32.xlu0 %v1385_v61 }
 0xacc   :  { %v1381_v9 = vpop.f32.mrf.mxu3 }
 0xacd   :  { %v1456_v19 = vpop.f32.mrf.mxu2 }
 0xad4   :  { %v3702_v20 = vpop.f32.mrf.mxu3 }
 0xadc   :  { %v1469_v59 = vpop.f32.mrf.mxu3 }
 0xb3c   :  { %v1387_v5 = vpop.xlane.xlu0 %1386 }
 0xb3d   :  { %vm1388_vm2 = vcmp.eq.f32.partialorder %v1385_v61, %v1387_v5  ;;  %v2401_v61 = vld [vmem:[%s3924_s1 + $0x20] sm:$0xff] }
 0xb3e   :  { %v1389_v33 = vsel %vm1388_vm2, %v4205_v58, 128 }
 0xb3f   :  { %v1391_v16 = vshra.s32 %v1389_v33, 16  ;;  %v1390_v43 = vand.u32 65535, %v1389_v33  ;;  %v4206_v33 = vmov 1.0|1.0  }
 0xb41   :  { %v1393_v29 = vcvt.s32.f32 %v1391_v16  ;;  %v1392_v62 = vcvt.s32.f32 %v1390_v43  ;;  %v4207_v16 = vld [vmem:[#allocation8_spill] sm:$0xff]  ;;  %v4209_v43 = vld [vmem:[#allocation18_spill] sm:$0xff] }
 0xb43   :  { %1394 = vmin.xlane.f32.xlu0 %v1393_v29 }
 0xbb6   :  { %v1395_v49 = vpop.xlane.xlu0 %1394 }
 0xbb7   :  { %vm1396_vm3 = vcmp.eq.f32.partialorder %v1393_v29, %v1395_v49  ;;  %v1401_v15 = vcvt.f32.s32 %v1395_v49  ;;  %v4208_v29 = vld [vmem:[#allocation16_spill] sm:$0xff] }
 0xbb8   :  { %v1397_v0 = vsel %vm1396_vm3, %v1392_v62, inf  ;;  %v4210_v49 = vld [vmem:[#allocation20_spill] sm:$0xff]  ;;  %v4211_v62 = vld [vmem:[#allocation9_spill] sm:$0xff] }
 0xbb9   :  { %1398 = vmin.xlane.f32.xlu0 %v1397_v0  ;;  %v1402_v46 = vshll.u32 %v1401_v15, 16  ;;  %v4212_v0 = vld [vmem:[#allocation21_spill] sm:$0xff]  ;;  %v4213_v15 = vld [vmem:[#allocation22_spill] sm:$0xff] }
 0xc2c   :  { %v1399_v50 = vpop.xlane.xlu0 %1398 }
 0xc2d   :  { %v1400_v9 = vcvt.f32.s32 %v1399_v50  ;;  %v4215_v50 = vld [vmem:[#allocation10_spill] sm:$0xff] }
 0xc2f   :  { %v1403_v19 = vadd.s32 %v1402_v46, %v1400_v9  ;;  %v4216_v46 = vld [vmem:[#allocation25_spill] sm:$0xff]  ;;  %v4217_v9 = vld [vmem:[#allocation26_spill] sm:$0xff] }
 0xc31   :  { %v1411_v59 = vsel %vm1410_vm4, %v2401_v61, %v1403_v19  ;;  %v4218_v61 = vld [vmem:[#allocation27_spill] sm:$0xff] }
 0xc32   :  { %1413 = vperm.xlu2 %2526, %v1411_v59   ;;  %v4219_v19 = vld [vmem:[#allocation11_spill] sm:$0xff]  ;;  %v4220_v59 = vld [vmem:[#allocation29_spill] sm:$0xff] }
 0xc8c   :  { %v1414_v5 = vpop.permute.xlu2 %1413 }
 0xc8d   :  { %vm1415_vm5 = vcmp.eq.s32.totalorder %v4205_v58, %v1414_v5  ;;  %v4221_v5 = vld [vmem:[#allocation30_spill] sm:$0xff] }
 0xc8e   :  { %vm2403_vm6 = vmpackc.low %vm1415_vm5, %vm1415_vm5 }
 0xc8f   :  { %2404 = vmatmul.msk.bf16.vlgmr.msra.gmra.mxu0 %vm2403_vm6, %v4206_v33  ;;  %2406 = vmatmul.msk.bf16.vlgmr.msra.gmra.mxu1 %vm2403_vm6, %v4206_v33 }
 0xc90   :  { %2408 = vmatmul.msk.bf16.vlgmr.msra.gmra.mxu2 %vm2403_vm6, %v4206_v33  ;;  %2410 = vmatmul.msk.bf16.vlgmr.msra.gmra.mxu3 %vm2403_vm6, %v4206_v33  ;;  %v4241_v33 = vld [vmem:[#allocation51_spill] sm:$0xff] }
 0xc91   :  { %1679 = vmatpush.bf16.msra.mxu0 %v4207_v16  ;;  %1692 = vmatpush.bf16.msra.mxu1 %v4208_v29 }
 0xc92   :  { %1705 = vmatpush.bf16.msra.mxu2 %v4209_v43  ;;  %1718 = vmatpush.bf16.msra.mxu3 %v4210_v49  ;;  %v4239_v49 = vld [vmem:[#allocation49_spill] sm:$0xff]  ;;  %v4240_v43 = vld [vmem:[#allocation50_spill] sm:$0xff] }
 0xc95   :  { %1680 = vmatpush.bf16.msra.mxu0 %v4211_v62  ;;  %1693 = vmatpush.bf16.msra.mxu1 %v4212_v0  ;;  %v4222_v62 = vld [vmem:[#allocation31_spill] sm:$0xff]  ;;  %v4223_v0 = vld [vmem:[#allocation12_spill] sm:$0xff] }
 0xc96   :  { %1706 = vmatpush.bf16.msra.mxu2 %v4213_v15  ;;  %1719 = vmatpush.bf16.msra.mxu3 %v4214_v55  ;;  %v4224_v15 = vld [vmem:[#allocation33_spill] sm:$0xff]  ;;  %v4225_v55 = vld [vmem:[#allocation34_spill] sm:$0xff] }
 0xc99   :  { %1681 = vmatpush.bf16.msra.mxu0 %v4215_v50  ;;  %1694 = vmatpush.bf16.msra.mxu1 %v4216_v46  ;;  %v4226_v50 = vld [vmem:[#allocation35_spill] sm:$0xff]  ;;  %v4227_v46 = vld [vmem:[#allocation13_spill] sm:$0xff] }
 0xc9a   :  { %1707 = vmatpush.bf16.msra.mxu2 %v4217_v9  ;;  %1720 = vmatpush.bf16.msra.mxu3 %v4218_v61  ;;  %v4228_v9 = vld [vmem:[#allocation37_spill] sm:$0xff]  ;;  %v4229_v61 = vld [vmem:[#allocation38_spill] sm:$0xff] }
 0xc9d   :  { %1682 = vmatpush.bf16.msra.mxu0 %v4219_v19  ;;  %1695 = vmatpush.bf16.msra.mxu1 %v4220_v59  ;;  %v4230_v19 = vld [vmem:[#allocation39_spill] sm:$0xff] }
 0xc9e   :  { %1708 = vmatpush.bf16.msra.mxu2 %v4221_v5  ;;  %1721 = vmatpush.bf16.msra.mxu3 %v4222_v62  ;;  %v4231_v59 = vld [vmem:[#allocation15_spill] sm:$0xff]  ;;  %v4232_v5 = vld [vmem:[#allocation41_spill] sm:$0xff]  ;;  %v4233_v62 = vld [vmem:[#allocation42_spill] sm:$0xff] }
 0xca1   :  { %1683 = vmatpush.bf16.msra.mxu0 %v4223_v0  ;;  %1696 = vmatpush.bf16.msra.mxu1 %v4224_v15  ;;  %v4234_v0 = vld [vmem:[#allocation43_spill] sm:$0xff] }
 0xca2   :  { %1709 = vmatpush.bf16.msra.mxu2 %v4225_v55  ;;  %1722 = vmatpush.bf16.msra.mxu3 %v4226_v50  ;;  %v4235_v15 = vld [vmem:[#allocation19_spill] sm:$0xff]  ;;  %v4236_v55 = vld [vmem:[#allocation45_spill] sm:$0xff]  ;;  %v4237_v50 = vld [vmem:[#allocation46_spill] sm:$0xff] }
 0xca5   :  { %1684 = vmatpush.bf16.msra.mxu0 %v4227_v46  ;;  %1697 = vmatpush.bf16.msra.mxu1 %v4228_v9  ;;  %v4238_v46 = vld [vmem:[#allocation47_spill] sm:$0xff] }
 0xca6   :  { %1710 = vmatpush.bf16.msra.mxu2 %v4229_v61  ;;  %1723 = vmatpush.bf16.msra.mxu3 %v4230_v19 }
 0xca9   :  { %1685 = vmatpush.bf16.msra.mxu0 %v4231_v59  ;;  %1698 = vmatpush.bf16.msra.mxu1 %v4232_v5 }
 0xcaa   :  { %1711 = vmatpush.bf16.msra.mxu2 %v4233_v62  ;;  %1724 = vmatpush.bf16.msra.mxu3 %v4234_v0 }
 0xcad   :  { %1686 = vmatpush.bf16.msra.mxu0 %v4235_v15  ;;  %1699 = vmatpush.bf16.msra.mxu1 %v4236_v55 }
 0xcae   :  { %1712 = vmatpush.bf16.msra.mxu2 %v4237_v50  ;;  %1725 = vmatpush.bf16.msra.mxu3 %v4238_v46 }
 0xd0c   :  { %v1480_v9 = vpop.f32.mrf.mxu0  ;;  %v1493_v61 = vpop.f32.mrf.mxu1 }
 0xd0d   :  { %v1481_v19 = vadd.f32 %v1480_v9, %v3686_v3  ;;  %v1494_v59 = vadd.f32 %v1493_v61, %v3688_v13 }
 0xd0f   :  { %v1523_v5 = vadd.f32 %v1481_v19, %v4239_v49  ;;  %v1524_v62 = vadd.f32 %v1494_v59, %v4240_v43 }
 0xd11   :  { %v2411_v29 = vmul.f32 -1.442695, %v1523_v5  ;;  %v2412_v0 = vmul.f32 -1.442695, %v1524_v62 }
 0xd13   :  { %2593 = vpow2.f32 %v2411_v29  ;;  %v1506_v15 = vpop.f32.mrf.mxu2  ;;  %v1519_v16 = vpop.f32.mrf.mxu3 }
 0xd14   :  { %2595 = vpow2.f32 %v2412_v0  ;;  %v1520_v50 = vadd.f32 %v1519_v16, %v3702_v20  ;;  %v1482_v55 = vpop.f32.mrf.mxu0  ;;  %v1495_v46 = vpop.f32.mrf.mxu1  ;;  %v1507_v29 = vadd.f32 %v1506_v15, %v3696_v7  ;;  %v4242_v20 = vld [vmem:[#allocation52_spill] sm:$0xff] }
 0xd16   :  { %v1526_v58 = vadd.f32 %v1520_v50, %v4241_v33  ;;  %v1525_v16 = vadd.f32 %v1507_v29, %v4242_v20 }
 0xd18   :  { %v2413_v23 = vmul.f32 -1.442695, %v1526_v58 }
 0xd19   :  { %v2594_v3 = vpop.eup %2593 }
 0xd1a   :  { %v2596_v9 = vpop.eup %2595  ;;  %v1530_v13 = vadd.f32 1.0, %v2594_v3  ;;  %2597 = vpow2.f32 %v2413_v23 }
 0xd1b   :  { %v1549_v61 = vadd.f32 1.0, %v2596_v9  ;;  %v1508_v19 = vpop.f32.mrf.mxu2  ;;  %v1521_v59 = vpop.f32.mrf.mxu3 }
 0xd1c   :  { %2599 = vrcp.f32 %v1530_v13  ;;  %v1542_v3 = vand.u32 2147483648, %v1530_v13  ;;  %v1540_v19 = vand.u32 2147483647, %v1530_v13  ;;  %vm1536_vm9 = vweird.f32 %v1530_v13 }
 0xd1d   :  { %2601 = vrcp.f32 %v1549_v61  ;;  %v1561_v23 = vand.u32 2147483648, %v1549_v61  ;;  %v1559_v7 = vand.u32 2147483647, %v1549_v61  ;;  %vm1555_vm10 = vweird.f32 %v1549_v61 }
 0xd1e   :  { %v1543_v29 = vor.u32 1.1754944e-38, %v1542_v3  ;;  %vm1541_vm13 = vcmp.eq.f32.partialorder %v1540_v19, 8.507059e+37 }
 0xd1f   :  { %vm1560_vm14 = vcmp.eq.f32.partialorder %v1559_v7, 8.507059e+37  ;;  %v4250_v7 = vld [vmem:[#allocation16_spill] sm:$0xff] }
 0xd20   :  { %v2598_v62 = vpop.eup %2597 }
 0xd21   :  { %v1569_v0 = vadd.f32 1.0, %v2598_v62 }
 0xd22   :  { %v2600_v5 = vpop.eup %2599 }
 0xd23   :  { %v2602_v55 = vpop.eup %2601  ;;  %v1532_v46 = vmul.f32 %v2600_v5, %v1530_v13  ;;  %2603 = vrcp.f32 %v1569_v0  ;;  %vm1537_vm7 = vweird.f32 %v2600_v5  ;;  %v1581_v3 = vand.u32 2147483648, %v1569_v0 }
 0xd24   :  { %v1551_v58 = vmul.f32 %v2602_v55, %v1549_v61  ;;  %2605 = vtanh.f32 %v1525_v16  ;;  %vm1556_vm8 = vweird.f32 %v2602_v55  ;;  %vm1538_vm11 = vmor %vm1536_vm9, %vm1537_vm7  ;;  %vm1575_vm0 = vweird.f32 %v1569_v0 }
 0xd25   :  { %v1533_v50 = vsub.f32 1.0, %v1532_v46  ;;  %vm1557_vm12 = vmor %vm1555_vm10, %vm1556_vm8  ;;  %v1562_v46 = vor.u32 1.1754944e-38, %v1561_v23  ;;  %v1582_v19 = vor.u32 1.1754944e-38, %v1581_v3  ;;  %v4261_v3 = vld [vmem:[#allocation11_spill] sm:$0xff] }
 0xd26   :  { %v1552_v43 = vsub.f32 1.0, %v1551_v58 }
 0xd27   :  { %v1534_v9 = vmul.f32 %v2600_v5, %v1533_v50 }
 0xd28   :  { %v1553_v59 = vmul.f32 %v2602_v55, %v1552_v43 }
 0xd29   :  { %v2604_v15 = vpop.eup %2603  ;;  %v1535_v62 = vadd.f32 %v2600_v5, %v1534_v9 }
 0xd2a   :  { %v1554_v20 = vadd.f32 %v2602_v55, %v1553_v59  ;;  %v1571_v33 = vmul.f32 %v2604_v15, %v1569_v0  ;;  %v2606_v16 = vpop.eup %2605  ;;  %vm1576_vm15 = vweird.f32 %v2604_v15  ;;  %v4249_v59 = vld [vmem:[#allocation8_spill] sm:$0xff] }
 0xd2b   :  { %v1539_v58 = vsel %vm1538_vm11, %v2600_v5, %v1535_v62  ;;  %v1579_v5 = vand.u32 2147483647, %v1569_v0  ;;  %vm1577_vm1 = vmor %vm1575_vm0, %vm1576_vm15  ;;  %v4248_v0 = vmov 1.0|1.0   ;;  %v4252_v62 = vld [vmem:[#allocation20_spill] sm:$0xff] }
 0xd2c   :  { %v1544_v49 = vsel %vm1541_vm13, %v1543_v29, %v1539_v58  ;;  %v1558_v50 = vsel %vm1557_vm12, %v2602_v55, %v1554_v20  ;;  %v1572_v41 = vsub.f32 1.0, %v1571_v33  ;;  %v4253_v29 = vld [vmem:[#allocation9_spill] sm:$0xff]  ;;  %v4255_v58 = vld [vmem:[#allocation22_spill] sm:$0xff] }
 0xd2d   :  { %v1563_v43 = vsel %vm1560_vm14, %v1562_v46, %v1558_v50  ;;  %v1586_v39 = vmul.f32 %v2606_v16, %v1544_v49  ;;  %vm1580_vm2 = vcmp.eq.f32.partialorder %v1579_v5, 8.507059e+37  ;;  %v4254_v46 = vld [vmem:[#allocation21_spill] sm:$0xff]  ;;  %v4256_v16 = vld [vmem:[#allocation23_spill] sm:$0xff]  ;;  %v4257_v50 = vld [vmem:[#allocation10_spill] sm:$0xff] }
 0xd2e   :  { %v1585_v36 = vmul.f32 %v1563_v43, %v3643_v27  ;;  %v1573_v9 = vmul.f32 %v2604_v15, %v1572_v41  ;;  %v2416_v27 = vld [vmem:[%s3924_s1 + $0x28] sm:$0xff] }
 0xd2f   :  { %v4258_v43 = vld [vmem:[#allocation25_spill] sm:$0xff] }
 0xd30   :  { %v3754_v13 = vadd.f32 %v1586_v39, %v1585_v36  ;;  %v1574_v61 = vadd.f32 %v2604_v15, %v1573_v9  ;;  %v4259_v9 = vld [vmem:[#allocation26_spill] sm:$0xff]  ;;  %v4262_v5 = vld [vmem:[#allocation29_spill] sm:$0xff] }
 0xd32   :  { %2607 = vtanh.f32 %v3754_v13  ;;  %v1578_v23 = vsel %vm1577_vm1, %v2604_v15, %v1574_v61  ;;  %v4251_v15 = vld [vmem:[#allocation18_spill] sm:$0xff]  ;;  %v4260_v61 = vld [vmem:[#allocation27_spill] sm:$0xff] }
 0xd33   :  { %v1583_v33 = vsel %vm1580_vm2, %v1582_v19, %v1578_v23  ;;  %v4263_v23 = vld [vmem:[#allocation30_spill] sm:$0xff]  ;;  %v4264_v19 = vld [vmem:[#allocation31_spill] sm:$0xff] }
 0xd38   :  { %v2608_v20 = vpop.eup %2607 }
 0xd39   :  { %v1589_v55 = vmul.f32 %v2608_v20, %v1583_v33  ;;  %v4265_v20 = vld [vmem:[#allocation12_spill] sm:$0xff]  ;;  %v4266_v33 = vld [vmem:[#allocation33_spill] sm:$0xff] }
 0xd3b   :  { %v1590_v49 = vpack.c.bf16 %v1589_v55, %v1589_v55  ;;  %v4267_v55 = vld [vmem:[#allocation34_spill] sm:$0xff] }
 0xd3d   :  { %1599 = vmatmul.bf16.vlgmr.msrb.gmra.mxu0 %v1590_v49  ;;  %1648 = vmatmul.bf16.vlgmr.msrb.gmra.mxu1 %v1590_v49 }
 0xd3e   :  { %1661 = vmatmul.bf16.vlgmr.msrb.gmra.mxu2 %v1590_v49  ;;  %1674 = vmatmul.bf16.vlgmr.msrb.gmra.mxu3 %v1590_v49 }
 0xd3f   :  { %1731 = vmatpush.bf16.msrb.mxu0 %v2902_v11  ;;  %1812 = vmatpush.bf16.msrb.mxu1 %v3504_v54 }
 0xd40   :  { %1861 = vmatpush.bf16.msrb.mxu2 %v2761_v4  ;;  %1874 = vmatpush.bf16.msrb.mxu3 %v2766_v8  ;;  %v4243_v4 = vld [vmem:[#allocation14_spill] sm:$0xff]  ;;  %v4244_v8 = vld [vmem:[#allocation17_spill] sm:$0xff] }
 0xd43   :  { %1732 = vmatpush.bf16.msrb.mxu0 %v4084_v26  ;;  %1813 = vmatpush.bf16.msrb.mxu1 %v3513_v56 }
 0xd44   :  { %1862 = vmatpush.bf16.msrb.mxu2 %v2774_v17  ;;  %1875 = vmatpush.bf16.msrb.mxu3 %v2777_v21  ;;  %v4245_v21 = vld [vmem:[#allocation32_spill] sm:$0xff] }
 0xd47   :  { %1733 = vmatpush.bf16.msrb.mxu0 %v4085_v42  ;;  %1814 = vmatpush.bf16.msrb.mxu1 %v3522_v32 }
 0xd48   :  { %1863 = vmatpush.bf16.msrb.mxu2 %v2785_v30  ;;  %1876 = vmatpush.bf16.msrb.mxu3 %v2788_v34 }
 0xd4b   :  { %1734 = vmatpush.bf16.msrb.mxu0 %v4086_v1  ;;  %1815 = vmatpush.bf16.msrb.mxu1 %v3531_v22 }
 0xd4c   :  { %1864 = vmatpush.bf16.msrb.mxu2 %v2797_v45  ;;  %1877 = vmatpush.bf16.msrb.mxu3 %v2800_v48 }
 0xd4d   :  { %1687 = vmatmul.bf16.vlgmr.msra.gmra.mxu0 %v1590_v49  ;;  %v4268_v49 = vld [vmem:[#allocation35_spill] sm:$0xff] }
 0xd4f   :  { %1735 = vmatpush.bf16.msrb.mxu0 %v4087_v35  ;;  %1816 = vmatpush.bf16.msrb.mxu1 %v3540_v44  ;;  %v1630_v44 = vstv %s1629_s11 }
 0xd50   :  { %1865 = vmatpush.bf16.msrb.mxu2 %v2809_v57  ;;  %1878 = vmatpush.bf16.msrb.mxu3 %v2812_v60  ;;  %vm1631_vm5 = vcmp.eq.s32.totalorder %v1630_v44, 1 }
 0xd53   :  { %1736 = vmatpush.bf16.msrb.mxu0 %v4088_v40  ;;  %1817 = vmatpush.bf16.msrb.mxu1 %v3549_v52 }
 0xd54   :  { %1866 = vmatpush.bf16.msrb.mxu2 %v2821_v6  ;;  %1879 = vmatpush.bf16.msrb.mxu3 %v2824_v10 }
 0xd57   :  { %1737 = vmatpush.bf16.msrb.mxu0 %v4089_v18  ;;  %1818 = vmatpush.bf16.msrb.mxu1 %v3558_v2 }
 0xd58   :  { %1867 = vmatpush.bf16.msrb.mxu2 %v2833_v24  ;;  %1880 = vmatpush.bf16.msrb.mxu3 %v2836_v31 }
 0xd5b   :  { %1738 = vmatpush.bf16.msrb.mxu0 %v3146_v37  ;;  %1819 = vmatpush.bf16.msrb.mxu1 %v3567_v28 }
 0xd5c   :  { %1868 = vmatpush.bf16.msrb.mxu2 %v2857_v47  ;;  %1881 = vmatpush.bf16.msrb.mxu3 %v2866_v53 }
 0xd5f   :  { %1887 = vmatpush.bf16.msra.mxu0 %v2769_v12 }
 0xd63   :  { %1888 = vmatpush.bf16.msra.mxu0 %v2780_v25  ;;  %v4246_v25 = vld [vmem:[#allocation28_spill] sm:$0xff] }
 0xd67   :  { %1889 = vmatpush.bf16.msra.mxu0 %v2791_v38 }
 0xd6b   :  { %1890 = vmatpush.bf16.msra.mxu0 %v2803_v51 }
 0xd6f   :  { %1891 = vmatpush.bf16.msra.mxu0 %v2815_v63 }
 0xd73   :  { %1892 = vmatpush.bf16.msra.mxu0 %v2827_v14  ;;  %v4247_v14 = vld [vmem:[#allocation48_spill] sm:$0xff] }
 0xd77   :  { %1893 = vmatpush.bf16.msra.mxu0 %v4243_v4  ;;  %v4269_v4 = vld [vmem:[#allocation13_spill] sm:$0xff] }
 0xd7b   :  { %1894 = vmatpush.bf16.msra.mxu0 %v4244_v8  ;;  %v4270_v8 = vld [vmem:[#allocation37_spill] sm:$0xff] }
 0xdba   :  { %v1600_v17 = vpop.f32.mrf.mxu0  ;;  %v3797_v12 = vpop.f32.mrf.mxu1 }
 0xdbb   :  { %v1601_v30 = vadd.f32 %v4245_v21, %v1600_v17  ;;  %v4271_v17 = vld [vmem:[#allocation38_spill] sm:$0xff] }
 0xdbd   :  { %2414 = vst [vmem:[%s3931_s8 + $0x28] sm:$0xff] %v1601_v30  ;;  %v1606_v34 = vadd.f32 %v1601_v30, %v4246_v25  ;;  %v4272_v30 = vld [vmem:[#allocation39_spill] sm:$0xff] }
 0xdbf   :  { %1607 = vmax.xlane.f32.xlu0 %v1606_v34 }
 0xdc1   :  { %v3804_v38 = vpop.f32.mrf.mxu2  ;;  %v3806_v45 = vpop.f32.mrf.mxu3 }
 0xdc2   :  { %v1602_v48 = vpop.f32.mrf.mxu0  ;;  %v1651_v51 = vpop.f32.mrf.mxu1 }
 0xdc3   :  { %v4274_v48 = vld [vmem:[#allocation41_spill] sm:$0xff]  ;;  %v4275_v51 = vld [vmem:[#allocation42_spill] sm:$0xff] }
 0xdc9   :  { %v1664_v57 = vpop.f32.mrf.mxu2  ;;  %v1677_v60 = vpop.f32.mrf.mxu3 }
 0xdca   :  { %v3808_v63 = vpop.f32.mrf.mxu0  ;;  %v4276_v57 = vld [vmem:[#allocation43_spill] sm:$0xff] }
 0xdcb   :  { %v4277_v60 = vld [vmem:[#allocation19_spill] sm:$0xff] }
 0xdd2   :  { %v1690_v6 = vpop.f32.mrf.mxu0 }
 0xdd3   :  { %v4278_v6 = vld [vmem:[#allocation45_spill] sm:$0xff] }
 0xe32   :  { %v1608_v10 = vpop.xlane.xlu0 %1607 }
 0xe33   :  { %vm1609_vm3 = vcmp.eq.f32.partialorder %v1606_v34, %v1608_v10  ;;  %v4273_v34 = vld [vmem:[#allocation15_spill] sm:$0xff]  ;;  %v4279_v10 = vld [vmem:[#allocation46_spill] sm:$0xff] }
 0xe34   :  { %v1610_v24 = vsel %vm1609_vm3, %v4247_v14, 128 }
 0xe35   :  { %v1612_v31 = vshra.s32 %v1610_v24, 16  ;;  %v1611_v53 = vand.u32 65535, %v1610_v24  ;;  %v4280_v24 = vld [vmem:[#allocation47_spill] sm:$0xff] }
 0xe37   :  { %v1614_v47 = vcvt.s32.f32 %v1612_v31  ;;  %v1613_v56 = vcvt.s32.f32 %v1611_v53 }
 0xe39   :  { %1615 = vmin.xlane.f32.xlu2 %v1614_v47 }
 0xeac   :  { %v1616_v54 = vpop.xlane.xlu2 %1615 }
 0xead   :  { %vm1617_vm4 = vcmp.eq.f32.partialorder %v1614_v47, %v1616_v54  ;;  %v1622_v22 = vcvt.f32.s32 %v1616_v54 }
 0xeae   :  { %v1618_v32 = vsel %vm1617_vm4, %v1613_v56, inf  ;;  %v4281_v56 = vld [vmem:[#allocation49_spill] sm:$0xff] }
 0xeaf   :  { %1619 = vmin.xlane.f32.xlu0 %v1618_v32  ;;  %v1623_v2 = vshll.u32 %v1622_v22, 16  ;;  %v4282_v22 = vld [vmem:[#allocation51_spill] sm:$0xff] }
 0xf22   :  { %v1620_v52 = vpop.xlane.xlu0 %1619 }
 0xf23   :  { %v1621_v28 = vcvt.f32.s32 %v1620_v52 }
 0xf25   :  { %v1624_v36 = vadd.s32 %v1623_v2, %v1621_v28 }
 0xf27   :  { %v1632_v39 = vsel %vm1631_vm5, %v2416_v27, %v1624_v36 }
 0xf28   :  { %1634 = vperm.xlu0 %2525, %v1632_v39  }
 0xf9a   :  { %v1635_v41 = vpop.permute.xlu0 %1634 }
 0xf9b   :  { %vm1636_vm6 = vcmp.eq.s32.totalorder %v4247_v14, %v1635_v41  ;;  %v4283_v41 = vld [vmem:[#allocation50_spill] sm:$0xff] }
 0xf9c   :  { %vm2418_vm7 = vmpackc.low %vm1636_vm6, %vm1636_vm6 }
 0xf9d   :  { %2419 = vmatmul.msk.bf16.vlgmr.msra.gmra.mxu1 %vm2418_vm7, %v4248_v0  ;;  %2421 = vmatmul.msk.bf16.vlgmr.msra.gmra.mxu2 %vm2418_vm7, %v4248_v0 }
 0xf9e   :  { %2423 = vmatmul.msk.bf16.vlgmr.msra.gmra.mxu3 %vm2418_vm7, %v4248_v0  ;;  %2425 = vmatmul.msk.bf16.vlgmr.msrb.gmra.mxu0 %vm2418_vm7, %v4248_v0 }
 0xf9f   :  { %1900 = vmatpush.bf16.msra.mxu1 %v4249_v59  ;;  %1913 = vmatpush.bf16.msra.mxu2 %v4250_v7 }
 0xfa0   :  { %1926 = vmatpush.bf16.msra.mxu3 %v4251_v15  ;;  %1939 = vmatpush.bf16.msrb.mxu0 %v4252_v62 }
 0xfa3   :  { %1901 = vmatpush.bf16.msra.mxu1 %v4253_v29  ;;  %1914 = vmatpush.bf16.msra.mxu2 %v4254_v46 }
 0xfa4   :  { %1927 = vmatpush.bf16.msra.mxu3 %v4255_v58  ;;  %1940 = vmatpush.bf16.msrb.mxu0 %v4256_v16 }
 0xfa7   :  { %1902 = vmatpush.bf16.msra.mxu1 %v4257_v50  ;;  %1915 = vmatpush.bf16.msra.mxu2 %v4258_v43 }
 0xfa8   :  { %1928 = vmatpush.bf16.msra.mxu3 %v4259_v9  ;;  %1941 = vmatpush.bf16.msrb.mxu0 %v4260_v61 }
 0xfab   :  { %1903 = vmatpush.bf16.msra.mxu1 %v4261_v3  ;;  %1916 = vmatpush.bf16.msra.mxu2 %v4262_v5 }
 0xfac   :  { %1929 = vmatpush.bf16.msra.mxu3 %v4263_v23  ;;  %1942 = vmatpush.bf16.msrb.mxu0 %v4264_v19  ;;  %v4284_v19 = vld [vmem:[#allocation52_spill] sm:$0xff] }
 0xfaf   :  { %1904 = vmatpush.bf16.msra.mxu1 %v4265_v20  ;;  %1917 = vmatpush.bf16.msra.mxu2 %v4266_v33 }
 0xfb0   :  { %1930 = vmatpush.bf16.msra.mxu3 %v4267_v55  ;;  %1943 = vmatpush.bf16.msrb.mxu0 %v4268_v49 }
 0xfb3   :  { %1905 = vmatpush.bf16.msra.mxu1 %v4269_v4  ;;  %1918 = vmatpush.bf16.msra.mxu2 %v4270_v8 }
 0xfb4   :  { %1931 = vmatpush.bf16.msra.mxu3 %v4271_v17  ;;  %1944 = vmatpush.bf16.msrb.mxu0 %v4272_v30 }
 0xfb7   :  { %1906 = vmatpush.bf16.msra.mxu1 %v4273_v34  ;;  %1919 = vmatpush.bf16.msra.mxu2 %v4274_v48 }
 0xfb8   :  { %1932 = vmatpush.bf16.msra.mxu3 %v4275_v51  ;;  %1945 = vmatpush.bf16.msrb.mxu0 %v4276_v57 }
 0xfbb   :  { %1907 = vmatpush.bf16.msra.mxu1 %v4277_v60  ;;  %1920 = vmatpush.bf16.msra.mxu2 %v4278_v6 }
 0xfbc   :  { %1933 = vmatpush.bf16.msra.mxu3 %v4279_v10  ;;  %1946 = vmatpush.bf16.msrb.mxu0 %v4280_v24 }
0x101a   :  { %v1701_v31 = vpop.f32.mrf.mxu1 }
0x101b   :  { %v1702_v47 = vadd.f32 %v1701_v31, %v3797_v12  ;;  %v1740_v53 = vpop.f32.mrf.mxu0 }
0x101c   :  { %v1741_v54 = vadd.f32 %v1740_v53, %v3808_v63 }
0x101d   :  { %v1744_v32 = vadd.f32 %v1702_v47, %v4281_v56 }
0x101e   :  { %v1747_v44 = vadd.f32 %v1741_v54, %v4282_v22 }
0x101f   :  { %v2426_v52 = vmul.f32 -1.442695, %v1744_v32 }
0x1020   :  { %v2428_v2 = vmul.f32 -1.442695, %v1747_v44  ;;  %v1714_v28 = vpop.f32.mrf.mxu2 }
0x1021   :  { %2609 = vpow2.f32 %v2426_v52  ;;  %v1715_v27 = vadd.f32 %v1714_v28, %v3804_v38  ;;  %v1727_v36 = vpop.f32.mrf.mxu3 }
0x1022   :  { %2611 = vpow2.f32 %v2428_v2  ;;  %v1703_v39 = vpop.f32.mrf.mxu1  ;;  %v1728_v9 = vadd.f32 %v1727_v36, %v3806_v45 }
0x1023   :  { %v1745_v59 = vadd.f32 %v1715_v27, %v4283_v41  ;;  %v1742_v7 = vpop.f32.mrf.mxu0 }
0x1024   :  { %v1746_v20 = vadd.f32 %v1728_v9, %v4284_v19 }
0x1025   :  { %v2427_v12 = vmul.f32 -1.442695, %v1745_v59 }
0x1027   :  { %v2610_v15 = vpop.eup %2609  ;;  %2613 = vpow2.f32 %v2427_v12 }
0x1028   :  { %v2612_v63 = vpop.eup %2611  ;;  %v1751_v62 = vadd.f32 1.0, %v2610_v15  ;;  %v1716_v29 = vpop.f32.mrf.mxu2  ;;  %v2651_v15 = vld [vmem:[%s3929_s6 + $0x30] sm:$0xff] }
0x1029   :  { %v1729_v46 = vpop.f32.mrf.mxu3  ;;  %v1790_v58 = vadd.f32 1.0, %v2612_v63  ;;  %v2652_v63 = vld [vmem:[%s3929_s6 + $0x28] sm:$0xff] }
0x102a   :  { %2615 = vrcp.f32 %v1751_v62  ;;  %v1763_v4 = vand.u32 2147483648, %v1751_v62  ;;  %vm1757_vm9 = vweird.f32 %v1751_v62  ;;  %v1761_v17 = vand.u32 2147483647, %v1751_v62 }
0x102b   :  { %2617 = vrcp.f32 %v1790_v58  ;;  %v1802_v2 = vand.u32 2147483648, %v1790_v58  ;;  %vm1796_vm1 = vweird.f32 %v1790_v58  ;;  %v1800_v28 = vand.u32 2147483647, %v1790_v58 }
0x102c   :  { %v1764_v57 = vor.u32 1.1754944e-38, %v1763_v4  ;;  %vm1762_vm13 = vcmp.eq.f32.partialorder %v1761_v17, 8.507059e+37 }
0x102d   :  { %v2614_v16 = vpop.eup %2613  ;;  %v1803_v36 = vor.u32 1.1754944e-38, %v1802_v2  ;;  %vm1801_vm3 = vcmp.eq.f32.partialorder %v1800_v28, 8.507059e+37 }
0x102e   :  { %v1770_v50 = vadd.f32 1.0, %v2614_v16 }
0x1030   :  { %v2616_v43 = vpop.eup %2615  ;;  %2619 = vrcp.f32 %v1770_v50  ;;  %v1782_v30 = vand.u32 2147483648, %v1770_v50  ;;  %v1780_v48 = vand.u32 2147483647, %v1770_v50  ;;  %vm1776_vm12 = vweird.f32 %v1770_v50 }
0x1031   :  { %v1753_v38 = vmul.f32 %v2616_v43, %v1751_v62  ;;  %v2618_v3 = vpop.eup %2617  ;;  %vm1758_vm8 = vweird.f32 %v2616_v43  ;;  %2621 = vtanh.f32 %v1746_v20 }
0x1032   :  { %v1792_v49 = vmul.f32 %v2618_v3, %v1790_v58  ;;  %vm1759_vm10 = vmor %vm1757_vm9, %vm1758_vm8  ;;  %v1783_v6 = vor.u32 1.1754944e-38, %v1782_v30  ;;  %vm1781_vm15 = vcmp.eq.f32.partialorder %v1780_v48, 8.507059e+37  ;;  %vm1797_vm0 = vweird.f32 %v2618_v3  ;;  %v2431_v30 = vld [vmem:[%s3924_s1 + $0x30] sm:$0xff] }
0x1033   :  { %v1754_v61 = vsub.f32 1.0, %v1753_v38  ;;  %vm1798_vm2 = vmor %vm1796_vm1, %vm1797_vm0 }
0x1034   :  { %v1793_v51 = vsub.f32 1.0, %v1792_v49 }
0x1035   :  { %v1755_v5 = vmul.f32 %v2616_v43, %v1754_v61 }
0x1036   :  { %v2620_v23 = vpop.eup %2619  ;;  %v1794_v47 = vmul.f32 %v2618_v3, %v1793_v51 }
0x1037   :  { %v1772_v33 = vmul.f32 %v2620_v23, %v1770_v50  ;;  %v1756_v55 = vadd.f32 %v2616_v43, %v1755_v5  ;;  %vm1777_vm11 = vweird.f32 %v2620_v23  ;;  %v2622_v31 = vpop.eup %2621 }
0x1038   :  { %vm1778_vm14 = vmor %vm1776_vm12, %vm1777_vm11  ;;  %v1795_v52 = vadd.f32 %v2618_v3, %v1794_v47 }
0x1039   :  { %v1773_v8 = vsub.f32 1.0, %v1772_v33  ;;  %v1760_v45 = vsel %vm1759_vm10, %v2616_v43, %v1756_v55 }
0x103a   :  { %v1765_v10 = vsel %vm1762_vm13, %v1764_v57, %v1760_v45  ;;  %v1799_v27 = vsel %vm1798_vm2, %v2618_v3, %v1795_v52 }
0x103b   :  { %v1774_v34 = vmul.f32 %v2620_v23, %v1773_v8  ;;  %v1807_v32 = vmul.f32 %v2622_v31, %v1765_v10  ;;  %v1804_v59 = vsel %vm1801_vm3, %v1803_v36, %v1799_v27 }
0x103d   :  { %v1775_v60 = vadd.f32 %v2620_v23, %v1774_v34 }
0x103f   :  { %v1779_v24 = vsel %vm1778_vm14, %v2620_v23, %v1775_v60 }
0x1040   :  { %v1784_v53 = vsel %vm1781_vm15, %v1783_v6, %v1779_v24 }
0x1041   :  { %v1806_v54 = vmul.f32 %v1784_v53, %v3754_v13  ;;  %v2650_v13 = vld [vmem:[%s3929_s6 + $0x38] sm:$0xff] }
0x1043   :  { %v3860_v44 = vadd.f32 %v1807_v32, %v1806_v54 }
0x1045   :  { %2623 = vtanh.f32 %v3860_v44 }
0x104b   :  { %v2624_v39 = vpop.eup %2623 }
0x104c   :  { %v1810_v7 = vmul.f32 %v2624_v39, %v1804_v59 }
0x104e   :  { %v1811_v12 = vpack.c.bf16 %v1810_v7, %v1810_v7 }
0x1050   :  { %1820 = vmatmul.bf16.vlgmr.msrb.gmra.mxu1 %v1811_v12  ;;  %1869 = vmatmul.bf16.vlgmr.msrb.gmra.mxu2 %v1811_v12 }
0x1051   :  { %1882 = vmatmul.bf16.vlgmr.msrb.gmra.mxu3 %v1811_v12  ;;  %1895 = vmatmul.bf16.vlgmr.msra.gmra.mxu0 %v1811_v12 }
0x1052   :  { %1952 = vmatpush.bf16.msrb.mxu1 %v2902_v11  ;;  %2033 = vmatpush.bf16.msrb.mxu2 %v2650_v13  ;;  %v2653_v11 = vld [vmem:[%s3929_s6 + $0x20] sm:$0xff] }
0x1056   :  { %1953 = vmatpush.bf16.msrb.mxu1 %v4084_v26  ;;  %2034 = vmatpush.bf16.msrb.mxu2 %v2651_v15  ;;  %v2654_v26 = vld [vmem:[%s3929_s6 + $0x18] sm:$0xff] }
0x105a   :  { %1954 = vmatpush.bf16.msrb.mxu1 %v4085_v42  ;;  %2035 = vmatpush.bf16.msrb.mxu2 %v2652_v63  ;;  %v2655_v42 = vld [vmem:[%s3929_s6 + $0x10] sm:$0xff] }
0x105e   :  { %1955 = vmatpush.bf16.msrb.mxu1 %v4086_v1  ;;  %2036 = vmatpush.bf16.msrb.mxu2 %v2653_v11  ;;  %v2656_v1 = vld [vmem:[%s3929_s6 + $0x8] sm:$0xff] }
0x1060   :  { %1908 = vmatmul.bf16.vlgmr.msra.gmra.mxu1 %v1811_v12 }
0x1062   :  { %1956 = vmatpush.bf16.msrb.mxu1 %v4087_v35  ;;  %2037 = vmatpush.bf16.msrb.mxu2 %v2654_v26  ;;  %v2657_v35 = vld [vmem:[%s3929_s6] sm:$0xff]  ;;  %s2430_s6 = sld [smem:[#allocation2 + $0x6]] }
0x1066   :  { %1957 = vmatpush.bf16.msrb.mxu1 %v4088_v40  ;;  %2038 = vmatpush.bf16.msrb.mxu2 %v2655_v42 }
0x1068   :  { %p1847_p5 = scmp.gt.s32.totalorder %s2430_s6, 0 }
0x106a   :  { %1958 = vmatpush.bf16.msrb.mxu1 %v4089_v18  ;;  %2039 = vmatpush.bf16.msrb.mxu2 %v2656_v1  ;;  %s1850_s27 = scalar_select %p1847_p5, 1, 0 }
0x106c   :  { %v1851_v49 = vstv %s1850_s27 }
0x106d   :  { %vm1852_vm6 = vcmp.eq.s32.totalorder %v1851_v49, 1 }
0x106e   :  { %1959 = vmatpush.bf16.msrb.mxu1 %v3146_v37  ;;  %2040 = vmatpush.bf16.msrb.mxu2 %v2657_v35 }
0x10cd   :  { %v1821_v40 = vpop.f32.mrf.mxu1 }
0x10ce   :  { %v1822_v62 = vadd.f32 %v4245_v21, %v1821_v40  ;;  %v3896_v29 = vpop.f32.mrf.mxu0 }
0x10d0   :  { %2429 = vst [vmem:[%s3931_s8 + $0x30] sm:$0xff] %v1822_v62  ;;  %v1827_v18 = vadd.f32 %v1822_v62, %v4246_v25 }
0x10d2   :  { %1828 = vmax.xlane.f32.xlu1 %v1827_v18 }
0x10d3   :  { %v1870_v46 = vpop.f32.mrf.mxu2 }
0x10d4   :  { %v1883_v58 = vpop.f32.mrf.mxu3 }
0x10d5   :  { %v1823_v37 = vpop.f32.mrf.mxu1 }
0x10d6   :  { %v1898_v16 = vpop.f32.mrf.mxu0 }
0x10db   :  { %v1872_v50 = vpop.f32.mrf.mxu2 }
0x10dc   :  { %v1885_v43 = vpop.f32.mrf.mxu3 }
0x10dd   :  { %v1909_v38 = vpop.f32.mrf.mxu1 }
0x10e5   :  { %v1911_v9 = vpop.f32.mrf.mxu1 }
0x1145   :  { %v1829_v61 = vpop.xlane.xlu1 %1828 }
0x1146   :  { %vm1830_vm4 = vcmp.eq.f32.partialorder %v1827_v18, %v1829_v61 }
0x1147   :  { %v1831_v21 = vsel %vm1830_vm4, %v4247_v14, 128 }
0x1148   :  { %v1833_v3 = vshra.s32 %v1831_v21, 16  ;;  %v1832_v23 = vand.u32 65535, %v1831_v21 }
0x114a   :  { %v1835_v5 = vcvt.s32.f32 %v1833_v3  ;;  %v1834_v33 = vcvt.s32.f32 %v1832_v23 }
0x114c   :  { %1836 = vmin.xlane.f32.xlu1 %v1835_v5 }
0x11bf   :  { %v1837_v20 = vpop.xlane.xlu1 %1836 }
0x11c0   :  { %vm1838_vm5 = vcmp.eq.f32.partialorder %v1835_v5, %v1837_v20  ;;  %v1843_v55 = vcvt.f32.s32 %v1837_v20 }
0x11c1   :  { %v1839_v25 = vsel %vm1838_vm5, %v1834_v33, inf }
0x11c2   :  { %1840 = vmin.xlane.f32.xlu1 %v1839_v25  ;;  %v1844_v8 = vshll.u32 %v1843_v55, 16 }
0x1235   :  { %v1841_v4 = vpop.xlane.xlu1 %1840 }
0x1236   :  { %v1842_v17 = vcvt.f32.s32 %v1841_v4 }
0x1238   :  { %v1845_v34 = vadd.s32 %v1844_v8, %v1842_v17 }
0x123a   :  { %v1853_v45 = vsel %vm1852_vm6, %v2431_v30, %v1845_v34 }
0x123b   :  { %1855 = vperm.xlu0 %2525, %v1853_v45  }
0x12ad   :  { %v1856_v48 = vpop.permute.xlu0 %1855 }
0x12ae   :  { %vm1857_vm7 = vcmp.eq.s32.totalorder %v4247_v14, %v1856_v48 }
0x12af   :  { %vm2433_vm8 = vmpackc.low %vm1857_vm7, %vm1857_vm7 }
0x12b0   :  { %2434 = vmatmul.msk.bf16.vlgmr.msra.gmra.mxu2 %vm2433_vm8, %v4248_v0  ;;  %2436 = vmatmul.msk.bf16.vlgmr.msra.gmra.mxu3 %vm2433_vm8, %v4248_v0 }
0x12b1   :  { %2438 = vmatmul.msk.bf16.vlgmr.msrb.gmra.mxu0 %vm2433_vm8, %v4248_v0  ;;  %2440 = vmatmul.msk.bf16.vlgmr.msrb.gmra.mxu1 %vm2433_vm8, %v4248_v0 }
0x132e   :  { %v1948_v51 = vpop.f32.mrf.mxu0  ;;  %v1961_v57 = vpop.f32.mrf.mxu1 }
0x132f   :  { %v1962_v60 = vadd.f32 %v1961_v57, %v1909_v38 }
0x1331   :  { %v1968_v6 = vadd.f32 %v1962_v60, %v4282_v22 }
0x1333   :  { %v2443_v10 = vmul.f32 -1.442695, %v1968_v6  ;;  %v1922_v24 = vpop.f32.mrf.mxu2  ;;  %v1935_v31 = vpop.f32.mrf.mxu3 }
0x1334   :  { %v1923_v47 = vadd.f32 %v1922_v24, %v1870_v46  ;;  %v1936_v53 = vadd.f32 %v1935_v31, %v1883_v58 }
0x1335   :  { %2625 = vpow2.f32 %v2443_v10 }
0x1336   :  { %v1965_v14 = vadd.f32 %v1923_v47, %v4281_v56  ;;  %v1966_v54 = vadd.f32 %v1936_v53, %v4283_v41  ;;  %v1950_v32 = vpop.f32.mrf.mxu0  ;;  %v1963_v52 = vpop.f32.mrf.mxu1  ;;  %v1949_v56 = vadd.f32 %v1948_v51, %v3896_v29 }
0x1338   :  { %v2441_v2 = vmul.f32 -1.442695, %v1965_v14  ;;  %v2442_v28 = vmul.f32 -1.442695, %v1966_v54  ;;  %v1967_v15 = vadd.f32 %v1949_v56, %v4284_v19 }
0x133a   :  { %2627 = vpow2.f32 %v2441_v2 }
0x133b   :  { %v2626_v0 = vpop.eup %2625  ;;  %2629 = vpow2.f32 %v2442_v28  ;;  %v1924_v27 = vpop.f32.mrf.mxu2 }
0x133c   :  { %v1937_v36 = vpop.f32.mrf.mxu3  ;;  %v2011_v22 = vadd.f32 1.0, %v2626_v0 }
0x133e   :  { %2631 = vrcp.f32 %v2011_v22  ;;  %v2023_v55 = vand.u32 2147483648, %v2011_v22  ;;  %vm2017_vm2 = vweird.f32 %v2011_v22  ;;  %v2021_v49 = vand.u32 2147483647, %v2011_v22 }
0x1340   :  { %v2628_v39 = vpop.eup %2627  ;;  %v2024_v8 = vor.u32 1.1754944e-38, %v2023_v55  ;;  %vm2022_vm4 = vcmp.eq.f32.partialorder %v2021_v49, 8.507059e+37 }
0x1341   :  { %v2630_v59 = vpop.eup %2629  ;;  %v1972_v7 = vadd.f32 1.0, %v2628_v39 }
0x1342   :  { %v1991_v12 = vadd.f32 1.0, %v2630_v59 }
0x1343   :  { %2633 = vrcp.f32 %v1972_v7  ;;  %v1984_v35 = vand.u32 2147483648, %v1972_v7  ;;  %v1982_v18 = vand.u32 2147483647, %v1972_v7  ;;  %vm1978_vm11 = vweird.f32 %v1972_v7 }
0x1344   :  { %2635 = vrcp.f32 %v1991_v12  ;;  %v2632_v41 = vpop.eup %2631  ;;  %v2003_v46 = vand.u32 2147483648, %v1991_v12  ;;  %v2001_v37 = vand.u32 2147483647, %v1991_v12  ;;  %vm1997_vm13 = vweird.f32 %v1991_v12 }
0x1345   :  { %v2013_v42 = vmul.f32 %v2632_v41, %v2011_v22  ;;  %2637 = vtanh.f32 %v1967_v15  ;;  %v1985_v19 = vor.u32 1.1754944e-38, %v1984_v35  ;;  %vm1983_vm14 = vcmp.eq.f32.partialorder %v1982_v18, 8.507059e+37 }
0x1346   :  { %v2004_v38 = vor.u32 1.1754944e-38, %v2003_v46  ;;  %vm2002_vm0 = vcmp.eq.f32.partialorder %v2001_v37, 8.507059e+37  ;;  %vm2018_vm1 = vweird.f32 %v2632_v41 }
0x1347   :  { %v2014_v29 = vsub.f32 1.0, %v2013_v42  ;;  %vm2019_vm3 = vmor %vm2017_vm2, %vm2018_vm1 }
0x1349   :  { %v2634_v13 = vpop.eup %2633  ;;  %v2015_v3 = vmul.f32 %v2632_v41, %v2014_v29 }
0x134a   :  { %v2636_v63 = vpop.eup %2635  ;;  %v1974_v11 = vmul.f32 %v2634_v13, %v1972_v7  ;;  %vm1979_vm9 = vweird.f32 %v2634_v13 }
0x134b   :  { %v1993_v26 = vmul.f32 %v2636_v63, %v1991_v12  ;;  %vm1998_vm10 = vweird.f32 %v2636_v63  ;;  %vm1980_vm12 = vmor %vm1978_vm11, %vm1979_vm9  ;;  %v2638_v9 = vpop.eup %2637  ;;  %v2016_v25 = vadd.f32 %v2632_v41, %v2015_v3 }
0x134c   :  { %v1975_v1 = vsub.f32 1.0, %v1974_v11  ;;  %vm1999_vm15 = vmor %vm1997_vm13, %vm1998_vm10 }
0x134d   :  { %v1994_v40 = vsub.f32 1.0, %v1993_v26  ;;  %v2020_v4 = vsel %vm2019_vm3, %v2632_v41, %v2016_v25 }
0x134e   :  { %v1976_v62 = vmul.f32 %v2634_v13, %v1975_v1  ;;  %v2025_v30 = vsel %vm2022_vm4, %v2024_v8, %v2020_v4 }
0x134f   :  { %v1995_v58 = vmul.f32 %v2636_v63, %v1994_v40 }
0x1350   :  { %v1977_v16 = vadd.f32 %v2634_v13, %v1976_v62 }
0x1351   :  { %v1996_v50 = vadd.f32 %v2636_v63, %v1995_v58 }
0x1352   :  { %v1981_v43 = vsel %vm1980_vm12, %v2634_v13, %v1977_v16 }
0x1353   :  { %v1986_v61 = vsel %vm1983_vm14, %v1985_v19, %v1981_v43  ;;  %v2000_v21 = vsel %vm1999_vm15, %v2636_v63, %v1996_v50 }
0x1354   :  { %v2028_v5 = vmul.f32 %v2638_v9, %v1986_v61  ;;  %v2005_v23 = vsel %vm2002_vm0, %v2004_v38, %v2000_v21 }
0x1355   :  { %v2027_v20 = vmul.f32 %v2005_v23, %v3860_v44  ;;  %v2658_v44 = vld [vmem:[%s3930_s7] ss:$0 sm:$0xff] }
0x1357   :  { %v2029_v33 = vadd.f32 %v2028_v5, %v2027_v20 }
0x1359   :  { %2639 = vtanh.f32 %v2029_v33 }
0x135f   :  { %v2640_v17 = vpop.eup %2639 }
0x1360   :  { %v2031_v34 = vmul.f32 %v2640_v17, %v2025_v30 }
0x1362   :  { %v2032_v45 = vpack.c.bf16 %v2031_v34, %v2031_v34 }
0x1364   :  { %2041 = vmatmul.bf16.vlgmr.msrb.gmra.mxu2 %v2032_v45 }
0x13e7   :  { %v2042_v48 = vpop.f32.mrf.mxu2 }
0x13e8   :  { %v2043_v51 = vadd.f32 %v2658_v44, %v2042_v48 }
0x13ea   :  { %2444 = vst [vmem:[%s3931_s8 + $0x38] sm:$0xff] %v2043_v51 }
0x13ef   :  { %v2044_v57 = vpop.f32.mrf.mxu2 }
0x13f0   :  { %2052 = vsyncpa [#allocation3], 1 }
0x13f1   :  { %2053 = vsyncpa [#allocation4], 1 }

</bundles_post_ra>
